<compile_context>
chip_gen: v7x
topology: tpu7x:2x2x1
jax: 0.10.0
libtpu: 0.0.40
codegen_flags: <defaults>
</compile_context>

<pallas_src>
import functools

import jax
import jax.numpy as jnp
from jax.experimental import pallas as pl
from jax.experimental.pallas import tpu as pltpu

_VMEM_BUDGET = 40 * 1024 * 1024  # headroom inside v7x's 64 MiB physical VMEM


def _round_up(x, m):
    return ((x + m - 1) // m) * m


# --------------------------------------------------------------------------- #
# Kernel
# --------------------------------------------------------------------------- #
def _gated_attn_kernel(x_ref, wab_ref, bab_ref, wct_ref, bct_ref, out_ref, *,
                       hidden_dim):
    """One row tile: out (nc, TM) = Wc^T @ (tanh(xWa+ba) * sigmoid(xWb+bb))^T + bc."""
    # x tile (TM, L): cast to bf16 for the MXU only (no-op if x is already bf16).
    x = x_ref[...].astype(jnp.bfloat16)
    # Fused first layer: one MXU pass of output width 2D, f32 accumulation,
    # f32 bias add.  hidden_dim is a multiple of 128 so the two halves of h are
    # lane-tile aligned slices (no hidden VMEM copies).
    h = jnp.dot(x, wab_ref[...], preferred_element_type=jnp.float32) + bab_ref[...]
    a = jnp.tanh(h[:, :hidden_dim])          # (TM, D) f32, EUP
    b = jax.nn.sigmoid(h[:, hidden_dim:])    # (TM, D) f32, EUP
    gated = a * b                            # (TM, D) f32, VPU

    # Classifier as (nc, D) x (TM, D) contracting D -> (nc, TM).  The TM axis is
    # lane-dense so the store / writeback DMA is unmasked and only nc * TM floats
    # are written per tile (no 128-wide class padding, no broadcast slab).
    att = jax.lax.dot_general(
        wct_ref[...], gated.astype(jnp.bfloat16),
        dimension_numbers=(((1,), (1,)), ((), ())),
        preferred_element_type=jnp.float32)
    out_ref[...] = att + bct_ref[...]        # bc broadcast (nc, 1) -> (nc, TM)


# --------------------------------------------------------------------------- #
# Wrapper
# --------------------------------------------------------------------------- #
def prepare_attn_params(wa, ba, wb, bb, wc, bc):
    """One-time weight prep (hoisted out of the per-call forward).

    Weights are (in_features, out_features); biases are (1, out_features).
    Returns (wab, bab, wct, bct) ready for attn_net_gated_forward.
    """
    wab = jnp.concatenate([wa, wb], axis=1).astype(jnp.bfloat16)   # (L, 2D)
    bab = jnp.concatenate([ba, bb], axis=1).astype(jnp.float32)    # (1, 2D)
    wct = jnp.transpose(wc).astype(jnp.bfloat16)                   # (nc, D)
    bct = jnp.transpose(bc).astype(jnp.float32)                    # (nc, 1)
    return wab, bab, wct, bct


def _vmem_bytes(tm, L, D, nc, x_itemsize):
    """Conservative per-grid-step VMEM estimate (buffers + Mosaic intermediates)."""
    weights = L * 2 * D * 2 + 2 * D * 4 + nc * D * 2 + nc * 4
    per_tile = (2 * tm * L * x_itemsize      # double-buffered x tiles
                + 2 * nc * tm * 4            # double-buffered output tiles
                + tm * L * 2                 # bf16 copy of x
                + tm * 2 * D * 4             # h
                + 3 * tm * D * 4             # a, b, gated
                + nc * tm * 4)               # att
    return per_tile + 2 * weights            # worst case: weights double-buffered


def attn_net_gated_forward(x, params, *, block_rows=1024):
    """Pallas-backed Attn_Net_Gated forward. Returns (A, x) like the module.

    x may be f32 or bf16 (bf16 halves the dominant HBM read traffic); MXU
    operands are bf16 with f32 accumulation (~1e-3 rel error vs pure f32 torch).
    """
    wab, bab, wct, bct = params
    N, L = x.shape
    two_d = wab.shape[1]
    D = two_d // 2
    nc = wct.shape[0]
    x_itemsize = jnp.dtype(x.dtype).itemsize

    # Row tile: multiple of 256 (256-wide MXU on v6e/v7x, >=128 for v5e), capped so
    # (a) the grid has >= 2 steps whenever N allows it (v7x: both TensorCores get
    # work) and (b) the tile fits the v7x VMEM budget.  No padding of x: the last
    # tile is a partial boundary block.
    tm = min(_round_up(max(block_rows, 256), 256),
             _round_up(pl.cdiv(N, 2), 256))
    while tm > 256 and _vmem_bytes(tm, L, D, nc, x_itemsize) > _VMEM_BUDGET:
        tm -= 256
    grid_n = pl.cdiv(N, tm)

    est = _vmem_bytes(tm, L, D, nc, x_itemsize)
    vmem_limit = int(min(max(2 * est, 32 * 1024 * 1024), 60 * 1024 * 1024))

    cost = pl.CostEstimate(
        flops=2 * N * L * two_d + 2 * N * D * nc + 6 * N * D,
        transcendentals=2 * N * D,
        bytes_accessed=(N * L * x_itemsize + wab.size * 2 + bab.size * 4
                        + wct.size * 2 + bct.size * 4 + grid_n * nc * tm * 4),
    )

    kernel = functools.partial(_gated_attn_kernel, hidden_dim=D)

    def run(single_buffer_weights):
        if single_buffer_weights:
            # Constant-index-map operands are DMA'd once; single-buffer them to
            # free VMEM (matters most under v7x's 64 MiB).
            def resident(shape):
                return pl.BlockSpec(shape, lambda *_: (0,) * len(shape),
                                    pipeline_mode=pl.Buffered(1))
        else:
            def resident(shape):
                return pl.BlockSpec(shape, lambda *_: (0,) * len(shape))

        return pl.pallas_call(
            kernel,
            out_shape=jax.ShapeDtypeStruct((grid_n, nc, tm), jnp.float32),
            grid=(grid_n,),
            in_specs=[
                pl.BlockSpec((tm, L), lambda i: (i, 0)),   # x: streamed row tiles
                resident((L, two_d)),                      # fused Wa|Wb (resident)
                resident((1, two_d)),                      # fused bias (resident)
                resident((nc, D)),                         # Wc^T (resident)
                resident((nc, 1)),                         # bc^T (resident)
            ],
            out_specs=pl.BlockSpec((None, nc, tm), lambda i: (i, 0, 0)),
            compiler_params=pltpu.CompilerParams(
                dimension_semantics=("parallel",),         # v7x: shard rows over TCs
                vmem_limit_bytes=vmem_limit,
            ),
            cost_estimate=cost,
        )(x, wab, bab, wct, bct)

    try:
        out = run(True)
    except Exception:   # pl.Buffered(1) unsupported on this JAX -> default buffering
        out = run(False)

    # (grid_n, nc, tm) -> (N, nc): tiny (N * nc floats) relayout outside the kernel.
    A = out.transpose(0, 2, 1).reshape(grid_n * tm, nc)[:N]
    return A, x


# --------------------------------------------------------------------------- #
# Reference / test harness
# --------------------------------------------------------------------------- #
def init_params(key, L, D, n_classes):
    """torch.nn.Linear-style init (U(+-1/sqrt(fan_in))), weights stored transposed."""
    ks = jax.random.split(key, 6)
    lim1 = 1.0 / jnp.sqrt(float(L))
    lim2 = 1.0 / jnp.sqrt(float(D))
    wa = jax.random.uniform(ks[0], (L, D), jnp.float32, -lim1, lim1)
    ba = jax.random.uniform(ks[1], (1, D), jnp.float32, -lim1, lim1)
    wb = jax.random.uniform(ks[2], (L, D), jnp.float32, -lim1, lim1)
    bb = jax.random.uniform(ks[3], (1, D), jnp.float32, -lim1, lim1)
    wc = jax.random.uniform(ks[4], (D, n_classes), jnp.float32, -lim2, lim2)
    bc = jax.random.uniform(ks[5], (1, n_classes), jnp.float32, -lim2, lim2)
    return wa, ba, wb, bb, wc, bc


def _reference(x, wa, ba, wb, bb, wc, bc, mxu_dtype):
    """Pure-JAX reference; mxu_dtype mirrors the kernel's MXU operand casting."""
    D = wa.shape[1]
    wab = jnp.concatenate([wa, wb], axis=1)
    bab = jnp.concatenate([ba, bb], axis=1)
    h = jnp.dot(x.astype(mxu_dtype), wab.astype(mxu_dtype),
                preferred_element_type=jnp.float32) + bab
    a = jnp.tanh(h[:, :D])
    b = jax.nn.sigmoid(h[:, D:])
    gated = a * b
    A = jnp.dot(gated.astype(mxu_dtype), wc.astype(mxu_dtype),
                preferred_element_type=jnp.float32) + bc
    return A


if __name__ == "__main__":
    # TODO(synk): dropout (p=0.7) branch not implemented; module default is dropout=False.
    # Module defaults are L=1024, D=256, n_classes=1; shapes below are scaled down
    # but keep D a multiple of 128.  N=300 / 640 are not multiples of the row tile
    # so the un-padded boundary (tail) tile is exercised; the last config exercises
    # bf16 input activations.
    configs = [
        # (N,   L,   D, n_classes, block_rows, x_dtype)
        (300, 512, 128, 1, 256, jnp.float32),    # nc=1, 2 tiles, partial tail tile
        (256, 512, 128, 4, 512, jnp.float32),    # multi-class head, single tile
        (640, 256, 128, 3, 1024, jnp.bfloat16),  # bf16 activations, partial tail
    ]

    key = jax.random.PRNGKey(0)
    for (N, L, D, n_classes, block_rows, x_dtype) in configs:
        key, k_x, k_p = jax.random.split(key, 3)
        x = jax.random.normal(k_x, (N, L), dtype=jnp.float32).astype(x_dtype)
        wa, ba, wb, bb, wc, bc = init_params(k_p, L, D, n_classes)
        params = prepare_attn_params(wa, ba, wb, bb, wc, bc)

        A, x_out = attn_net_gated_forward(x, params, block_rows=block_rows)
        A = jax.block_until_ready(A)
        x_out = jax.block_until_ready(x_out)

        assert A.shape == (N, n_classes)
        assert x_out.shape == (N, L)
        assert jnp.array_equal(x_out, x)   # module returns x unchanged

        # Matched-precision reference (bf16 MXU operands, like the kernel).
        A_match = _reference(x.astype(jnp.float32), wa, ba, wb, bb, wc, bc,
                             jnp.bfloat16)
        assert jnp.allclose(A, A_match, atol=3e-4, rtol=3e-4), (
            "mismatch vs matched-precision reference")

        # Loose sanity check vs pure-f32 math (bf16 MXU operands => ~1e-3 error).
        A_f32 = _reference(x.astype(jnp.float32), wa, ba, wb, bb, wc, bc,
                           jnp.float32)
        assert jnp.allclose(A, A_f32, atol=5e-2, rtol=5e-2), (
            "mismatch vs f32 reference")

    print("KERNEL_OK")
</pallas_src>

<mosaic_0001>
module attributes {stable_mosaic.version = 11 : i64} {
  func.func @_gated_attn_kernel(%arg0: i32, %arg1: memref<256x512xf32, #tpu.memory_space<vmem>>, %arg2: memref<512x256xbf16, #tpu.memory_space<vmem>>, %arg3: memref<1x256xf32, #tpu.memory_space<vmem>>, %arg4: memref<1x128xbf16, #tpu.memory_space<vmem>>, %arg5: memref<1x1xf32, #tpu.memory_space<vmem>>, %arg6: memref<1x1x256xf32, #tpu.memory_space<vmem>>) attributes {dimension_semantics = [#tpu.dimension_semantics<parallel>], iteration_bounds = array<i64: 2>, scalar_prefetch = 0 : i64, scratch_operands = 0 : i64, tpu.core_type = #tpu.core_type<tc>, window_params = [{transform_indices = @transform_0, window_bounds = array<i64: 256, 512>}, {pipeline_mode = #tpu.pipeline_mode<synchronous>, transform_indices = @transform_1, window_bounds = array<i64: 512, 256>}, {pipeline_mode = #tpu.pipeline_mode<synchronous>, transform_indices = @transform_2, window_bounds = array<i64: 1, 256>}, {pipeline_mode = #tpu.pipeline_mode<synchronous>, transform_indices = @transform_3, window_bounds = array<i64: 1, 128>}, {pipeline_mode = #tpu.pipeline_mode<synchronous>, transform_indices = @transform_4, window_bounds = array<i64: 1, 1>}, {transform_indices = @transform_5, window_bounds = array<i64: 1, 1, 256>}]} {
    %c0 = arith.constant 0 : index
    %c0_0 = arith.constant 0 : index
    %0 = vector.load %arg1[%c0, %c0_0] : memref<256x512xf32, #tpu.memory_space<vmem>>, vector<256x512xf32>
    %1 = arith.truncf %0 : vector<256x512xf32> to vector<256x512xbf16>
    %c0_1 = arith.constant 0 : index
    %c0_2 = arith.constant 0 : index
    %2 = vector.load %arg2[%c0_1, %c0_2] : memref<512x256xbf16, #tpu.memory_space<vmem>>, vector<512x256xbf16>
    %cst = arith.constant dense<0.000000e+00> : vector<256x256xf32>
    %3 = tpu.matmul %1, %2, %cst {dimension_numbers = #tpu.dot_dimension_numbers<[1], [0], [0], [1], [0, 0, 1, 1], [], []>} : vector<256x512xbf16>, vector<512x256xbf16>, vector<256x256xf32> -> vector<256x256xf32>
    %c0_3 = arith.constant 0 : index
    %c0_4 = arith.constant 0 : index
    %4 = vector.load %arg3[%c0_3, %c0_4] : memref<1x256xf32, #tpu.memory_space<vmem>>, vector<1x256xf32>
    %5 = vector.broadcast %4 : vector<1x256xf32> to vector<256x256xf32>
    %6 = arith.addf %3, %5 : vector<256x256xf32>
    %7 = vector.extract_strided_slice %6 {offsets = [0, 0], sizes = [256, 128], strides = [1, 1]} : vector<256x256xf32> to vector<256x128xf32>
    %8 = math.tanh %7 : vector<256x128xf32>
    %9 = vector.extract_strided_slice %6 {offsets = [0, 128], sizes = [256, 128], strides = [1, 1]} : vector<256x256xf32> to vector<256x128xf32>
    %10 = arith.negf %9 : vector<256x128xf32>
    %11 = math.exp %10 : vector<256x128xf32>
    %cst_5 = arith.constant 1.000000e+00 : f32
    %12 = vector.broadcast %cst_5 : f32 to vector<256x128xf32>
    %13 = arith.addf %12, %11 : vector<256x128xf32>
    %14 = arith.divf %12, %13 : vector<256x128xf32>
    %15 = arith.mulf %8, %14 : vector<256x128xf32>
    %c0_6 = arith.constant 0 : index
    %c0_7 = arith.constant 0 : index
    %16 = vector.load %arg4[%c0_6, %c0_7] : memref<1x128xbf16, #tpu.memory_space<vmem>>, vector<1x128xbf16>
    %17 = arith.truncf %15 : vector<256x128xf32> to vector<256x128xbf16>
    %cst_8 = arith.constant dense<0.000000e+00> : vector<1x256xf32>
    %18 = tpu.matmul %16, %17, %cst_8 {dimension_numbers = #tpu.dot_dimension_numbers<[1], [1], [0], [0], [0, 0, 1, 0], [], []>} : vector<1x128xbf16>, vector<256x128xbf16>, vector<1x256xf32> -> vector<1x256xf32>
    %c0_9 = arith.constant 0 : index
    %c0_10 = arith.constant 0 : index
    %19 = vector.load %arg5[%c0_9, %c0_10] : memref<1x1xf32, #tpu.memory_space<vmem>>, vector<1x1xf32>
    %20 = vector.broadcast %19 : vector<1x1xf32> to vector<1x256xf32>
    %21 = arith.addf %18, %20 : vector<1x256xf32>
    %c0_11 = arith.constant 0 : index
    %c0_12 = arith.constant 0 : index
    %c0_13 = arith.constant 0 : index
    %22 = vector.load %arg6[%c0_11, %c0_12, %c0_13] : memref<1x1x256xf32, #tpu.memory_space<vmem>>, vector<1x1x256xf32>
    %23 = vector.shape_cast %22 : vector<1x1x256xf32> to vector<1x256xf32>
    %24 = vector.shape_cast %21 : vector<1x256xf32> to vector<1x1x256xf32>
    tpu.vector_store %arg6[%c0_11, %c0_12, %c0_13], %24 {strides = array<i32>} : memref<1x1x256xf32, #tpu.memory_space<vmem>>, vector<1x1x256xf32>,
    return
  }
  func.func @transform_0(%arg0: i32) -> (i32, i32) {
    %c0_i32 = arith.constant 0 : i32
    %c0_i32_0 = arith.constant 0 : i32
    return %arg0, %c0_i32 : i32, i32
  }
  func.func @transform_1(%arg0: i32) -> (i32, i32) {
    %c0_i32 = arith.constant 0 : i32
    %c0_i32_0 = arith.constant 0 : i32
    %c0_i32_1 = arith.constant 0 : i32
    return %c0_i32, %c0_i32_0 : i32, i32
  }
  func.func @transform_2(%arg0: i32) -> (i32, i32) {
    %c0_i32 = arith.constant 0 : i32
    %c0_i32_0 = arith.constant 0 : i32
    %c0_i32_1 = arith.constant 0 : i32
    return %c0_i32, %c0_i32_0 : i32, i32
  }
  func.func @transform_3(%arg0: i32) -> (i32, i32) {
    %c0_i32 = arith.constant 0 : i32
    %c0_i32_0 = arith.constant 0 : i32
    %c0_i32_1 = arith.constant 0 : i32
    return %c0_i32, %c0_i32_0 : i32, i32
  }
  func.func @transform_4(%arg0: i32) -> (i32, i32) {
    %c0_i32 = arith.constant 0 : i32
    %c0_i32_0 = arith.constant 0 : i32
    %c0_i32_1 = arith.constant 0 : i32
    return %c0_i32, %c0_i32_0 : i32, i32
  }
  func.func @transform_5(%arg0: i32) -> (i32, i32, i32) {
    %c0_i32 = arith.constant 0 : i32
    %c0_i32_0 = arith.constant 0 : i32
    %c0_i32_1 = arith.constant 0 : i32
    return %arg0, %c0_i32, %c0_i32_0 : i32, i32, i32
  }
}

module attributes {stable_mosaic.version = 11 : i64} {
  func.func @_gated_attn_kernel(%arg0: i32, %arg1: memref<256x512xf32, #tpu.memory_space<vmem>>, %arg2: memref<512x256xbf16, #tpu.memory_space<vmem>>, %arg3: memref<1x256xf32, #tpu.memory_space<vmem>>, %arg4: memref<1x128xbf16, #tpu.memory_space<vmem>>, %arg5: memref<1x1xf32, #tpu.memory_space<vmem>>, %arg6: memref<1x1x256xf32, #tpu.memory_space<vmem>>) attributes {dimension_semantics = [#tpu.dimension_semantics<parallel>], iteration_bounds = array<i64: 2>, scalar_prefetch = 0 : i64, scratch_operands = 0 : i64, tpu.core_type = #tpu.core_type<tc>, window_params = [{transform_indices = @transform_0, window_bounds = array<i64: 256, 512>}, {pipeline_mode = #tpu.pipeline_mode<synchronous>, transform_indices = @transform_1, window_bounds = array<i64: 512, 256>}, {pipeline_mode = #tpu.pipeline_mode<synchronous>, transform_indices = @transform_2, window_bounds = array<i64: 1, 256>}, {pipeline_mode = #tpu.pipeline_mode<synchronous>, transform_indices = @transform_3, window_bounds = array<i64: 1, 128>}, {pipeline_mode = #tpu.pipeline_mode<synchronous>, transform_indices = @transform_4, window_bounds = array<i64: 1, 1>}, {transform_indices = @transform_5, window_bounds = array<i64: 1, 1, 256>}]} {
    %c0 = arith.constant 0 : index
    %c0_0 = arith.constant 0 : index
    %0 = vector.load %arg1[%c0, %c0_0] : memref<256x512xf32, #tpu.memory_space<vmem>>, vector<256x512xf32>
    %1 = arith.truncf %0 : vector<256x512xf32> to vector<256x512xbf16>
    %c0_1 = arith.constant 0 : index
    %c0_2 = arith.constant 0 : index
    %2 = vector.load %arg2[%c0_1, %c0_2] : memref<512x256xbf16, #tpu.memory_space<vmem>>, vector<512x256xbf16>
    %cst = arith.constant dense<0.000000e+00> : vector<256x256xf32>
    %3 = tpu.matmul %1, %2, %cst {dimension_numbers = #tpu.dot_dimension_numbers<[1], [0], [0], [1], [0, 0, 1, 1], [], []>} : vector<256x512xbf16>, vector<512x256xbf16>, vector<256x256xf32> -> vector<256x256xf32>
    %c0_3 = arith.constant 0 : index
    %c0_4 = arith.constant 0 : index
    %4 = vector.load %arg3[%c0_3, %c0_4] : memref<1x256xf32, #tpu.memory_space<vmem>>, vector<1x256xf32>
    %5 = vector.broadcast %4 : vector<1x256xf32> to vector<256x256xf32>
    %6 = arith.addf %3, %5 : vector<256x256xf32>
    %7 = vector.extract_strided_slice %6 {offsets = [0, 0], sizes = [256, 128], strides = [1, 1]} : vector<256x256xf32> to vector<256x128xf32>
    %8 = math.tanh %7 : vector<256x128xf32>
    %9 = vector.extract_strided_slice %6 {offsets = [0, 128], sizes = [256, 128], strides = [1, 1]} : vector<256x256xf32> to vector<256x128xf32>
    %10 = arith.negf %9 : vector<256x128xf32>
    %11 = math.exp %10 : vector<256x128xf32>
    %cst_5 = arith.constant 1.000000e+00 : f32
    %12 = vector.broadcast %cst_5 : f32 to vector<256x128xf32>
    %13 = arith.addf %12, %11 : vector<256x128xf32>
    %14 = arith.divf %12, %13 : vector<256x128xf32>
    %15 = arith.mulf %8, %14 : vector<256x128xf32>
    %c0_6 = arith.constant 0 : index
    %c0_7 = arith.constant 0 : index
    %16 = vector.load %arg4[%c0_6, %c0_7] : memref<1x128xbf16, #tpu.memory_space<vmem>>, vector<1x128xbf16>
    %17 = arith.truncf %15 : vector<256x128xf32> to vector<256x128xbf16>
    %cst_8 = arith.constant dense<0.000000e+00> : vector<1x256xf32>
    %18 = tpu.matmul %16, %17, %cst_8 {dimension_numbers = #tpu.dot_dimension_numbers<[1], [1], [0], [0], [0, 0, 1, 0], [], []>} : vector<1x128xbf16>, vector<256x128xbf16>, vector<1x256xf32> -> vector<1x256xf32>
    %c0_9 = arith.constant 0 : index
    %c0_10 = arith.constant 0 : index
    %19 = vector.load %arg5[%c0_9, %c0_10] : memref<1x1xf32, #tpu.memory_space<vmem>>, vector<1x1xf32>
    %20 = vector.broadcast %19 : vector<1x1xf32> to vector<1x256xf32>
    %21 = arith.addf %18, %20 : vector<1x256xf32>
    %c0_11 = arith.constant 0 : index
    %c0_12 = arith.constant 0 : index
    %c0_13 = arith.constant 0 : index
    %22 = vector.load %arg6[%c0_11, %c0_12, %c0_13] : memref<1x1x256xf32, #tpu.memory_space<vmem>>, vector<1x1x256xf32>
    %23 = vector.shape_cast %22 : vector<1x1x256xf32> to vector<1x256xf32>
    %24 = vector.shape_cast %21 : vector<1x256xf32> to vector<1x1x256xf32>
    tpu.vector_store %arg6[%c0_11, %c0_12, %c0_13], %24 {strides = array<i32>} : memref<1x1x256xf32, #tpu.memory_space<vmem>>, vector<1x1x256xf32>,
    return
  }
  func.func @transform_0(%arg0: i32) -> (i32, i32) {
    %c0_i32 = arith.constant 0 : i32
    %c0_i32_0 = arith.constant 0 : i32
    return %arg0, %c0_i32 : i32, i32
  }
  func.func @transform_1(%arg0: i32) -> (i32, i32) {
    %c0_i32 = arith.constant 0 : i32
    %c0_i32_0 = arith.constant 0 : i32
    %c0_i32_1 = arith.constant 0 : i32
    return %c0_i32, %c0_i32_0 : i32, i32
  }
  func.func @transform_2(%arg0: i32) -> (i32, i32) {
    %c0_i32 = arith.constant 0 : i32
    %c0_i32_0 = arith.constant 0 : i32
    %c0_i32_1 = arith.constant 0 : i32
    return %c0_i32, %c0_i32_0 : i32, i32
  }
  func.func @transform_3(%arg0: i32) -> (i32, i32) {
    %c0_i32 = arith.constant 0 : i32
    %c0_i32_0 = arith.constant 0 : i32
    %c0_i32_1 = arith.constant 0 : i32
    return %c0_i32, %c0_i32_0 : i32, i32
  }
  func.func @transform_4(%arg0: i32) -> (i32, i32) {
    %c0_i32 = arith.constant 0 : i32
    %c0_i32_0 = arith.constant 0 : i32
    %c0_i32_1 = arith.constant 0 : i32
    return %c0_i32, %c0_i32_0 : i32, i32
  }
  func.func @transform_5(%arg0: i32) -> (i32, i32, i32) {
    %c0_i32 = arith.constant 0 : i32
    %c0_i32_0 = arith.constant 0 : i32
    %c0_i32_1 = arith.constant 0 : i32
    return %arg0, %c0_i32, %c0_i32_0 : i32, i32, i32
  }
}

</mosaic_0001>

<bundles_post_ra>
// kernel: tpu_custom_call.1
= control target key start
LH: loop header
LB: loop body
LE: loop exit
PB: predicated region body
PF: predicated region fallthrough
CT: control target
= control target key end

     0   :  { %s3040_s0 = inlined_call_operand.hbm [shape: f32[300,512], index: 0, kind: input, shape index: {}]   ;;  %s3041_s1 = inlined_call_operand.hbm [shape: bf16[512,256], index: 1, kind: input, shape index: {}]   ;;  %s3042_s2 = inlined_call_operand.vmem [shape: f32[1,256], index: 2, kind: input, shape index: {}]   ;;  %s3043_s3 = inlined_call_operand.vmem [shape: bf16[1,128], index: 3, kind: input, shape index: {}]   ;;  %s3044_s4 = inlined_call_operand.<no memory space> [shape: f32[1,1], index: 4, kind: input, shape index: {}]   ;;  %s3045_s5 = inlined_call_operand.hbm [shape: f32[2,1,256], index: 5, kind: output, shape index: {}]  }
   0x1   :  { %v10_v0 = vstv %s3044_s4 }
   0x2   :  { %11 = vst [vmem:[#allocation2] sm:$0x1] %v10_v0 }
   0x3   :  { %12 = vsyncpa [#allocation4], 0 }
   0x4   :  { %14 = vsyncpa [#allocation4 + $0x1], 0 }
   0x5   :  { %15 = vsyncpa [#allocation7], 0 }
   0x6   :  { %16 = vsyncpa [#allocation5], 0 }
   0x7   :  { %18 = vsyncpa [#allocation5 + $0x1], 0  ;;  %s2475_s20 = smov 0   ;;  %s2477_s21 = smov 0  }
   0x8   :  { %s2479_s22 = smov 0   ;;  %s2481_s23 = smov 0  }
   0x9 LB: > { %s2496_s4 = sadd.s32 4294967295, %s2431_s23   ;;  %s1691_s24 = sadd.s32 4294967294, %s2431_s23   ;;  %s2431_s23 = sphi %s2481_s23, %s3066_s23   ;;  %s2427_s22 = sphi %s2479_s22, %s3065_s22   ;;  %s2423_s21 = sphi %s2477_s21, %s3064_s21   ;;  %s2419_s20 = sphi %s2475_s20, %s3063_s20  }
   0xa   : > { %s2500_s25 = sadd.s32 1, %s2431_s23   ;;  %s31_s26 = sadd.s32 1, %s2427_s22 }
   0xb   : > { %s28_s27 = ssub.s32 %s2431_s23, %s2500_s25  ;;  %p38_p0 = scmp.ne.s32.totalorder %s2427_s22, %s2423_s21 }
   0xc   : > { %p29_p1 = scmp.eq.s32.totalorder %s28_s27, 0  ;;  %p39_p2 = scmp.eq.s32.totalorder %s2431_s23, 0 }
   0xd   : > { %p44_p3 = scmp.ne.s32.totalorder %s2423_s21, %s2419_s20  ;;  %p3046_p4 = scmp.eq.s32.totalorder %s2496_s4, 0 }
   0xe   : > { %s2512_s28 = scalar_select %p29_p1, %s2427_s22, %s31_s26  }
   0xf   : > { %p2514_p5 = por %p39_p2, %p38_p0  ;;  %p2520_p6 = por %p3046_p4, %p44_p3 }
  0x10   : > { %p152_p7 = scmp.eq.s32.totalorder %s2496_s4, 1  ;;  %p158_p8 = scmp.eq.s32.totalorder %s1691_s24, 1 }
  0x11   : > { %s3050_s29 = scalar_select %p2514_p5, 1, 0 }
  0x12   : > { %s3051_s30 = scalar_select %p2520_p6, 1, 0 }
  0x13   : > { %p1692_p9 = scmp.ge.s32.totalorder %s2431_s23, 1  ;;  %p165_p10 = scmp.lt.s32.totalorder %s2431_s23, 3 }
  0x14   : > { %p2527_p11 = por %p152_p7, %p38_p0  ;;  %p2531_p12 = por %p158_p8, %p44_p3 }
  0x15   : > { %p2535_p13 = pnand %p1692_p9, %p165_p10  ;;  %s2433_s9 = smov [#allocation6]  }
  0x16   : > { %s3052_s6 = scalar_select %p2527_p11, 1, 0 }
  0x17   : > { %s3053_s7 = scalar_select %p2531_p12, 1, 0 }
  0x18   : > { %s3054_s8 = scalar_select %p2535_p13, 1, 0 }
  0x19   : > { %p1966_p1 = pneg %p2535_p13  ;;  %s177_s10 = sshll.u32 %s2433_s9, 4  ;;  %s178_s10 = int_to_ptr.vmem [resolvable:$true] %s177_s10 }
  0x1a   : > { %s2305_s14 = scalar_lea.hbm %s3041_s1, 8192 }
  0x1b   : > { %p2543_p2 = pnand %p1966_p1, %p3046_p4  ;;  %p2306_p0 = scmp.ne.s32.totalorder %s3041_s1, %s2305_s14 }
  0x1c   : > { %p2312_p9 = scmp.lt.u32.totalorder %s2305_s14, %s3041_s1 }
  0x1d   : > { %p2307_p3 = pneg %p2543_p2 }
  0x1f   : > { %p2308_p7 = pnand %p2307_p3, %p2306_p0 }
  0x21   : > { %p2309_p8 = pneg %p2308_p7 }
  0x23   : > { %p2314_p10 = pnand %p2312_p9, %p2309_p8 }
  0x25   : > { %2317 = shalt.err (!%p2314_p10)
}
  0x26   : > { %s2318_s19 = scalar_lea.vmem %s178_s10, 8192  ;;  %p2326_p11 = scmp.lt.s32.totalorder %s178_s10, %s178_s10 }
  0x27   : > { %p2319_p1 = scmp.ne.s32.totalorder %s178_s10, %s2318_s19  ;;  %p2327_p6 = scmp.lt.s32.totalorder %s2318_s19, %s2318_s19 }
  0x29   : > { %p2321_p4 = pnand %p2319_p1, %p2307_p3  ;;  %p2328_p13 = por %p2327_p6, %p2326_p11 }
  0x2b   : > { %p2322_p12 = pneg %p2321_p4 }
  0x2d   : > { %p2329_p5 = pnand %p2328_p13, %p2322_p12 }
  0x2f   : > { %2332 = shalt.err (!%p2329_p5)
}
  0x30   : > { %s2434_s24 = smov 128   ;;  %s2435_s26 = smov 8  }
  0x31   : > { %1969 = dma.hbm_to_vmem [thread:$0]  (!%p2543_p2), %s3041_s1, 8192, %s178_s10, [#allocation7], %s2434_s24, %s2434_s24, %s2435_s26  }
  0x32   : > { %p1694_p0 = scmp.ge.s32.totalorder %s2431_s23, 2 }
  0x33   : > { %p3056_p4 = scmp.ne.s32.totalorder (!%p1694_p0), %s3050_s29, 0 }
  0x34   : > { %196 = sbr.rel (%p1694_p0) target bundleno = 94 (0x5e), region = 32 }
  0x3b   : > { %199 = sbr.rel (!%p3056_p4) target bundleno = 94 (0x5e), region = 36  ;;  %s200_s12 = sand.u32 (%p3056_p4), 1, %s2427_s22  }
  0x3c   : > { %s1696_s13 = sshll.u32 (%p3056_p4), %s2431_s23, 5  ;;  %s1695_s14 = sshll.u32 (%p3056_p4), %s200_s12, 10 }
  0x3d   : > { %s206_s15 = ssub.s32 (%p3056_p4), 38, %s1696_s13  ;;  %s2573_s16 = scalar_lea.sflag (%p3056_p4), [#allocation4], %s200_s12 }
  0x3e   : > { %p207_p5 = scmp.lt.s32.totalorder (%p3056_p4), %s206_s15, 32  ;;  %s204_s17 = scalar_lea.vmem (%p3056_p4), [#allocation3], %s1695_s14 }
  0x42   : > { %s3068_s15 = smov (!%p207_p5, %s206_s15), 32 }
  0x43   : > { %s2570_s11 = sshll.u32 %s3068_s15, 9 }
  0x44   : > { %s212_s10 = ssub.s32 16384, %s2570_s11 }
  0x45   : > { %213 = vsyncadd %s2573_s16, %s212_s10  ;;  %p1699_p6 = scmp.ne.s32.totalorder %s2570_s11, 0  ;;  %s1811_s29 = sshll.u32 %s2431_s23, 14 }
  0x46   : > { %s2581_s24 = scalar_lea.hbm %s3040_s0, %s1811_s29  ;;  %s219_s26 = sshll.u32 %s204_s17, 4  ;;  %s2583_s26 = int_to_ptr.vmem [resolvable:$true] %s219_s26 }
  0x47   : > { %s2333_s27 = scalar_lea.hbm %s2581_s24, %s2570_s11  ;;  %s2337_s13 = scalar_lea.hbm %s3040_s0, 19456 }
  0x48   : > { %p2334_p11 = scmp.ne.s32.totalorder %s2581_s24, %s2333_s27  ;;  %p2338_p2 = scmp.lt.u32.totalorder %s2581_s24, %s3040_s0 }
  0x49   : > { %p2339_p3 = scmp.lt.u32.totalorder %s2337_s13, %s2333_s27  ;;  %p2341_p8 = scmp.lt.u32.totalorder %s2333_s27, %s2581_s24 }
  0x4a   : > { %p2335_p12 = pnand %p2334_p11, %p1699_p6 }
  0x4b   : > { %p2340_p7 = por %p2339_p3, %p2338_p2 }
  0x4c   : > { %p2336_p13 = pneg %p2335_p12 }
  0x4d   : > { %p2342_p9 = por %p2341_p8, %p2340_p7 }
  0x4f   : > { %p2343_p10 = pnand %p2342_p9, %p2336_p13 }
  0x51   : > { %2346 = shalt.err (!%p2343_p10)
}
  0x52   : > { %s2347_s10 = scalar_lea.vmem %s2583_s26, %s2570_s11  ;;  %s2436_s17 = smov [#allocation3]  }
  0x53   : > { %p2348_p1 = scmp.ne.s32.totalorder %s2583_s26, %s2347_s10  ;;  %s2351_s29 = sshll.u32 %s2436_s17, 4  ;;  %s2352_s29 = int_to_ptr.vmem [resolvable:$false] %s2351_s29 }
  0x54   : > { %s2353_s18 = scalar_lea.vmem %s2352_s29, 32768  ;;  %p2354_p11 = scmp.lt.s32.totalorder %s2583_s26, %s2352_s29 }
  0x55   : > { %p2349_p4 = pnand %p2348_p1, %p1699_p6  ;;  %p2355_p12 = scmp.lt.s32.totalorder %s2353_s18, %s2347_s10 }
  0x57   : > { %p2350_p5 = pneg %p2349_p4  ;;  %p2356_p2 = por %p2355_p12, %p2354_p11 }
  0x59   : > { %p2357_p3 = pnand %p2356_p2, %p2350_p5 }
  0x5b   : > { %2360 = shalt.err (!%p2357_p3)
}
  0x5c   : > { %s2437_s19 = smov 512   ;;  %s2438_s27 = smov 32  }
  0x5d   : > { %225 = dma.hbm_to_vmem [thread:$0]  (%p1699_p6), %s2581_s24, %s2570_s11, %s2583_s26, %s2573_s16, %s2437_s19, %s2437_s19, %s2438_s27  }
  0x5e PF: > { %p3057_p13 = scmp.ne.s32.totalorder %s3054_s8, 0 }
  0x5f   : > { %s2613_s9 = sand.u32 (!%p3057_p13), 1, %s2423_s21   ;;  %p3058_p7 = scmp.ne.s32.totalorder (!%p3057_p13), %s3051_s30, 0 }
  0x60   : > { %231 = sbr.rel (%p3057_p13) target bundleno = 786 (0x312), region = 40  ;;  %s1705_s12 = sshll.u32 (!%p3057_p13), %s2613_s9, 10 }
  0x61   : > { %s234_s13 = scalar_lea.sflag (!%p3057_p13), [#allocation4], %s2613_s9  ;;  %s2617_s14 = scalar_lea.vmem (!%p3057_p13), [#allocation3], %s1705_s12 }
  0x67   : > { %2406 = dma.done.wait (%p3058_p7), %s234_s13, 16384  }
  0x68   : > { %2408 = vsyncadd (%p3058_p7), %s234_s13, 4294950912  ;;  %p3059_p6 = scmp.eq.s32.totalorder %s2496_s4, 0 }
  0x6a   : > { %2410 = dma.done.wait (%p3059_p6), [#allocation7], 8192   ;;  %p3060_p8 = pmov %p3059_p6 }
  0x6b   : > { %v2017_v1 = vld [vmem:[#allocation6 + $0x4] ss:$8 sps:$4 sm:$0xff]   ;;  %v2021_v3 = vld [vmem:[#allocation6] ss:$8 sps:$4 sm:$0xff]   ;;  %v2023_v5 = vld [vmem:[#allocation6 + $0x14] ss:$8 sps:$4 sm:$0xff]  }
  0x6c   : > { %2412 = vsyncadd (%p3060_p8), [#allocation7], 4294959104  ;;  %v2019_v2 = vld [vmem:[#allocation6 + $0x104] ss:$8 sps:$4 sm:$0xff]   ;;  %863 = vmatprep.subr.bf16.mxu1 %v2017_v1  ;;  %v2022_v4 = vld [vmem:[#allocation6 + $0x100] ss:$8 sps:$4 sm:$0xff]  }
  0x6d   : > { %1056 = vmatprep.subr.bf16.mxu0 %v2019_v2  ;;  %864 = vmatpush1.bf16.msra.mxu1 %v2021_v3  ;;  %v2025_v6 = vld [vmem:[#allocation6 + $0x114] ss:$8 sps:$4 sm:$0xff]   ;;  %v2027_v7 = vld [vmem:[#allocation6 + $0x10] ss:$8 sps:$4 sm:$0xff]   ;;  %v2029_v9 = vld [vmem:[#allocation6 + $0x24] ss:$8 sps:$4 sm:$0xff]  }
  0x6e   : > { %1057 = vmatpush1.bf16.msra.mxu0 %v2022_v4  ;;  %865 = vmatprep.subr.bf16.mxu1 %v2023_v5  ;;  %v2028_v8 = vld [vmem:[#allocation6 + $0x110] ss:$8 sps:$4 sm:$0xff]   ;;  %v2031_v10 = vld [vmem:[#allocation6 + $0x124] ss:$8 sps:$4 sm:$0xff]   ;;  %v2033_v11 = vld [vmem:[#allocation6 + $0x20] ss:$8 sps:$4 sm:$0xff]  }
  0x6f   : > { %1058 = vmatprep.subr.bf16.mxu0 %v2025_v6  ;;  %v2034_v12 = vld [vmem:[#allocation6 + $0x120] ss:$8 sps:$4 sm:$0xff]   ;;  %v2035_v13 = vld [vmem:[#allocation6 + $0x34] ss:$8 sps:$4 sm:$0xff]   ;;  %v2039_v15 = vld [vmem:[#allocation6 + $0x30] ss:$8 sps:$4 sm:$0xff]  }
  0x70   : > { %v2037_v14 = vld [vmem:[#allocation6 + $0x134] ss:$8 sps:$4 sm:$0xff]   ;;  %v2040_v16 = vld [vmem:[#allocation6 + $0x130] ss:$8 sps:$4 sm:$0xff]   ;;  %v2041_v17 = vld [vmem:[#allocation6 + $0x44] ss:$8 sps:$4 sm:$0xff]  }
  0x71   : > { %866 = vmatpush1.bf16.msra.mxu1 %v2027_v7  ;;  %v2043_v18 = vld [vmem:[#allocation6 + $0x144] ss:$8 sps:$4 sm:$0xff]   ;;  %v2045_v19 = vld [vmem:[#allocation6 + $0x40] ss:$8 sps:$4 sm:$0xff]   ;;  %v2047_v21 = vld [vmem:[#allocation6 + $0x54] ss:$8 sps:$4 sm:$0xff]  }
  0x72   : > { %1059 = vmatpush1.bf16.msra.mxu0 %v2028_v8  ;;  %867 = vmatprep.subr.bf16.mxu1 %v2029_v9  ;;  %v2046_v20 = vld [vmem:[#allocation6 + $0x140] ss:$8 sps:$4 sm:$0xff]   ;;  %v2049_v22 = vld [vmem:[#allocation6 + $0x154] ss:$8 sps:$4 sm:$0xff]   ;;  %v2051_v23 = vld [vmem:[#allocation6 + $0x50] ss:$8 sps:$4 sm:$0xff]  }
  0x73   : > { %1060 = vmatprep.subr.bf16.mxu0 %v2031_v10  ;;  %v2052_v24 = vld [vmem:[#allocation6 + $0x150] ss:$8 sps:$4 sm:$0xff]   ;;  %v2053_v25 = vld [vmem:[#allocation6 + $0x64] ss:$8 sps:$4 sm:$0xff]   ;;  %v2057_v27 = vld [vmem:[#allocation6 + $0x60] ss:$8 sps:$4 sm:$0xff]  }
  0x74   : > { %v2055_v26 = vld [vmem:[#allocation6 + $0x164] ss:$8 sps:$4 sm:$0xff]   ;;  %v2058_v28 = vld [vmem:[#allocation6 + $0x160] ss:$8 sps:$4 sm:$0xff]   ;;  %v2059_v29 = vld [vmem:[#allocation6 + $0x74] ss:$8 sps:$4 sm:$0xff]  }
  0x75   : > { %868 = vmatpush1.bf16.msra.mxu1 %v2033_v11  ;;  %v2061_v30 = vld [vmem:[#allocation6 + $0x174] ss:$8 sps:$4 sm:$0xff]   ;;  %v2063_v31 = vld [vmem:[#allocation6 + $0x70] ss:$8 sps:$4 sm:$0xff]   ;;  %v2065_v33 = vld [vmem:[#allocation6 + $0x84] ss:$8 sps:$4 sm:$0xff]  }
  0x76   : > { %1061 = vmatpush1.bf16.msra.mxu0 %v2034_v12  ;;  %869 = vmatprep.subr.bf16.mxu1 %v2035_v13  ;;  %v2064_v32 = vld [vmem:[#allocation6 + $0x170] ss:$8 sps:$4 sm:$0xff]   ;;  %v2067_v34 = vld [vmem:[#allocation6 + $0x184] ss:$8 sps:$4 sm:$0xff]   ;;  %v2069_v35 = vld [vmem:[#allocation6 + $0x80] ss:$8 sps:$4 sm:$0xff]  }
  0x77   : > { %1062 = vmatprep.subr.bf16.mxu0 %v2037_v14  ;;  %v2070_v36 = vld [vmem:[#allocation6 + $0x180] ss:$8 sps:$4 sm:$0xff]   ;;  %v2071_v37 = vld [vmem:[#allocation6 + $0x94] ss:$8 sps:$4 sm:$0xff]   ;;  %v2075_v39 = vld [vmem:[#allocation6 + $0x90] ss:$8 sps:$4 sm:$0xff]  }
  0x78   : > { %v2073_v38 = vld [vmem:[#allocation6 + $0x194] ss:$8 sps:$4 sm:$0xff]   ;;  %v2076_v40 = vld [vmem:[#allocation6 + $0x190] ss:$8 sps:$4 sm:$0xff]   ;;  %v2077_v41 = vld [vmem:[#allocation6 + $0xa4] ss:$8 sps:$4 sm:$0xff]  }
  0x79   : > { %870 = vmatpush1.bf16.msra.mxu1 %v2039_v15  ;;  %v2079_v42 = vld [vmem:[#allocation6 + $0x1a4] ss:$8 sps:$4 sm:$0xff]   ;;  %v2081_v43 = vld [vmem:[#allocation6 + $0xa0] ss:$8 sps:$4 sm:$0xff]   ;;  %v2083_v45 = vld [vmem:[#allocation6 + $0xb4] ss:$8 sps:$4 sm:$0xff]  }
  0x7a   : > { %1063 = vmatpush1.bf16.msra.mxu0 %v2040_v16  ;;  %871 = vmatprep.subr.bf16.mxu1 %v2041_v17  ;;  %v2082_v44 = vld [vmem:[#allocation6 + $0x1a0] ss:$8 sps:$4 sm:$0xff]   ;;  %v2085_v46 = vld [vmem:[#allocation6 + $0x1b4] ss:$8 sps:$4 sm:$0xff]   ;;  %v2087_v51 = vld [vmem:[#allocation6 + $0xb0] ss:$8 sps:$4 sm:$0xff]  }
  0x7b   : > { %1064 = vmatprep.subr.bf16.mxu0 %v2043_v18  ;;  %v276_v47 = vld [vmem:[%s2617_s14 + $0x8] sm:$0xff]  ;;  %v278_v49 = vld [vmem:[%s2617_s14 + $0x18] sm:$0xff]  ;;  %v275_v7 = vld [vmem:[%s2617_s14] sm:$0xff]  ;;  %s1707_s24 = sshll.u32 %s2613_s9, 1  ;;  %s1812_s26 = sshll.u32 %s2496_s4, 5 }
  0x7c   : > { %v280_v48 = vld [vmem:[%s2617_s14 + $0x28] sm:$0xff]  ;;  %v282_v50 = vld [vmem:[%s2617_s14 + $0x38] sm:$0xff]  ;;  %v279_v8 = vld [vmem:[%s2617_s14 + $0x20] sm:$0xff]  ;;  %s267_s15 = scalar_lea.vmem [#allocation8], %s1707_s24  ;;  %s2996_s18 = scalar_lea.hbm %s3045_s5, %s1812_s26 }
  0x7d   : > { %872 = vmatpush1.bf16.msra.mxu1 %v2045_v19  ;;  %v2088_v52 = vld [vmem:[#allocation6 + $0x1b0] ss:$8 sps:$4 sm:$0xff]   ;;  %v404_v53 = vpack.c.bf16 %v280_v48, %v276_v47  ;;  %v406_v54 = vpack.c.bf16 %v282_v50, %v278_v49  ;;  %v2089_v55 = vld [vmem:[#allocation6 + $0xc4] ss:$8 sps:$4 sm:$0xff]   ;;  %v2093_v57 = vld [vmem:[#allocation6 + $0xc0] ss:$8 sps:$4 sm:$0xff]   ;;  %v403_v15 = vpack.c.bf16 %v279_v8, %v275_v7 }
  0x7e   : > { %1065 = vmatpush1.bf16.msra.mxu0 %v2046_v20  ;;  %873 = vmatprep.subr.bf16.mxu1 %v2047_v21  ;;  %v2091_v56 = vld [vmem:[#allocation6 + $0x1c4] ss:$8 sps:$4 sm:$0xff]   ;;  %v2094_v58 = vld [vmem:[#allocation6 + $0x1c0] ss:$8 sps:$4 sm:$0xff]   ;;  %v2095_v59 = vld [vmem:[#allocation6 + $0xd4] ss:$8 sps:$4 sm:$0xff]  }
  0x7f   : > { %1066 = vmatprep.subr.bf16.mxu0 %v2049_v22  ;;  %895 = vmatprep.mubr.bf16.mxu1 %v404_v53  ;;  %v2097_v60 = vld [vmem:[#allocation6 + $0x1d4] ss:$8 sps:$4 sm:$0xff]   ;;  %v2099_v61 = vld [vmem:[#allocation6 + $0xd0] ss:$8 sps:$4 sm:$0xff]   ;;  %v2101_v63 = vld [vmem:[#allocation6 + $0xe4] ss:$8 sps:$4 sm:$0xff]  }
  0x80   : > { %1088 = vmatprep.mubr.bf16.mxu0 %v406_v54  ;;  %v2100_v62 = vld [vmem:[#allocation6 + $0x1d0] ss:$8 sps:$4 sm:$0xff]   ;;  %v2103_v0 = vld [vmem:[#allocation6 + $0x1e4] ss:$8 sps:$4 sm:$0xff]   ;;  %v2105_v1 = vld [vmem:[#allocation6 + $0xe0] ss:$8 sps:$4 sm:$0xff]  }
  0x81   : > { %874 = vmatpush1.bf16.msra.mxu1 %v2051_v23  ;;  %v2106_v2 = vld [vmem:[#allocation6 + $0x1e0] ss:$8 sps:$4 sm:$0xff]   ;;  %v2107_v3 = vld [vmem:[#allocation6 + $0xf4] ss:$8 sps:$4 sm:$0xff]   ;;  %v2111_v5 = vld [vmem:[#allocation6 + $0xf0] ss:$8 sps:$4 sm:$0xff]  }
  0x82   : > { %1067 = vmatpush1.bf16.msra.mxu0 %v2052_v24  ;;  %875 = vmatprep.subr.bf16.mxu1 %v2053_v25  ;;  %v2109_v4 = vld [vmem:[#allocation6 + $0x1f4] ss:$8 sps:$4 sm:$0xff]   ;;  %v2112_v6 = vld [vmem:[#allocation6 + $0x1f0] ss:$8 sps:$4 sm:$0xff]   ;;  %v284_v11 = vld [vmem:[%s2617_s14 + $0x48] sm:$0xff]  ;;  %s1611_s10 = sshll.u32 %s267_s15, 4  ;;  %s2998_s10 = int_to_ptr.vmem [resolvable:$true] %s1611_s10 }
  0x83   : > { %1068 = vmatprep.subr.bf16.mxu0 %v2055_v26  ;;  %v277_v9 = vld [vmem:[%s2617_s14 + $0x10] sm:$0xff]  ;;  %v288_v12 = vld [vmem:[%s2617_s14 + $0x68] sm:$0xff]  ;;  %v286_v13 = vld [vmem:[%s2617_s14 + $0x58] sm:$0xff]  ;;  %s1597_s19 = scalar_lea.sflag [#allocation5], %s2613_s9  ;;  %s2361_s27 = scalar_lea.vmem %s2998_s10, 32 }
  0x84   : > { %v281_v10 = vld [vmem:[%s2617_s14 + $0x30] sm:$0xff]  ;;  %v290_v14 = vld [vmem:[%s2617_s14 + $0x78] sm:$0xff]  ;;  %v408_v17 = vpack.c.bf16 %v288_v12, %v284_v11  ;;  %v283_v19 = vld [vmem:[%s2617_s14 + $0x40] sm:$0xff]  ;;  %p2362_p9 = scmp.ne.s32.totalorder %s2998_s10, %s2361_s27  ;;  %p3061_p10 = scmp.ne.s32.totalorder %s3052_s6, 0 }
  0x85   : > { %876 = vmatpush1.bf16.msra.mxu1 %v2057_v27  ;;  %v405_v16 = vpack.c.bf16 %v281_v10, %v277_v9  ;;  %v410_v18 = vpack.c.bf16 %v290_v14, %v286_v13  ;;  %v287_v20 = vld [vmem:[%s2617_s14 + $0x60] sm:$0xff]  ;;  %v285_v21 = vld [vmem:[%s2617_s14 + $0x50] sm:$0xff]  ;;  %v292_v23 = vld [vmem:[%s2617_s14 + $0x88] sm:$0xff]  ;;  %s2441_s4 = smov [#allocation8]  }
  0x86   : > { %1069 = vmatpush1.bf16.msra.mxu0 %v2058_v28  ;;  %877 = vmatprep.subr.bf16.mxu1 %v2059_v29  ;;  %v289_v22 = vld [vmem:[%s2617_s14 + $0x70] sm:$0xff]  ;;  %v296_v24 = vld [vmem:[%s2617_s14 + $0xa8] sm:$0xff]  ;;  %v294_v25 = vld [vmem:[%s2617_s14 + $0x98] sm:$0xff]  ;;  %v407_v27 = vpack.c.bf16 %v287_v20, %v283_v19  ;;  %p2363_p1 = pnand %p2362_p9, %p3061_p10  ;;  %s2365_s12 = sshll.u32 %s2441_s4, 4  ;;  %s2366_s12 = int_to_ptr.vmem [resolvable:$false] %s2365_s12 }
  0x87   : > { %1070 = vmatprep.subr.bf16.mxu0 %v2061_v30  ;;  %v298_v26 = vld [vmem:[%s2617_s14 + $0xb8] sm:$0xff]  ;;  %v409_v28 = vpack.c.bf16 %v289_v22, %v285_v21  ;;  %v412_v29 = vpack.c.bf16 %v296_v24, %v292_v23  ;;  %v308_v47 = vld [vmem:[%s2617_s14 + $0x108] sm:$0xff]  ;;  %s2367_s13 = scalar_lea.vmem %s2366_s12, 64  ;;  %p2368_p5 = scmp.lt.s32.totalorder %s2998_s10, %s2366_s12 }
  0x88   : > { %v414_v30 = vpack.c.bf16 %v298_v26, %v294_v25  ;;  %v312_v48 = vld [vmem:[%s2617_s14 + $0x128] sm:$0xff]  ;;  %v310_v49 = vld [vmem:[%s2617_s14 + $0x118] sm:$0xff]  ;;  %p2364_p4 = pneg %p2363_p1  ;;  %p2369_p11 = scmp.lt.s32.totalorder %s2367_s13, %s2361_s27 }
  0x89   : > { %878 = vmatpush1.bf16.msra.mxu1 %v2063_v31  ;;  %v291_v31 = vld [vmem:[%s2617_s14 + $0x80] sm:$0xff]  ;;  %v314_v50 = vld [vmem:[%s2617_s14 + $0x138] sm:$0xff]  ;;  %v420_v53 = vpack.c.bf16 %v312_v48, %v308_v47  ;;  %v324_v7 = vld [vmem:[%s2617_s14 + $0x188] sm:$0xff] }
  0x8a   : > { %1071 = vmatpush1.bf16.msra.mxu0 %v2064_v32  ;;  %879 = vmatprep.subr.bf16.mxu1 %v2065_v33  ;;  %v295_v32 = vld [vmem:[%s2617_s14 + $0xa0] sm:$0xff]  ;;  %v293_v33 = vld [vmem:[%s2617_s14 + $0x90] sm:$0xff]  ;;  %v422_v54 = vpack.c.bf16 %v314_v50, %v310_v49  ;;  %v328_v8 = vld [vmem:[%s2617_s14 + $0x1a8] sm:$0xff]  ;;  %p2370_p12 = por %p2369_p11, %p2368_p5 }
  0x8b   : > { %1072 = vmatprep.subr.bf16.mxu0 %v2067_v34  ;;  %v297_v34 = vld [vmem:[%s2617_s14 + $0xb0] sm:$0xff]  ;;  %v326_v9 = vld [vmem:[%s2617_s14 + $0x198] sm:$0xff]  ;;  %v428_v13 = vpack.c.bf16 %v328_v8, %v324_v7  ;;  %v332_v19 = vld [vmem:[%s2617_s14 + $0x1c8] sm:$0xff] }
  0x8c   : > { %v330_v10 = vld [vmem:[%s2617_s14 + $0x1b8] sm:$0xff]  ;;  %v336_v20 = vld [vmem:[%s2617_s14 + $0x1e8] sm:$0xff]  ;;  %p2371_p2 = pnand %p2370_p12, %p2364_p4 }
  0x8d   : > { %880 = vmatpush1.bf16.msra.mxu1 %v2069_v35  ;;  %v300_v35 = vld [vmem:[%s2617_s14 + $0xc8] sm:$0xff]  ;;  %v430_v14 = vpack.c.bf16 %v330_v10, %v326_v9  ;;  %v334_v21 = vld [vmem:[%s2617_s14 + $0x1d8] sm:$0xff]  ;;  %v432_v25 = vpack.c.bf16 %v336_v20, %v332_v19 }
  0x8e   : > { %1073 = vmatpush1.bf16.msra.mxu0 %v2070_v36  ;;  %881 = vmatprep.subr.bf16.mxu1 %v2071_v37  ;;  %v304_v36 = vld [vmem:[%s2617_s14 + $0xe8] sm:$0xff]  ;;  %v302_v37 = vld [vmem:[%s2617_s14 + $0xd8] sm:$0xff] }
  0x8f   : > { %1074 = vmatprep.subr.bf16.mxu0 %v2073_v38  ;;  %v306_v38 = vld [vmem:[%s2617_s14 + $0xf8] sm:$0xff] }
  0x90   : > { %v338_v22 = vld [vmem:[%s2617_s14 + $0x1f8] sm:$0xff] }
  0x91   : > { %882 = vmatpush1.bf16.msra.mxu1 %v2075_v39  ;;  %v411_v39 = vpack.c.bf16 %v295_v32, %v291_v31  ;;  %v434_v26 = vpack.c.bf16 %v338_v22, %v334_v21  ;;  %v340_v31 = vld [vmem:[%s2617_s14 + $0x208] sm:$0xff] }
  0x92   : > { %1075 = vmatpush1.bf16.msra.mxu0 %v2076_v40  ;;  %883 = vmatprep.subr.bf16.mxu1 %v2077_v41  ;;  %v413_v40 = vpack.c.bf16 %v297_v34, %v293_v33  ;;  %v416_v41 = vpack.c.bf16 %v304_v36, %v300_v35  ;;  %v344_v32 = vld [vmem:[%s2617_s14 + $0x228] sm:$0xff]  ;;  %v342_v33 = vld [vmem:[%s2617_s14 + $0x218] sm:$0xff] }
  0x93   : > { %1076 = vmatprep.subr.bf16.mxu0 %v2079_v42  ;;  %v418_v42 = vpack.c.bf16 %v306_v38, %v302_v37  ;;  %v346_v34 = vld [vmem:[%s2617_s14 + $0x238] sm:$0xff]  ;;  %v436_v37 = vpack.c.bf16 %v344_v32, %v340_v31 }
  0x94   : > { %v438_v38 = vpack.c.bf16 %v346_v34, %v342_v33 }
  0x95   : > { %884 = vmatpush1.bf16.msra.mxu1 %v2081_v43  ;;  %v299_v43 = vld [vmem:[%s2617_s14 + $0xc0] sm:$0xff] }
  0x96   : > { %1077 = vmatpush1.bf16.msra.mxu0 %v2082_v44  ;;  %885 = vmatprep.subr.bf16.mxu1 %v2083_v45  ;;  %v303_v44 = vld [vmem:[%s2617_s14 + $0xe0] sm:$0xff]  ;;  %v301_v45 = vld [vmem:[%s2617_s14 + $0xd0] sm:$0xff] }
  0x97   : > { %1078 = vmatprep.subr.bf16.mxu0 %v2085_v46  ;;  %v305_v46 = vld [vmem:[%s2617_s14 + $0xf0] sm:$0xff] }
  0x99   : > { %886 = vmatpush1.bf16.msra.mxu1 %v2087_v51  ;;  %v415_v51 = vpack.c.bf16 %v303_v44, %v299_v43  ;;  %v348_v43 = vld [vmem:[%s2617_s14 + $0x248] sm:$0xff] }
  0x9a   : > { %1079 = vmatpush1.bf16.msra.mxu0 %v2088_v52  ;;  %887 = vmatprep.subr.bf16.mxu1 %v2089_v55  ;;  %v417_v52 = vpack.c.bf16 %v305_v46, %v301_v45  ;;  %v307_v55 = vld [vmem:[%s2617_s14 + $0x100] sm:$0xff]  ;;  %v352_v44 = vld [vmem:[%s2617_s14 + $0x268] sm:$0xff]  ;;  %v350_v45 = vld [vmem:[%s2617_s14 + $0x258] sm:$0xff] }
  0x9b   : > { %1080 = vmatprep.subr.bf16.mxu0 %v2091_v56  ;;  %v311_v56 = vld [vmem:[%s2617_s14 + $0x120] sm:$0xff]  ;;  %v354_v46 = vld [vmem:[%s2617_s14 + $0x278] sm:$0xff]  ;;  %v440_v49 = vpack.c.bf16 %v352_v44, %v348_v43 }
  0x9c   : > { %v442_v50 = vpack.c.bf16 %v354_v46, %v350_v45 }
  0x9d   : > { %888 = vmatpush1.bf16.msra.mxu1 %v2093_v57  ;;  %v309_v57 = vld [vmem:[%s2617_s14 + $0x110] sm:$0xff] }
  0x9e   : > { %1081 = vmatpush1.bf16.msra.mxu0 %v2094_v58  ;;  %889 = vmatprep.subr.bf16.mxu1 %v2095_v59  ;;  %v313_v58 = vld [vmem:[%s2617_s14 + $0x130] sm:$0xff]  ;;  %v316_v59 = vld [vmem:[%s2617_s14 + $0x148] sm:$0xff] }
  0x9f   : > { %1082 = vmatprep.subr.bf16.mxu0 %v2097_v60  ;;  %v320_v60 = vld [vmem:[%s2617_s14 + $0x168] sm:$0xff] }
  0xa1   : > { %890 = vmatpush1.bf16.msra.mxu1 %v2099_v61  ;;  %v318_v61 = vld [vmem:[%s2617_s14 + $0x158] sm:$0xff] }
  0xa2   : > { %1083 = vmatpush1.bf16.msra.mxu0 %v2100_v62  ;;  %891 = vmatprep.subr.bf16.mxu1 %v2101_v63  ;;  %v322_v62 = vld [vmem:[%s2617_s14 + $0x178] sm:$0xff]  ;;  %v419_v63 = vpack.c.bf16 %v311_v56, %v307_v55  ;;  %v356_v55 = vld [vmem:[%s2617_s14 + $0x288] sm:$0xff] }
  0xa3   : > { %1084 = vmatprep.subr.bf16.mxu0 %v2103_v0  ;;  %v421_v0 = vpack.c.bf16 %v313_v58, %v309_v57  ;;  %v360_v56 = vld [vmem:[%s2617_s14 + $0x2a8] sm:$0xff]  ;;  %v358_v57 = vld [vmem:[%s2617_s14 + $0x298] sm:$0xff] }
  0xa4   : > { %v362_v58 = vld [vmem:[%s2617_s14 + $0x2b8] sm:$0xff] }
  0xa5   : > { %892 = vmatpush1.bf16.msra.mxu1 %v2105_v1  ;;  %v424_v1 = vpack.c.bf16 %v320_v60, %v316_v59 }
  0xa6   : > { %1085 = vmatpush1.bf16.msra.mxu0 %v2106_v2  ;;  %893 = vmatprep.subr.bf16.mxu1 %v2107_v3  ;;  %v426_v2 = vpack.c.bf16 %v322_v62, %v318_v61  ;;  %v315_v3 = vld [vmem:[%s2617_s14 + $0x140] sm:$0xff]  ;;  %v444_v61 = vpack.c.bf16 %v360_v56, %v356_v55  ;;  %v446_v62 = vpack.c.bf16 %v362_v58, %v358_v57 }
  0xa7   : > { %1086 = vmatprep.subr.bf16.mxu0 %v2109_v4  ;;  %v319_v4 = vld [vmem:[%s2617_s14 + $0x160] sm:$0xff] }
  0xa8   : > { %v423_v11 = vpack.c.bf16 %v319_v4, %v315_v3  ;;  %v364_v3 = vld [vmem:[%s2617_s14 + $0x2c8] sm:$0xff] }
  0xa9   : > { %894 = vmatpush1.bf16.msra.mxu1 %v2111_v5  ;;  %v317_v5 = vld [vmem:[%s2617_s14 + $0x150] sm:$0xff]  ;;  %v368_v4 = vld [vmem:[%s2617_s14 + $0x2e8] sm:$0xff] }
  0xaa   : > { %1087 = vmatpush1.bf16.msra.mxu0 %v2112_v6  ;;  %v321_v6 = vld [vmem:[%s2617_s14 + $0x170] sm:$0xff]  ;;  %v448_v9 = vpack.c.bf16 %v368_v4, %v364_v3  ;;  %v531_v4 = vld [vmem:[%s3042_s2] sm:$0x3] }
  0xab   : > { %v425_v12 = vpack.c.bf16 %v321_v6, %v317_v5  ;;  %v366_v5 = vld [vmem:[%s2617_s14 + $0x2d8] sm:$0xff] }
  0xac   : > { %896 = vmatmul.mubr.bf16.vlgmr.msra.gmra.mrb[0].mxu1 %v403_v15  ;;  %v323_v15 = vld [vmem:[%s2617_s14 + $0x180] sm:$0xff]  ;;  %v370_v6 = vld [vmem:[%s2617_s14 + $0x2f8] sm:$0xff] }
  0xad   : > { %1089 = vmatmul.mubr.bf16.vlgmr.msra.gmra.mrb[0].mxu0 %v405_v16  ;;  %905 = vmatprep.mubr.bf16.mxu1 %v408_v17  ;;  %v327_v16 = vld [vmem:[%s2617_s14 + $0x1a0] sm:$0xff]  ;;  %v325_v17 = vld [vmem:[%s2617_s14 + $0x190] sm:$0xff]  ;;  %v450_v10 = vpack.c.bf16 %v370_v6, %v366_v5 }
  0xae   : > { %1098 = vmatprep.mubr.bf16.mxu0 %v410_v18  ;;  %v329_v18 = vld [vmem:[%s2617_s14 + $0x1b0] sm:$0xff]  ;;  %v427_v23 = vpack.c.bf16 %v327_v16, %v323_v15  ;;  %v372_v15 = vld [vmem:[%s2617_s14 + $0x308] sm:$0xff] }
  0xaf   : > { %v429_v24 = vpack.c.bf16 %v329_v18, %v325_v17  ;;  %v376_v16 = vld [vmem:[%s2617_s14 + $0x328] sm:$0xff]  ;;  %v374_v17 = vld [vmem:[%s2617_s14 + $0x318] sm:$0xff] }
  0xb0   : > { %v378_v18 = vld [vmem:[%s2617_s14 + $0x338] sm:$0xff]  ;;  %v452_v21 = vpack.c.bf16 %v376_v16, %v372_v15 }
  0xb1   : > { %v454_v22 = vpack.c.bf16 %v378_v18, %v374_v17 }
  0xb4   : > { %906 = vmatmul.mubr.bf16.gmra.mrb[4].mxu1 %v407_v27  ;;  %v331_v27 = vld [vmem:[%s2617_s14 + $0x1c0] sm:$0xff] }
  0xb5   : > { %1099 = vmatmul.mubr.bf16.gmra.mrb[4].mxu0 %v409_v28  ;;  %915 = vmatprep.mubr.bf16.mxu1 %v412_v29  ;;  %v335_v28 = vld [vmem:[%s2617_s14 + $0x1e0] sm:$0xff]  ;;  %v333_v29 = vld [vmem:[%s2617_s14 + $0x1d0] sm:$0xff] }
  0xb6   : > { %1108 = vmatprep.mubr.bf16.mxu0 %v414_v30  ;;  %v337_v30 = vld [vmem:[%s2617_s14 + $0x1f0] sm:$0xff]  ;;  %v431_v35 = vpack.c.bf16 %v335_v28, %v331_v27  ;;  %v380_v27 = vld [vmem:[%s2617_s14 + $0x348] sm:$0xff] }
  0xb7   : > { %v433_v36 = vpack.c.bf16 %v337_v30, %v333_v29  ;;  %v384_v28 = vld [vmem:[%s2617_s14 + $0x368] sm:$0xff]  ;;  %v382_v29 = vld [vmem:[%s2617_s14 + $0x358] sm:$0xff] }
  0xb8   : > { %v386_v30 = vld [vmem:[%s2617_s14 + $0x378] sm:$0xff]  ;;  %v456_v33 = vpack.c.bf16 %v384_v28, %v380_v27 }
  0xb9   : > { %v458_v34 = vpack.c.bf16 %v386_v30, %v382_v29 }
  0xbc   : > { %916 = vmatmul.mubr.bf16.gmra.mrb[8].mxu1 %v411_v39  ;;  %v339_v39 = vld [vmem:[%s2617_s14 + $0x200] sm:$0xff] }
  0xbd   : > { %1109 = vmatmul.mubr.bf16.gmra.mrb[8].mxu0 %v413_v40  ;;  %925 = vmatprep.mubr.bf16.mxu1 %v416_v41  ;;  %v343_v40 = vld [vmem:[%s2617_s14 + $0x220] sm:$0xff]  ;;  %v341_v41 = vld [vmem:[%s2617_s14 + $0x210] sm:$0xff] }
  0xbe   : > { %1118 = vmatprep.mubr.bf16.mxu0 %v418_v42  ;;  %v345_v42 = vld [vmem:[%s2617_s14 + $0x230] sm:$0xff]  ;;  %v435_v47 = vpack.c.bf16 %v343_v40, %v339_v39  ;;  %v388_v39 = vld [vmem:[%s2617_s14 + $0x388] sm:$0xff] }
  0xbf   : > { %v437_v48 = vpack.c.bf16 %v345_v42, %v341_v41  ;;  %v392_v40 = vld [vmem:[%s2617_s14 + $0x3a8] sm:$0xff]  ;;  %v390_v41 = vld [vmem:[%s2617_s14 + $0x398] sm:$0xff] }
  0xc0   : > { %v394_v42 = vld [vmem:[%s2617_s14 + $0x3b8] sm:$0xff]  ;;  %v460_v45 = vpack.c.bf16 %v392_v40, %v388_v39 }
  0xc1   : > { %v462_v46 = vpack.c.bf16 %v394_v42, %v390_v41 }
  0xc4   : > { %926 = vmatmul.mubr.bf16.gmra.mrb[12].mxu1 %v415_v51  ;;  %v347_v51 = vld [vmem:[%s2617_s14 + $0x240] sm:$0xff] }
  0xc5   : > { %1119 = vmatmul.mubr.bf16.gmra.mrb[12].mxu0 %v417_v52  ;;  %935 = vmatprep.mubr.bf16.mxu1 %v420_v53  ;;  %v351_v52 = vld [vmem:[%s2617_s14 + $0x260] sm:$0xff]  ;;  %v349_v53 = vld [vmem:[%s2617_s14 + $0x250] sm:$0xff] }
  0xc6   : > { %1128 = vmatprep.mubr.bf16.mxu0 %v422_v54  ;;  %v353_v54 = vld [vmem:[%s2617_s14 + $0x270] sm:$0xff]  ;;  %v439_v59 = vpack.c.bf16 %v351_v52, %v347_v51  ;;  %v396_v51 = vld [vmem:[%s2617_s14 + $0x3c8] sm:$0xff] }
  0xc7   : > { %v441_v60 = vpack.c.bf16 %v353_v54, %v349_v53  ;;  %v400_v52 = vld [vmem:[%s2617_s14 + $0x3e8] sm:$0xff]  ;;  %v398_v53 = vld [vmem:[%s2617_s14 + $0x3d8] sm:$0xff] }
  0xc8   : > { %v402_v54 = vld [vmem:[%s2617_s14 + $0x3f8] sm:$0xff]  ;;  %v464_v57 = vpack.c.bf16 %v400_v52, %v396_v51 }
  0xc9   : > { %v466_v58 = vpack.c.bf16 %v402_v54, %v398_v53 }
  0xcc   : > { %936 = vmatmul.mubr.bf16.gmra.mrb[16].mxu1 %v419_v63  ;;  %v355_v63 = vld [vmem:[%s2617_s14 + $0x280] sm:$0xff] }
  0xcd   : > { %1129 = vmatmul.mubr.bf16.gmra.mrb[16].mxu0 %v421_v0  ;;  %945 = vmatprep.mubr.bf16.mxu1 %v424_v1  ;;  %v359_v0 = vld [vmem:[%s2617_s14 + $0x2a0] sm:$0xff]  ;;  %v357_v1 = vld [vmem:[%s2617_s14 + $0x290] sm:$0xff] }
  0xce   : > { %1138 = vmatprep.mubr.bf16.mxu0 %v426_v2  ;;  %v361_v2 = vld [vmem:[%s2617_s14 + $0x2b0] sm:$0xff]  ;;  %v443_v7 = vpack.c.bf16 %v359_v0, %v355_v63 }
  0xcf   : > { %v445_v8 = vpack.c.bf16 %v361_v2, %v357_v1  ;;  %v533_v1 = vlaneseq }
  0xd1   : > { %v2756_v2 = vshrl.u32 %v533_v1, 7  ;;  %vm1593_vm0 = vcmp.lt.s32.totalorder %v533_v1, 256 }
  0xd3   : > { %v535_v3 = vsub.s32 0, %v2756_v2  ;;  %v539_v5 = vsub.s32 1, %v2756_v2 }
  0xd4   : > { %946 = vmatmul.mubr.bf16.gmra.mrb[20].mxu1 %v423_v11  ;;  %v363_v11 = vld [vmem:[%s2617_s14 + $0x2c0] sm:$0xff] }
  0xd5   : > { %1139 = vmatmul.mubr.bf16.gmra.mrb[20].mxu0 %v425_v12  ;;  %955 = vmatprep.mubr.bf16.mxu1 %v428_v13  ;;  %v367_v12 = vld [vmem:[%s2617_s14 + $0x2e0] sm:$0xff]  ;;  %v365_v13 = vld [vmem:[%s2617_s14 + $0x2d0] sm:$0xff]  ;;  %v2765_v6 = vrot.slane %v531_v4, %v535_v3 }
  0xd6   : > { %1148 = vmatprep.mubr.bf16.mxu0 %v430_v14  ;;  %v369_v14 = vld [vmem:[%s2617_s14 + $0x2f0] sm:$0xff]  ;;  %v447_v19 = vpack.c.bf16 %v367_v12, %v363_v11 }
  0xd7   : > { %v449_v20 = vpack.c.bf16 %v369_v14, %v365_v13 }
  0xdc   : > { %956 = vmatmul.mubr.bf16.gmra.mrb[24].mxu1 %v427_v23  ;;  %v371_v23 = vld [vmem:[%s2617_s14 + $0x300] sm:$0xff] }
  0xdd   : > { %1149 = vmatmul.mubr.bf16.gmra.mrb[24].mxu0 %v429_v24  ;;  %965 = vmatprep.mubr.bf16.mxu1 %v432_v25  ;;  %v375_v24 = vld [vmem:[%s2617_s14 + $0x320] sm:$0xff]  ;;  %v373_v25 = vld [vmem:[%s2617_s14 + $0x310] sm:$0xff] }
  0xde   : > { %1158 = vmatprep.mubr.bf16.mxu0 %v434_v26  ;;  %v377_v26 = vld [vmem:[%s2617_s14 + $0x330] sm:$0xff]  ;;  %v451_v31 = vpack.c.bf16 %v375_v24, %v371_v23 }
  0xdf   : > { %v453_v32 = vpack.c.bf16 %v377_v26, %v373_v25 }
  0xe4   : > { %966 = vmatmul.mubr.bf16.gmra.mrb[28].mxu1 %v431_v35  ;;  %v379_v35 = vld [vmem:[%s2617_s14 + $0x340] sm:$0xff] }
  0xe5   : > { %1159 = vmatmul.mubr.bf16.gmra.mrb[28].mxu0 %v433_v36  ;;  %975 = vmatprep.mubr.bf16.mxu1 %v436_v37  ;;  %v383_v36 = vld [vmem:[%s2617_s14 + $0x360] sm:$0xff]  ;;  %v381_v37 = vld [vmem:[%s2617_s14 + $0x350] sm:$0xff] }
  0xe6   : > { %1168 = vmatprep.mubr.bf16.mxu0 %v438_v38  ;;  %v385_v38 = vld [vmem:[%s2617_s14 + $0x370] sm:$0xff]  ;;  %v455_v43 = vpack.c.bf16 %v383_v36, %v379_v35 }
  0xe7   : > { %v457_v44 = vpack.c.bf16 %v385_v38, %v381_v37 }
  0xec   : > { %976 = vmatmul.mubr.bf16.gmra.mrb[32].mxu1 %v435_v47  ;;  %v387_v47 = vld [vmem:[%s2617_s14 + $0x380] sm:$0xff] }
  0xed   : > { %1169 = vmatmul.mubr.bf16.gmra.mrb[32].mxu0 %v437_v48  ;;  %985 = vmatprep.mubr.bf16.mxu1 %v440_v49  ;;  %v391_v48 = vld [vmem:[%s2617_s14 + $0x3a0] sm:$0xff]  ;;  %v389_v49 = vld [vmem:[%s2617_s14 + $0x390] sm:$0xff] }
  0xee   : > { %1178 = vmatprep.mubr.bf16.mxu0 %v442_v50  ;;  %v393_v50 = vld [vmem:[%s2617_s14 + $0x3b0] sm:$0xff]  ;;  %v459_v55 = vpack.c.bf16 %v391_v48, %v387_v47 }
  0xef   : > { %v461_v56 = vpack.c.bf16 %v393_v50, %v389_v49 }
  0xf4   : > { %986 = vmatmul.mubr.bf16.gmra.mrb[36].mxu1 %v439_v59  ;;  %v395_v59 = vld [vmem:[%s2617_s14 + $0x3c0] sm:$0xff] }
  0xf5   : > { %1179 = vmatmul.mubr.bf16.gmra.mrb[36].mxu0 %v441_v60  ;;  %995 = vmatprep.mubr.bf16.mxu1 %v444_v61  ;;  %v399_v60 = vld [vmem:[%s2617_s14 + $0x3e0] sm:$0xff]  ;;  %v397_v61 = vld [vmem:[%s2617_s14 + $0x3d0] sm:$0xff] }
  0xf6   : > { %1188 = vmatprep.mubr.bf16.mxu0 %v446_v62  ;;  %v401_v62 = vld [vmem:[%s2617_s14 + $0x3f0] sm:$0xff]  ;;  %v463_v63 = vpack.c.bf16 %v399_v60, %v395_v59 }
  0xf7   : > { %v465_v0 = vpack.c.bf16 %v401_v62, %v397_v61 }
  0xfc   : > { %996 = vmatmul.mubr.bf16.gmra.mrb[40].mxu1 %v443_v7  ;;  %v2767_v7 = vrot.slane %v531_v4, %v539_v5 }
  0xfd   : > { %1189 = vmatmul.mubr.bf16.gmra.mrb[40].mxu0 %v445_v8  ;;  %1005 = vmatprep.mubr.bf16.mxu1 %v448_v9 }
  0xfe   : > { %1198 = vmatprep.mubr.bf16.mxu0 %v450_v10 }
 0x104   : > { %1006 = vmatmul.mubr.bf16.gmra.mrb[44].mxu1 %v447_v19 }
 0x105   : > { %1199 = vmatmul.mubr.bf16.gmra.mrb[44].mxu0 %v449_v20  ;;  %1015 = vmatprep.mubr.bf16.mxu1 %v452_v21 }
 0x106   : > { %1208 = vmatprep.mubr.bf16.mxu0 %v454_v22 }
 0x10c   : > { %1016 = vmatmul.mubr.bf16.gmra.mrb[48].mxu1 %v451_v31 }
 0x10d   : > { %1209 = vmatmul.mubr.bf16.gmra.mrb[48].mxu0 %v453_v32  ;;  %1025 = vmatprep.mubr.bf16.mxu1 %v456_v33 }
 0x10e   : > { %1218 = vmatprep.mubr.bf16.mxu0 %v458_v34 }
 0x114   : > { %1026 = vmatmul.mubr.bf16.gmra.mrb[52].mxu1 %v455_v43 }
 0x115   : > { %1219 = vmatmul.mubr.bf16.gmra.mrb[52].mxu0 %v457_v44  ;;  %1035 = vmatprep.mubr.bf16.mxu1 %v460_v45 }
 0x116   : > { %1228 = vmatprep.mubr.bf16.mxu0 %v462_v46 }
 0x11c   : > { %1036 = vmatmul.mubr.bf16.gmra.mrb[56].mxu1 %v459_v55 }
 0x11d   : > { %1229 = vmatmul.mubr.bf16.gmra.mrb[56].mxu0 %v461_v56  ;;  %1045 = vmatprep.mubr.bf16.mxu1 %v464_v57 }
 0x11e   : > { %1238 = vmatprep.mubr.bf16.mxu0 %v466_v58 }
 0x124   : > { %1046 = vmatmul.mubr.bf16.gmra.mrb[60].mxu1 %v463_v63 }
 0x125   : > { %1239 = vmatmul.mubr.bf16.gmra.mrb[60].mxu0 %v465_v0 }
 0x17f   : > { %v897_v8 = vpop.f32.mrb[0].mxu1 }
 0x180   : > { %v1090_v9 = vpop.f32.mrb[0].mxu0  ;;  %v898_v10 = vadd.f32 %v897_v8, %v2765_v6  ;;  %v899_v11 = vpop.f32.mrb[1].mxu1 }
 0x181   : > { %v1092_v12 = vpop.f32.mrb[1].mxu0  ;;  %v900_v13 = vadd.f32 %v899_v11, %v2767_v7  ;;  %v901_v14 = vpop.f32.mrb[2].mxu1 }
 0x182   : > { %v1094_v15 = vpop.f32.mrb[2].mxu0  ;;  %v1091_v16 = vadd.f32 %v1090_v9, %v898_v10  ;;  %v902_v17 = vadd.f32 %v901_v14, %v2765_v6  ;;  %v903_v18 = vpop.f32.mrb[3].mxu1 }
 0x183   : > { %v1096_v19 = vpop.f32.mrb[3].mxu0  ;;  %v1093_v20 = vadd.f32 %v1092_v12, %v900_v13  ;;  %v904_v21 = vadd.f32 %v903_v18, %v2767_v7 }
 0x184   : > { %v1095_v22 = vadd.f32 %v1094_v15, %v902_v17 }
 0x185   : > { %v1772_v23 = vmul.f32 -1.442695, %v1093_v20  ;;  %v1097_v24 = vadd.f32 %v1096_v19, %v904_v21 }
 0x187   : > { %2113 = vpow2.f32 %v1772_v23  ;;  %v1773_v25 = vmul.f32 -1.442695, %v1097_v24  ;;  %v907_v26 = vpop.f32.mrb[4].mxu1 }
 0x188   : > { %v1100_v27 = vpop.f32.mrb[4].mxu0  ;;  %v908_v28 = vadd.f32 %v907_v26, %v2765_v6  ;;  %v909_v29 = vpop.f32.mrb[5].mxu1 }
 0x189   : > { %v1102_v30 = vpop.f32.mrb[5].mxu0  ;;  %2115 = vpow2.f32 %v1773_v25  ;;  %v910_v31 = vadd.f32 %v909_v29, %v2767_v7  ;;  %v911_v32 = vpop.f32.mrb[6].mxu1 }
 0x18a   : > { %v1104_v33 = vpop.f32.mrb[6].mxu0  ;;  %v1101_v34 = vadd.f32 %v1100_v27, %v908_v28  ;;  %v912_v35 = vadd.f32 %v911_v32, %v2765_v6  ;;  %v913_v36 = vpop.f32.mrb[7].mxu1 }
 0x18b   : > { %v1106_v37 = vpop.f32.mrb[7].mxu0  ;;  %v1103_v38 = vadd.f32 %v1102_v30, %v910_v31  ;;  %v914_v39 = vadd.f32 %v913_v36, %v2767_v7  ;;  %v2796_v30 = vld [vmem:[%s3043_s3] sm:$0x1] }
 0x18c   : > { %v1105_v40 = vadd.f32 %v1104_v33, %v912_v35  ;;  %1829 = vmatprep.mubr.bf16.mxu1 %v2796_v30 }
 0x18d   : > { %v1774_v41 = vmul.f32 -1.442695, %v1103_v38  ;;  %v1107_v42 = vadd.f32 %v1106_v37, %v914_v39 }
 0x18f   : > { %2117 = vpow2.f32 %v1774_v41  ;;  %v1775_v43 = vmul.f32 -1.442695, %v1107_v42  ;;  %v917_v44 = vpop.f32.mrb[8].mxu1 }
 0x190   : > { %v1110_v45 = vpop.f32.mrb[8].mxu0  ;;  %v918_v46 = vadd.f32 %v917_v44, %v2765_v6  ;;  %v919_v47 = vpop.f32.mrb[9].mxu1 }
 0x191   : > { %v1112_v48 = vpop.f32.mrb[9].mxu0  ;;  %v2114_v49 = vpop.eup %2113  ;;  %2119 = vpow2.f32 %v1775_v43  ;;  %v920_v50 = vadd.f32 %v919_v47, %v2767_v7 }
 0x192   : > { %v921_v51 = vpop.f32.mrb[10].mxu1  ;;  %v1114_v52 = vpop.f32.mrb[10].mxu0  ;;  %v1377_v53 = vadd.f32 1.0, %v2114_v49  ;;  %v2779_v54 = vadd.f32 %v1110_v45, %v918_v46  ;;  %2121 = vtanh.f32 %v1091_v16 }
 0x193   : > { %v922_v55 = vadd.f32 %v921_v51, %v2765_v6  ;;  %v923_v56 = vpop.f32.mrb[11].mxu1  ;;  %v1116_v57 = vpop.f32.mrb[11].mxu0  ;;  %v1113_v59 = vadd.f32 %v1112_v48, %v920_v50 }
 0x194   : > { %v2116_v58 = vpop.eup %2115  ;;  %v924_v60 = vadd.f32 %v923_v56, %v2767_v7  ;;  %2123 = vrcp.f32 %v1377_v53 }
 0x195   : > { %v1378_v61 = vadd.f32 1.0, %v2116_v58  ;;  %v2783_v62 = vadd.f32 %v1114_v52, %v922_v55  ;;  %2125 = vtanh.f32 %v1095_v22  ;;  %v1776_v63 = vmul.f32 -1.442695, %v1113_v59 }
 0x196   : > { %v1117_v0 = vadd.f32 %v1116_v57, %v924_v60  ;;  %v1522_v60 = vld [vmem:[#allocation2] sm:$0x1] }
 0x197   : > { %2127 = vrcp.f32 %v1378_v61  ;;  %v927_v5 = vpop.f32.mrb[12].mxu1 }
 0x198   : > { %2129 = vpow2.f32 %v1776_v63  ;;  %v1777_v4 = vmul.f32 -1.442695, %v1117_v0  ;;  %v1120_v8 = vpop.f32.mrb[12].mxu0  ;;  %v928_v9 = vadd.f32 %v927_v5, %v2765_v6  ;;  %v929_v10 = vpop.f32.mrb[13].mxu1  ;;  %v2439_v63 = vmov 0  }
 0x199   : > { %v1122_v11 = vpop.f32.mrb[13].mxu0  ;;  %v2118_v12 = vpop.eup %2117  ;;  %v930_v13 = vadd.f32 %v929_v10, %v2767_v7  ;;  %2016 = vset.pattern.permute.xlu0 %v2439_v63 }
 0x19a   : > { %2131 = vpow2.f32 %v1777_v4  ;;  %v931_v14 = vpop.f32.mrb[14].mxu1  ;;  %v1124_v15 = vpop.f32.mrb[14].mxu0  ;;  %v1379_v16 = vadd.f32 1.0, %v2118_v12  ;;  %v2787_v17 = vadd.f32 %v1120_v8, %v928_v9  ;;  %1525 = vperm.xlu0 %2016, %v1522_v60  }
 0x19b   : > { %v932_v18 = vadd.f32 %v931_v14, %v2765_v6  ;;  %v933_v19 = vpop.f32.mrb[15].mxu1  ;;  %v1126_v20 = vpop.f32.mrb[15].mxu0  ;;  %2133 = vtanh.f32 %v1101_v34  ;;  %v1123_v22 = vadd.f32 %v1122_v11, %v930_v13 }
 0x19c   : > { %v2120_v21 = vpop.eup %2119  ;;  %v934_v23 = vadd.f32 %v933_v19, %v2767_v7  ;;  %2135 = vrcp.f32 %v1379_v16 }
 0x19d   : > { %v1380_v24 = vadd.f32 1.0, %v2120_v21  ;;  %v2791_v25 = vadd.f32 %v1124_v15, %v932_v18  ;;  %v2122_v26 = vpop.eup %2121  ;;  %2137 = vtanh.f32 %v1105_v40  ;;  %v1778_v27 = vmul.f32 -1.442695, %v1123_v22 }
 0x19e   : > { %v1127_v28 = vadd.f32 %v1126_v20, %v934_v23  ;;  %v2124_v29 = vpop.eup %2123 }
 0x19f   : > { %2139 = vrcp.f32 %v1380_v24  ;;  %v2126_v31 = vpop.eup %2125  ;;  %v937_v33 = vpop.f32.mrb[16].mxu1  ;;  %v2798_v35 = vmul.f32 %v2124_v29, %v2122_v26 }
 0x1a0   : > { %2141 = vpow2.f32 %v1778_v27  ;;  %v1779_v32 = vmul.f32 -1.442695, %v1127_v28  ;;  %v1130_v34 = vpop.f32.mrb[16].mxu0  ;;  %v938_v37 = vadd.f32 %v937_v33, %v2765_v6  ;;  %v939_v38 = vpop.f32.mrb[17].mxu1 }
 0x1a1   : > { %v2128_v36 = vpop.eup %2127  ;;  %v1132_v39 = vpop.f32.mrb[17].mxu0  ;;  %v940_v41 = vadd.f32 %v939_v38, %v2767_v7 }
 0x1a2   : > { %v2130_v40 = vpop.eup %2129  ;;  %2143 = vpow2.f32 %v1779_v32  ;;  %v941_v42 = vpop.f32.mrb[18].mxu1  ;;  %v2803_v44 = vmul.f32 %v2128_v36, %v2126_v31  ;;  %v2805_v46 = vadd.f32 %v1130_v34, %v938_v37 }
 0x1a3   : > { %v1134_v43 = vpop.f32.mrb[18].mxu0  ;;  %v1381_v45 = vadd.f32 1.0, %v2130_v40  ;;  %v942_v47 = vadd.f32 %v941_v42, %v2765_v6  ;;  %v943_v48 = vpop.f32.mrb[19].mxu1  ;;  %2145 = vtanh.f32 %v2779_v54  ;;  %v1133_v51 = vadd.f32 %v1132_v39, %v940_v41 }
 0x1a4   : > { %v1136_v49 = vpop.f32.mrb[19].mxu0  ;;  %v2132_v50 = vpop.eup %2131  ;;  %v944_v52 = vadd.f32 %v943_v48, %v2767_v7  ;;  %v1506_v53 = vpack.c.bf16 %v2803_v44, %v2798_v35 }
 0x1a5   : > { %2147 = vrcp.f32 %v1381_v45  ;;  %v1382_v55 = vadd.f32 1.0, %v2132_v50  ;;  %v2812_v56 = vadd.f32 %v1134_v43, %v942_v47  ;;  %v2134_v57 = vpop.eup %2133  ;;  %v1780_v58 = vmul.f32 -1.442695, %v1133_v51 }
 0x1a6   : > { %2149 = vtanh.f32 %v2783_v62  ;;  %v1137_v59 = vadd.f32 %v1136_v49, %v944_v52  ;;  %v2136_v61 = vpop.eup %2135 }
 0x1a7   : > { %2151 = vrcp.f32 %v1382_v55  ;;  %v2138_v54 = vpop.eup %2137  ;;  %v947_v4 = vpop.f32.mrb[20].mxu1  ;;  %v2815_v8 = vmul.f32 %v2136_v61, %v2134_v57 }
 0x1a8   : > { %2153 = vpow2.f32 %v1780_v58  ;;  %v1781_v0 = vmul.f32 -1.442695, %v1137_v59  ;;  %v1140_v5 = vpop.f32.mrb[20].mxu0  ;;  %v948_v10 = vadd.f32 %v947_v4, %v2765_v6  ;;  %v949_v11 = vpop.f32.mrb[21].mxu1 }
 0x1a9   : > { %v2140_v9 = vpop.eup %2139  ;;  %v1142_v62 = vpop.f32.mrb[21].mxu0  ;;  %v950_v13 = vadd.f32 %v949_v11, %v2767_v7 }
 0x1aa   : > { %v2142_v12 = vpop.eup %2141  ;;  %2155 = vpow2.f32 %v1781_v0  ;;  %v951_v14 = vpop.f32.mrb[22].mxu1  ;;  %v2819_v16 = vmul.f32 %v2140_v9, %v2138_v54  ;;  %v2821_v19 = vadd.f32 %v1140_v5, %v948_v10 }
 0x1ab   : > { %v1144_v15 = vpop.f32.mrb[22].mxu0  ;;  %v1383_v18 = vadd.f32 1.0, %v2142_v12  ;;  %v952_v20 = vadd.f32 %v951_v14, %v2765_v6  ;;  %v953_v21 = vpop.f32.mrb[23].mxu1  ;;  %2157 = vtanh.f32 %v2787_v17  ;;  %v1143_v24 = vadd.f32 %v1142_v62, %v950_v13 }
 0x1ac   : > { %v1146_v22 = vpop.f32.mrb[23].mxu0  ;;  %v2144_v23 = vpop.eup %2143  ;;  %v954_v26 = vadd.f32 %v953_v21, %v2767_v7  ;;  %v1507_v27 = vpack.c.bf16 %v2819_v16, %v2815_v8 }
 0x1ad   : > { %2159 = vrcp.f32 %v1383_v18  ;;  %v1384_v28 = vadd.f32 1.0, %v2144_v23  ;;  %v2828_v29 = vadd.f32 %v1144_v15, %v952_v20  ;;  %v2146_v31 = vpop.eup %2145  ;;  %v1782_v32 = vmul.f32 -1.442695, %v1143_v24 }
 0x1ae   : > { %2161 = vtanh.f32 %v2791_v25  ;;  %v1147_v33 = vadd.f32 %v1146_v22, %v954_v26 }
 0x1af   : > { %v2148_v34 = vpop.eup %2147  ;;  %2163 = vrcp.f32 %v1384_v28  ;;  %v957_v37 = vpop.f32.mrb[24].mxu1 }
 0x1b0   : > { %v2150_v36 = vpop.eup %2149  ;;  %2165 = vpow2.f32 %v1782_v32  ;;  %v1783_v17 = vmul.f32 -1.442695, %v1147_v33  ;;  %v1150_v38 = vpop.f32.mrb[24].mxu0  ;;  %v2831_v39 = vmul.f32 %v2148_v34, %v2146_v31  ;;  %v958_v41 = vadd.f32 %v957_v37, %v2765_v6 }
 0x1b1   : > { %v2152_v40 = vpop.eup %2151  ;;  %v959_v42 = vpop.f32.mrb[25].mxu1 }
 0x1b2   : > { %v1152_v43 = vpop.f32.mrb[25].mxu0  ;;  %v2154_v45 = vpop.eup %2153  ;;  %2167 = vpow2.f32 %v1783_v17  ;;  %v960_v25 = vadd.f32 %v959_v42, %v2767_v7  ;;  %v2835_v49 = vmul.f32 %v2152_v40, %v2150_v36  ;;  %v2837_v51 = vadd.f32 %v1150_v38, %v958_v41 }
 0x1b3   : > { %v961_v47 = vpop.f32.mrb[26].mxu1  ;;  %v1154_v48 = vpop.f32.mrb[26].mxu0  ;;  %v1385_v50 = vadd.f32 1.0, %v2154_v45  ;;  %2169 = vtanh.f32 %v2805_v46 }
 0x1b4   : > { %v962_v52 = vadd.f32 %v961_v47, %v2765_v6  ;;  %v963_v55 = vpop.f32.mrb[27].mxu1  ;;  %v1156_v57 = vpop.f32.mrb[27].mxu0  ;;  %v1153_v59 = vadd.f32 %v1152_v43, %v960_v25  ;;  %v1508_v61 = vpack.c.bf16 %v2835_v49, %v2831_v39 }
 0x1b5   : > { %v2156_v58 = vpop.eup %2155  ;;  %v964_v60 = vadd.f32 %v963_v55, %v2767_v7  ;;  %2171 = vrcp.f32 %v1385_v50 }
 0x1b6   : > { %v1386_v63 = vadd.f32 1.0, %v2156_v58  ;;  %v2844_v54 = vadd.f32 %v1154_v48, %v962_v52  ;;  %v2158_v0 = vpop.eup %2157  ;;  %2173 = vtanh.f32 %v2812_v56  ;;  %v1784_v4 = vmul.f32 -1.442695, %v1153_v59 }
 0x1b7   : > { %v1157_v5 = vadd.f32 %v1156_v57, %v964_v60  ;;  %v2160_v9 = vpop.eup %2159  ;;  %v967_v11 = vpop.f32.mrb[28].mxu1 }
 0x1b8   : > { %2175 = vrcp.f32 %v1386_v63  ;;  %v2162_v10 = vpop.eup %2161  ;;  %v1160_v62 = vpop.f32.mrb[28].mxu0  ;;  %v2847_v12 = vmul.f32 %v2160_v9, %v2158_v0  ;;  %v968_v14 = vadd.f32 %v967_v11, %v2765_v6 }
 0x1b9   : > { %2177 = vpow2.f32 %v1784_v4  ;;  %v1785_v46 = vmul.f32 -1.442695, %v1157_v5  ;;  %v2164_v13 = vpop.eup %2163  ;;  %v969_v15 = vpop.f32.mrb[29].mxu1 }
 0x1ba   : > { %v1162_v18 = vpop.f32.mrb[29].mxu0  ;;  %v2166_v20 = vpop.eup %2165  ;;  %v970_v56 = vadd.f32 %v969_v15, %v2767_v7  ;;  %v2851_v23 = vmul.f32 %v2164_v13, %v2162_v10  ;;  %v2853_v26 = vadd.f32 %v1160_v62, %v968_v14 }
 0x1bb   : > { %2179 = vpow2.f32 %v1785_v46  ;;  %v971_v21 = vpop.f32.mrb[30].mxu1  ;;  %v1164_v22 = vpop.f32.mrb[30].mxu0  ;;  %v1387_v24 = vadd.f32 1.0, %v2166_v20 }
 0x1bc   : > { %v972_v28 = vadd.f32 %v971_v21, %v2765_v6  ;;  %v973_v31 = vpop.f32.mrb[31].mxu1  ;;  %v1166_v32 = vpop.f32.mrb[31].mxu0  ;;  %2181 = vtanh.f32 %v2821_v19  ;;  %v1163_v34 = vadd.f32 %v1162_v18, %v970_v56  ;;  %v1509_v17 = vpack.c.bf16 %v2851_v23, %v2847_v12 }
 0x1bd   : > { %v2168_v33 = vpop.eup %2167  ;;  %v974_v36 = vadd.f32 %v973_v31, %v2767_v7  ;;  %2183 = vrcp.f32 %v1387_v24 }
 0x1be   : > { %v1388_v37 = vadd.f32 1.0, %v2168_v33  ;;  %v2860_v38 = vadd.f32 %v1164_v22, %v972_v28  ;;  %v2170_v40 = vpop.eup %2169  ;;  %2185 = vtanh.f32 %v2828_v29  ;;  %v1786_v41 = vmul.f32 -1.442695, %v1163_v34 }
 0x1bf   : > { %v1167_v42 = vadd.f32 %v1166_v32, %v974_v36  ;;  %v2172_v43 = vpop.eup %2171  ;;  %v977_v25 = vpop.f32.mrb[32].mxu1 }
 0x1c0   : > { %2187 = vrcp.f32 %v1388_v37  ;;  %v2174_v45 = vpop.eup %2173  ;;  %v1170_v47 = vpop.f32.mrb[32].mxu0  ;;  %v2863_v48 = vmul.f32 %v2172_v43, %v2170_v40  ;;  %v978_v52 = vadd.f32 %v977_v25, %v2765_v6 }
 0x1c1   : > { %2189 = vpow2.f32 %v1786_v41  ;;  %v1787_v19 = vmul.f32 -1.442695, %v1167_v42  ;;  %v979_v55 = vpop.f32.mrb[33].mxu1  ;;  %v1172_v57 = vpop.f32.mrb[33].mxu0 }
 0x1c2   : > { %v2176_v50 = vpop.eup %2175  ;;  %v980_v29 = vadd.f32 %v979_v55, %v2767_v7  ;;  %v981_v59 = vpop.f32.mrb[34].mxu1  ;;  %v2869_v4 = vadd.f32 %v1170_v47, %v978_v52 }
 0x1c3   : > { %v2178_v58 = vpop.eup %2177  ;;  %2191 = vpow2.f32 %v1787_v19  ;;  %v1174_v60 = vpop.f32.mrb[34].mxu0  ;;  %v2867_v63 = vmul.f32 %v2176_v50, %v2174_v45  ;;  %v982_v5 = vadd.f32 %v981_v59, %v2765_v6 }
 0x1c4   : > { %v1389_v0 = vadd.f32 1.0, %v2178_v58  ;;  %v983_v9 = vpop.f32.mrb[35].mxu1  ;;  %v1176_v10 = vpop.f32.mrb[35].mxu0  ;;  %2193 = vtanh.f32 %v2837_v51  ;;  %v1173_v11 = vadd.f32 %v1172_v57, %v980_v29 }
 0x1c5   : > { %v2180_v46 = vpop.eup %2179  ;;  %v984_v62 = vadd.f32 %v983_v9, %v2767_v7  ;;  %v1510_v13 = vpack.c.bf16 %v2867_v63, %v2863_v48  ;;  %v2876_v15 = vadd.f32 %v1174_v60, %v982_v5 }
 0x1c6   : > { %2195 = vrcp.f32 %v1389_v0  ;;  %v1390_v14 = vadd.f32 1.0, %v2180_v46  ;;  %v2182_v18 = vpop.eup %2181  ;;  %v1788_v20 = vmul.f32 -1.442695, %v1173_v11 }
 0x1c7   : > { %2197 = vtanh.f32 %v2844_v54  ;;  %v1177_v56 = vadd.f32 %v1176_v10, %v984_v62  ;;  %v2184_v21 = vpop.eup %2183  ;;  %v987_v24 = vpop.f32.mrb[36].mxu1 }
 0x1c8   : > { %2199 = vrcp.f32 %v1390_v14  ;;  %v2186_v22 = vpop.eup %2185  ;;  %v1180_v28 = vpop.f32.mrb[36].mxu0  ;;  %v2879_v31 = vmul.f32 %v2184_v21, %v2182_v18  ;;  %v988_v33 = vadd.f32 %v987_v24, %v2765_v6 }
 0x1c9   : > { %2201 = vpow2.f32 %v1788_v20  ;;  %v1789_v51 = vmul.f32 -1.442695, %v1177_v56  ;;  %v989_v34 = vpop.f32.mrb[37].mxu1  ;;  %v1182_v36 = vpop.f32.mrb[37].mxu0 }
 0x1ca   : > { %v2188_v32 = vpop.eup %2187  ;;  %v990_v54 = vadd.f32 %v989_v34, %v2767_v7  ;;  %v991_v40 = vpop.f32.mrb[38].mxu1  ;;  %v2886_v19 = vadd.f32 %v1180_v28, %v988_v33 }
 0x1cb   : > { %v2190_v37 = vpop.eup %2189  ;;  %2203 = vpow2.f32 %v1789_v51  ;;  %v1184_v41 = vpop.f32.mrb[38].mxu0  ;;  %v2883_v42 = vmul.f32 %v2188_v32, %v2186_v22  ;;  %v992_v45 = vadd.f32 %v991_v40, %v2765_v6 }
 0x1cc   : > { %v1391_v43 = vadd.f32 1.0, %v2190_v37  ;;  %v993_v25 = vpop.f32.mrb[39].mxu1  ;;  %v1186_v47 = vpop.f32.mrb[39].mxu0  ;;  %2205 = vtanh.f32 %v2853_v26  ;;  %v1183_v55 = vadd.f32 %v1182_v36, %v990_v54 }
 0x1cd   : > { %v2192_v50 = vpop.eup %2191  ;;  %v994_v52 = vadd.f32 %v993_v25, %v2767_v7  ;;  %v1511_v57 = vpack.c.bf16 %v2883_v42, %v2879_v31  ;;  %v2892_v29 = vadd.f32 %v1184_v41, %v992_v45  ;;  %v2440_v42 = vmov 1966171168  }
 0x1ce   : > { %2207 = vrcp.f32 %v1391_v43  ;;  %v1392_v58 = vadd.f32 1.0, %v2192_v50  ;;  %v2194_v59 = vpop.eup %2193  ;;  %v1790_v60 = vmul.f32 -1.442695, %v1183_v55 }
 0x1cf   : > { %2209 = vtanh.f32 %v2860_v38  ;;  %v1187_v0 = vadd.f32 %v1186_v47, %v994_v52  ;;  %v997_v10 = vpop.f32.mrb[40].mxu1 }
 0x1d0   : > { %v2196_v5 = vpop.eup %2195  ;;  %2211 = vrcp.f32 %v1392_v58  ;;  %v1190_v46 = vpop.f32.mrb[40].mxu0  ;;  %v998_v14 = vadd.f32 %v997_v10, %v2765_v6 }
 0x1d1   : > { %v2198_v9 = vpop.eup %2197  ;;  %2213 = vpow2.f32 %v1790_v60  ;;  %v1791_v26 = vmul.f32 -1.442695, %v1187_v0  ;;  %v2895_v11 = vmul.f32 %v2196_v5, %v2194_v59  ;;  %v999_v18 = vpop.f32.mrb[41].mxu1 }
 0x1d2   : > { %v2200_v62 = vpop.eup %2199  ;;  %v1192_v20 = vpop.f32.mrb[41].mxu0  ;;  %v1000_v38 = vadd.f32 %v999_v18, %v2767_v7  ;;  %v2902_v32 = vadd.f32 %v1190_v46, %v998_v14 }
 0x1d3   : > { %v2202_v56 = vpop.eup %2201  ;;  %2215 = vpow2.f32 %v1791_v26  ;;  %v1001_v21 = vpop.f32.mrb[42].mxu1  ;;  %v2899_v51 = vmul.f32 %v2200_v62, %v2198_v9 }
 0x1d4   : > { %v1194_v22 = vpop.f32.mrb[42].mxu0  ;;  %v1393_v24 = vadd.f32 1.0, %v2202_v56  ;;  %v1002_v28 = vadd.f32 %v1001_v21, %v2765_v6  ;;  %v1003_v33 = vpop.f32.mrb[43].mxu1  ;;  %2217 = vtanh.f32 %v2869_v4  ;;  %v1193_v54 = vadd.f32 %v1192_v20, %v1000_v38 }
 0x1d5   : > { %v1196_v34 = vpop.f32.mrb[43].mxu0  ;;  %v2204_v36 = vpop.eup %2203  ;;  %v1004_v37 = vadd.f32 %v1003_v33, %v2767_v7  ;;  %v1512_v40 = vpack.c.bf16 %v2899_v51, %v2895_v11 }
 0x1d6   : > { %2219 = vrcp.f32 %v1393_v24  ;;  %v1394_v41 = vadd.f32 1.0, %v2204_v36  ;;  %v2908_v43 = vadd.f32 %v1194_v22, %v1002_v28  ;;  %v2206_v45 = vpop.eup %2205  ;;  %v1792_v25 = vmul.f32 -1.442695, %v1193_v54 }
 0x1d7   : > { %2221 = vtanh.f32 %v2876_v15  ;;  %v1197_v47 = vadd.f32 %v1196_v34, %v1004_v37  ;;  %v1007_v55 = vpop.f32.mrb[44].mxu1 }
 0x1d8   : > { %v2208_v50 = vpop.eup %2207  ;;  %2223 = vrcp.f32 %v1394_v41  ;;  %v1200_v58 = vpop.f32.mrb[44].mxu0  ;;  %v1008_v0 = vadd.f32 %v1007_v55, %v2765_v6 }
 0x1d9   : > { %v2210_v52 = vpop.eup %2209  ;;  %2225 = vpow2.f32 %v1792_v25  ;;  %v1793_v4 = vmul.f32 -1.442695, %v1197_v47  ;;  %v2911_v59 = vmul.f32 %v2208_v50, %v2206_v45  ;;  %v1009_v5 = vpop.f32.mrb[45].mxu1 }
 0x1da   : > { %v2212_v60 = vpop.eup %2211  ;;  %v1202_v9 = vpop.f32.mrb[45].mxu0  ;;  %v1010_v15 = vadd.f32 %v1009_v5, %v2767_v7  ;;  %v2918_v20 = vadd.f32 %v1200_v58, %v1008_v0 }
 0x1db   : > { %v2214_v26 = vpop.eup %2213  ;;  %2227 = vpow2.f32 %v1793_v4  ;;  %v1011_v10 = vpop.f32.mrb[46].mxu1  ;;  %v2915_v62 = vmul.f32 %v2212_v60, %v2210_v52 }
 0x1dc   : > { %v1204_v46 = vpop.f32.mrb[46].mxu0  ;;  %v1395_v14 = vadd.f32 1.0, %v2214_v26  ;;  %v1012_v18 = vadd.f32 %v1011_v10, %v2765_v6  ;;  %v1013_v56 = vpop.f32.mrb[47].mxu1  ;;  %2229 = vtanh.f32 %v2886_v19  ;;  %v1203_v24 = vadd.f32 %v1202_v9, %v1010_v15 }
 0x1dd   : > { %v1206_v38 = vpop.f32.mrb[47].mxu0  ;;  %v2216_v21 = vpop.eup %2215  ;;  %v1014_v22 = vadd.f32 %v1013_v56, %v2767_v7  ;;  %v1513_v28 = vpack.c.bf16 %v2915_v62, %v2911_v59 }
 0x1de   : > { %2231 = vrcp.f32 %v1395_v14  ;;  %v1396_v33 = vadd.f32 1.0, %v2216_v21  ;;  %v2924_v34 = vadd.f32 %v1204_v46, %v1012_v18  ;;  %v2218_v36 = vpop.eup %2217  ;;  %v1794_v37 = vmul.f32 -1.442695, %v1203_v24 }
 0x1df   : > { %2233 = vtanh.f32 %v2892_v29  ;;  %v1207_v54 = vadd.f32 %v1206_v38, %v1014_v22  ;;  %v1017_v25 = vpop.f32.mrb[48].mxu1 }
 0x1e0   : > { %v2220_v41 = vpop.eup %2219  ;;  %2235 = vrcp.f32 %v1396_v33  ;;  %v1210_v47 = vpop.f32.mrb[48].mxu0  ;;  %v1018_v4 = vadd.f32 %v1017_v25, %v2765_v6 }
 0x1e1   : > { %v2222_v45 = vpop.eup %2221  ;;  %2237 = vpow2.f32 %v1794_v37  ;;  %v1795_v19 = vmul.f32 -1.442695, %v1207_v54  ;;  %v1489_v50 = vmul.f32 %v2220_v41, %v2218_v36  ;;  %v1019_v55 = vpop.f32.mrb[49].mxu1 }
 0x1e2   : > { %v2224_v52 = vpop.eup %2223  ;;  %v1212_v58 = vpop.f32.mrb[49].mxu0  ;;  %v1020_v0 = vadd.f32 %v1019_v55, %v2767_v7  ;;  %v2930_v10 = vadd.f32 %v1210_v47, %v1018_v4 }
 0x1e3   : > { %v2226_v60 = vpop.eup %2225  ;;  %2239 = vpow2.f32 %v1795_v19  ;;  %v1021_v29 = vpop.f32.mrb[50].mxu1  ;;  %v1490_v9 = vmul.f32 %v2224_v52, %v2222_v45 }
 0x1e4   : > { %v1214_v5 = vpop.f32.mrb[50].mxu0  ;;  %v1397_v26 = vadd.f32 1.0, %v2226_v60  ;;  %v1022_v15 = vadd.f32 %v1021_v29, %v2765_v6  ;;  %v1023_v46 = vpop.f32.mrb[51].mxu1  ;;  %2241 = vtanh.f32 %v2902_v32  ;;  %v1213_v38 = vadd.f32 %v1212_v58, %v1020_v0 }
 0x1e5   : > { %v1216_v14 = vpop.f32.mrb[51].mxu0  ;;  %v2228_v18 = vpop.eup %2227  ;;  %v1024_v56 = vadd.f32 %v1023_v46, %v2767_v7  ;;  %v1514_v21 = vpack.c.bf16 %v1490_v9, %v1489_v50 }
 0x1e6   : > { %2243 = vrcp.f32 %v1397_v26  ;;  %v1398_v22 = vadd.f32 1.0, %v2228_v18  ;;  %v2934_v24 = vadd.f32 %v1214_v5, %v1022_v15  ;;  %v2230_v33 = vpop.eup %2229  ;;  %v1796_v36 = vmul.f32 -1.442695, %v1213_v38 }
 0x1e7   : > { %2245 = vtanh.f32 %v2908_v43  ;;  %v1217_v37 = vadd.f32 %v1216_v14, %v1024_v56  ;;  %1813 = vmatprep.subr.bf16.mxu1 %v1514_v21  ;;  %v1027_v45 = vpop.f32.mrb[52].mxu1 }
 0x1e8   : > { %v2232_v54 = vpop.eup %2231  ;;  %2247 = vrcp.f32 %v1398_v22  ;;  %1814 = vmatpush3.bf16.xpose.msra.mxu1 %v1506_v53  ;;  %v1220_v19 = vpop.f32.mrb[52].mxu0  ;;  %v1028_v50 = vadd.f32 %v1027_v45, %v2765_v6 }
 0x1e9   : > { %v2234_v32 = vpop.eup %2233  ;;  %2249 = vpow2.f32 %v1796_v36  ;;  %v1797_v41 = vmul.f32 -1.442695, %v1217_v37  ;;  %v1491_v25 = vmul.f32 %v2232_v54, %v2230_v33  ;;  %v1029_v52 = vpop.f32.mrb[53].mxu1 }
 0x1ea   : > { %v2236_v47 = vpop.eup %2235  ;;  %v1222_v43 = vpop.f32.mrb[53].mxu0  ;;  %v1030_v55 = vadd.f32 %v1029_v52, %v2767_v7  ;;  %v2943_v53 = vadd.f32 %v1220_v19, %v1028_v50 }
 0x1eb   : > { %v2238_v4 = vpop.eup %2237  ;;  %2251 = vpow2.f32 %v1797_v41  ;;  %v1031_v58 = vpop.f32.mrb[54].mxu1  ;;  %v1492_v0 = vmul.f32 %v2236_v47, %v2234_v32 }
 0x1ec   : > { %v1224_v60 = vpop.f32.mrb[54].mxu0  ;;  %v1399_v35 = vadd.f32 1.0, %v2238_v4  ;;  %v1032_v44 = vadd.f32 %v1031_v58, %v2765_v6  ;;  %v1033_v29 = vpop.f32.mrb[55].mxu1  ;;  %2253 = vtanh.f32 %v2918_v20  ;;  %v1223_v15 = vadd.f32 %v1222_v43, %v1030_v55 }
 0x1ed   : > { %v1226_v5 = vpop.f32.mrb[55].mxu0  ;;  %v2240_v9 = vpop.eup %2239  ;;  %v1034_v26 = vadd.f32 %v1033_v29, %v2767_v7  ;;  %v1515_v46 = vpack.c.bf16 %v1492_v0, %v1491_v25 }
 0x1ee   : > { %2255 = vrcp.f32 %v1399_v35  ;;  %v1400_v14 = vadd.f32 1.0, %v2240_v9  ;;  %v2947_v18 = vadd.f32 %v1224_v60, %v1032_v44  ;;  %v2242_v56 = vpop.eup %2241  ;;  %v1798_v38 = vmul.f32 -1.442695, %v1223_v15 }
 0x1ef   : > { %2257 = vtanh.f32 %v2924_v34  ;;  %v1227_v21 = vadd.f32 %v1226_v5, %v1034_v26  ;;  %1815 = vmatprep.subr.bf16.mxu1 %v1515_v46  ;;  %v1037_v36 = vpop.f32.mrb[56].mxu1 }
 0x1f0   : > { %v2244_v22 = vpop.eup %2243  ;;  %2259 = vrcp.f32 %v1400_v14  ;;  %1816 = vmatpush3.bf16.xpose.msra.mxu1 %v1507_v27  ;;  %v1230_v37 = vpop.f32.mrb[56].mxu0  ;;  %v1038_v41 = vadd.f32 %v1037_v36, %v2765_v6 }
 0x1f1   : > { %v2246_v20 = vpop.eup %2245  ;;  %2261 = vpow2.f32 %v1798_v38  ;;  %v1799_v33 = vmul.f32 -1.442695, %v1227_v21  ;;  %v1493_v54 = vmul.f32 %v2244_v22, %v2242_v56  ;;  %v1039_v45 = vpop.f32.mrb[57].mxu1 }
 0x1f2   : > { %v2248_v32 = vpop.eup %2247  ;;  %v1232_v34 = vpop.f32.mrb[57].mxu0  ;;  %v1040_v25 = vadd.f32 %v1039_v45, %v2767_v7  ;;  %v2956_v27 = vadd.f32 %v1230_v37, %v1038_v41 }
 0x1f3   : > { %v2250_v19 = vpop.eup %2249  ;;  %2263 = vpow2.f32 %v1799_v33  ;;  %v1041_v47 = vpop.f32.mrb[58].mxu1  ;;  %v1494_v52 = vmul.f32 %v2248_v32, %v2246_v20 }
 0x1f4   : > { %v1234_v50 = vpop.f32.mrb[58].mxu0  ;;  %v1401_v8 = vadd.f32 1.0, %v2250_v19  ;;  %v1042_v16 = vadd.f32 %v1041_v47, %v2765_v6  ;;  %v1043_v43 = vpop.f32.mrb[59].mxu1  ;;  %2265 = vtanh.f32 %v2930_v10  ;;  %v1233_v60 = vadd.f32 %v1232_v34, %v1040_v25 }
 0x1f5   : > { %v1236_v4 = vpop.f32.mrb[59].mxu0  ;;  %v2252_v55 = vpop.eup %2251  ;;  %v1044_v58 = vadd.f32 %v1043_v43, %v2767_v7  ;;  %v1516_v0 = vpack.c.bf16 %v1494_v52, %v1493_v54 }
 0x1f6   : > { %2267 = vrcp.f32 %v1401_v8  ;;  %v1402_v35 = vadd.f32 1.0, %v2252_v55  ;;  %v1235_v44 = vadd.f32 %v1234_v50, %v1042_v16  ;;  %v2254_v29 = vpop.eup %2253  ;;  %v1800_v5 = vmul.f32 -1.442695, %v1233_v60 }
 0x1f7   : > { %2269 = vtanh.f32 %v2934_v24  ;;  %v1237_v9 = vadd.f32 %v1236_v4, %v1044_v58  ;;  %1817 = vmatprep.subr.bf16.mxu1 %v1516_v0  ;;  %v1047_v46 = vpop.f32.mrb[60].mxu1 }
 0x1f8   : > { %v2256_v26 = vpop.eup %2255  ;;  %2271 = vrcp.f32 %v1402_v35  ;;  %1818 = vmatpush3.bf16.xpose.msra.mxu1 %v1508_v61  ;;  %v1240_v14 = vpop.f32.mrb[60].mxu0  ;;  %v1048_v21 = vadd.f32 %v1047_v46, %v2765_v6 }
 0x1f9   : > { %v2258_v10 = vpop.eup %2257  ;;  %2273 = vpow2.f32 %v1800_v5  ;;  %v1801_v15 = vmul.f32 -1.442695, %v1237_v9  ;;  %v1495_v56 = vmul.f32 %v2256_v26, %v2254_v29  ;;  %v1049_v22 = vpop.f32.mrb[61].mxu1 }
 0x1fa   : > { %v2260_v38 = vpop.eup %2259  ;;  %v1242_v24 = vpop.f32.mrb[61].mxu0  ;;  %v1050_v33 = vadd.f32 %v1049_v22, %v2767_v7  ;;  %v1241_v61 = vadd.f32 %v1240_v14, %v1048_v21 }
 0x1fb   : > { %v2262_v20 = vpop.eup %2261  ;;  %2275 = vpow2.f32 %v1801_v15  ;;  %v1051_v36 = vpop.f32.mrb[62].mxu1  ;;  %v1496_v54 = vmul.f32 %v2260_v38, %v2258_v10 }
 0x1fc   : > { %v1244_v37 = vpop.f32.mrb[62].mxu0  ;;  %v1403_v39 = vadd.f32 1.0, %v2262_v20  ;;  %v1052_v49 = vadd.f32 %v1051_v36, %v2765_v6  ;;  %v1053_v32 = vpop.f32.mrb[63].mxu1  ;;  %2277 = vtanh.f32 %v2943_v53  ;;  %v1243_v19 = vadd.f32 %v1242_v24, %v1050_v33 }
 0x1fd   : > { %v1246_v41 = vpop.f32.mrb[63].mxu0  ;;  %v2264_v45 = vpop.eup %2263  ;;  %v1054_v34 = vadd.f32 %v1053_v32, %v2767_v7  ;;  %v1517_v25 = vpack.c.bf16 %v1496_v54, %v1495_v56 }
 0x1fe   : > { %2279 = vrcp.f32 %v1403_v39  ;;  %v1404_v47 = vadd.f32 1.0, %v2264_v45  ;;  %v1245_v50 = vadd.f32 %v1244_v37, %v1052_v49  ;;  %v2266_v52 = vpop.eup %2265  ;;  %v1802_v8 = vmul.f32 -1.442695, %v1243_v19 }
 0x1ff   : > { %2281 = vtanh.f32 %v2947_v18  ;;  %v1247_v16 = vadd.f32 %v1246_v41, %v1054_v34  ;;  %1819 = vmatprep.subr.bf16.mxu1 %v1517_v25 }
 0x200   : > { %v2268_v6 = vpop.eup %2267  ;;  %2283 = vrcp.f32 %v1404_v47  ;;  %1820 = vmatpush3.bf16.xpose.msra.mxu1 %v1509_v17 }
 0x201   : > { %v2270_v53 = vpop.eup %2269  ;;  %2285 = vpow2.f32 %v1802_v8  ;;  %v1803_v7 = vmul.f32 -1.442695, %v1247_v16  ;;  %v1497_v43 = vmul.f32 %v2268_v6, %v2266_v52 }
 0x202   : > { %v2272_v4 = vpop.eup %2271 }
 0x203   : > { %v2274_v55 = vpop.eup %2273  ;;  %2287 = vpow2.f32 %v1803_v7  ;;  %v1498_v58 = vmul.f32 %v2272_v4, %v2270_v53 }
 0x204   : > { %v1405_v60 = vadd.f32 1.0, %v2274_v55  ;;  %2289 = vtanh.f32 %v2956_v27 }
 0x205   : > { %v2276_v0 = vpop.eup %2275  ;;  %v1518_v18 = vpack.c.bf16 %v1498_v58, %v1497_v43 }
 0x206   : > { %2291 = vrcp.f32 %v1405_v60  ;;  %v1406_v35 = vadd.f32 1.0, %v2276_v0  ;;  %v2278_v29 = vpop.eup %2277 }
 0x207   : > { %2293 = vtanh.f32 %v1235_v44  ;;  %1821 = vmatprep.subr.bf16.mxu1 %v1518_v18 }
 0x208   : > { %v2280_v12 = vpop.eup %2279  ;;  %2295 = vrcp.f32 %v1406_v35  ;;  %1822 = vmatpush3.bf16.xpose.msra.mxu1 %v1510_v13 }
 0x209   : > { %v2282_v23 = vpop.eup %2281  ;;  %v1499_v17 = vmul.f32 %v2280_v12, %v2278_v29  ;;  %2297 = vtanh.f32 %v1241_v61 }
 0x20a   : > { %v2284_v5 = vpop.eup %2283 }
 0x20b   : > { %v2286_v9 = vpop.eup %2285  ;;  %v1500_v26 = vmul.f32 %v2284_v5, %v2282_v23 }
 0x20c   : > { %v1407_v10 = vadd.f32 1.0, %v2286_v9 }
 0x20d   : > { %v2288_v15 = vpop.eup %2287  ;;  %v1519_v27 = vpack.c.bf16 %v1500_v26, %v1499_v17 }
 0x20e   : > { %2299 = vrcp.f32 %v1407_v10  ;;  %v1408_v46 = vadd.f32 1.0, %v2288_v15  ;;  %v2290_v14 = vpop.eup %2289 }
 0x20f   : > { %2301 = vtanh.f32 %v1245_v50  ;;  %1823 = vmatprep.subr.bf16.mxu1 %v1519_v27 }
 0x210   : > { %v2292_v44 = vpop.eup %2291  ;;  %2303 = vrcp.f32 %v1408_v46  ;;  %1824 = vmatpush3.bf16.xpose.msra.mxu1 %v1511_v57  ;;  %v1577_v57 = vunpack.c.l.s4 %v2440_v42 }
 0x211   : > { %v2294_v48 = vpop.eup %2293  ;;  %v1501_v63 = vmul.f32 %v2292_v44, %v2290_v14 }
 0x212   : > { %v2296_v13 = vpop.eup %2295  ;;  %v1578_v51 = vunpack.c.0.s8 %v1577_v57 }
 0x213   : > { %v1502_v56 = vmul.f32 %v2296_v13, %v2294_v48  ;;  %v2298_v21 = vpop.eup %2297 }
 0x214   : > { %v1581_v61 = vsub.s32 %v1578_v51, %v2756_v2 }
 0x215   : > { %v1520_v38 = vpack.c.bf16 %v1502_v56, %v1501_v63 }
 0x217   : > { %1825 = vmatprep.subr.bf16.mxu1 %v1520_v38 }
 0x218   : > { %v2300_v22 = vpop.eup %2299  ;;  %1826 = vmatpush3.bf16.xpose.msra.mxu1 %v1512_v40 }
 0x219   : > { %v2302_v24 = vpop.eup %2301  ;;  %v1503_v20 = vmul.f32 %v2300_v22, %v2298_v21  ;;  %v1526_v31 = vpop.permute.xlu0 %1525 }
 0x21a   : > { %v2304_v33 = vpop.eup %2303  ;;  %v1531_v11 = vrot.slane %v1526_v31, %v535_v3 }
 0x21b   : > { %v1504_v36 = vmul.f32 %v2304_v33, %v2302_v24 }
 0x21d   : > { %v1521_v37 = vpack.c.bf16 %v1504_v36, %v1503_v20 }
 0x21f   : > { %1827 = vmatprep.subr.bf16.mxu1 %v1521_v37 }
 0x220   : > { %1828 = vmatpush3.bf16.xpose.msra.mxu1 %v1513_v28 }
 0x227   : > { %1830 = vmatmul.mubr.bf16.vlgmr.msra.gmra.mrb[64].mxu1 %v2796_v30 }
 0x2fa   : > { %v1566_v40 = vpop.f32.mrb[64].mxu1 }
 0x2fb   : > { %v1567_v54 = vadd.f32 %v1566_v40, %v1531_v11  ;;  %v1568_v39 = vpop.f32.mrb[65].mxu1 }
 0x2fc   : > { %v1569_v49 = vadd.f32 %v1568_v39, %v1531_v11  ;;  %v1570_v59 = vpop.f32.mrb[66].mxu1 }
 0x2fd   : > { %v1571_v62 = vpop.f32.mrb[67].mxu1 }
 0x2fe   : > { %v1575_v28 = vcombine.low %v1567_v54, %v1569_v49 }
 0x300   : > { %v1582_v30 = vrot.slane %v1575_v28, %v1581_v61 }
 0x302   : > { %v1589_v3 = vrot.slane %v1582_v30, %v1581_v61 }
 0x304   : > { %1595 = vst.msk [vmem:[%s267_s15] sm:$0x3] %vm1593_vm0, %v1589_v3 }
 0x305   : > { %2374 = shalt.err (!%p2371_p2)
}
 0x306   : > { %s2375_s9 = scalar_lea.hbm %s2996_s18, 32  ;;  %s2379_s8 = scalar_lea.hbm %s3045_s5, 64 }
 0x307   : > { %p2376_p3 = scmp.ne.s32.totalorder %s2996_s18, %s2375_s9  ;;  %p2380_p6 = scmp.lt.u32.totalorder %s2996_s18, %s3045_s5 }
 0x308   : > { %p2381_p8 = scmp.lt.u32.totalorder %s2379_s8, %s2375_s9  ;;  %p2383_p1 = scmp.lt.u32.totalorder %s2375_s9, %s2996_s18 }
 0x309   : > { %p2377_p13 = pnand %p2376_p3, %p3061_p10 }
 0x30a   : > { %p2382_p9 = por %p2381_p8, %p2380_p6 }
 0x30b   : > { %p2378_p7 = pneg %p2377_p13 }
 0x30c   : > { %p2384_p4 = por %p2383_p1, %p2382_p9 }
 0x30e   : > { %p2385_p5 = pnand %p2384_p4, %p2378_p7 }
 0x310   : > { %2388 = shalt.err (!%p2385_p5)
}
 0x311   : > { %1964 = dma.vmem_to_hbm [thread:$0]  (%p3061_p10), %s2998_s10, 32, %s2996_s18, %s1597_s19  }
 0x312 PF: > { %s1623_s24 = sand.u32 1, %s2419_s20   ;;  %p3062_p11 = scmp.ne.s32.totalorder %s3053_s7, 0 }
 0x313   : > { %s1624_s26 = scalar_lea.sflag [#allocation5], %s1623_s24 }
 0x314   : > { %p1971_p12 = pnand %p1694_p0, %p3062_p11 }
 0x316   : > { %2414 = dma.done.wait (!%p1971_p12), %s1624_s26, 32  }
 0x317   : > { %2416 = vsyncadd (!%p1971_p12), %s1624_s26, 4294967264  ;;  %p21_p2 = scmp.ge.s32.totalorder %s2500_s25, 4   ;;  %s3063_s20 = smov %s2423_s21 }
 0x318   : > { %s3064_s21 = smov %s2427_s22  ;;  %s3065_s22 = smov %s2512_s28 }
 0x319   : > { %s3066_s23 = smov %s2500_s25  ;;  %23 = sbr.rel (!%p21_p2) target bundleno = 9 (0x9), region = 89 }
 0x320   :  { %1629 = vsyncpa [#allocation4], 1 }
 0x321   :  { %1631 = vsyncpa [#allocation4 + $0x1], 1 }
 0x322   :  { %1632 = vsyncpa [#allocation7], 1 }
 0x323   :  { %1633 = vsyncpa [#allocation5], 1 }
 0x324   :  { %1635 = vsyncpa [#allocation5 + $0x1], 1 }

// kernel: tpu_custom_call.1
= control target key start
LH: loop header
LB: loop body
LE: loop exit
PB: predicated region body
PF: predicated region fallthrough
CT: control target
= control target key end

     0   :  { %s3040_s0 = inlined_call_operand.hbm [shape: f32[300,512], index: 0, kind: input, shape index: {}]   ;;  %s3041_s1 = inlined_call_operand.hbm [shape: bf16[512,256], index: 1, kind: input, shape index: {}]   ;;  %s3042_s2 = inlined_call_operand.vmem [shape: f32[1,256], index: 2, kind: input, shape index: {}]   ;;  %s3043_s3 = inlined_call_operand.vmem [shape: bf16[1,128], index: 3, kind: input, shape index: {}]   ;;  %s3044_s4 = inlined_call_operand.<no memory space> [shape: f32[1,1], index: 4, kind: input, shape index: {}]   ;;  %s3045_s5 = inlined_call_operand.hbm [shape: f32[2,1,256], index: 5, kind: output, shape index: {}]  }
   0x1   :  { %v10_v0 = vstv %s3044_s4 }
   0x2   :  { %11 = vst [vmem:[#allocation2] sm:$0x1] %v10_v0 }
   0x3   :  { %12 = vsyncpa [#allocation4], 0 }
   0x4   :  { %14 = vsyncpa [#allocation4 + $0x1], 0 }
   0x5   :  { %15 = vsyncpa [#allocation7], 0 }
   0x6   :  { %16 = vsyncpa [#allocation5], 0 }
   0x7   :  { %18 = vsyncpa [#allocation5 + $0x1], 0  ;;  %s2475_s20 = smov 0   ;;  %s2477_s21 = smov 0  }
   0x8   :  { %s2479_s22 = smov 0   ;;  %s2481_s23 = smov 0  }
   0x9 LB: > { %s2496_s4 = sadd.s32 4294967295, %s2431_s23   ;;  %s1691_s24 = sadd.s32 4294967294, %s2431_s23   ;;  %s2431_s23 = sphi %s2481_s23, %s3066_s23   ;;  %s2427_s22 = sphi %s2479_s22, %s3065_s22   ;;  %s2423_s21 = sphi %s2477_s21, %s3064_s21   ;;  %s2419_s20 = sphi %s2475_s20, %s3063_s20  }
   0xa   : > { %s2500_s25 = sadd.s32 1, %s2431_s23   ;;  %s31_s26 = sadd.s32 1, %s2427_s22 }
   0xb   : > { %s28_s27 = ssub.s32 %s2431_s23, %s2500_s25  ;;  %p38_p0 = scmp.ne.s32.totalorder %s2427_s22, %s2423_s21 }
   0xc   : > { %p29_p1 = scmp.eq.s32.totalorder %s28_s27, 0  ;;  %p39_p2 = scmp.eq.s32.totalorder %s2431_s23, 0 }
   0xd   : > { %p44_p3 = scmp.ne.s32.totalorder %s2423_s21, %s2419_s20  ;;  %p3046_p4 = scmp.eq.s32.totalorder %s2496_s4, 0 }
   0xe   : > { %s2512_s28 = scalar_select %p29_p1, %s2427_s22, %s31_s26  }
   0xf   : > { %p2514_p5 = por %p39_p2, %p38_p0  ;;  %p2520_p6 = por %p3046_p4, %p44_p3 }
  0x10   : > { %p152_p7 = scmp.eq.s32.totalorder %s2496_s4, 1  ;;  %p158_p8 = scmp.eq.s32.totalorder %s1691_s24, 1 }
  0x11   : > { %s3050_s29 = scalar_select %p2514_p5, 1, 0 }
  0x12   : > { %s3051_s30 = scalar_select %p2520_p6, 1, 0 }
  0x13   : > { %p1692_p9 = scmp.ge.s32.totalorder %s2431_s23, 1  ;;  %p165_p10 = scmp.lt.s32.totalorder %s2431_s23, 3 }
  0x14   : > { %p2527_p11 = por %p152_p7, %p38_p0  ;;  %p2531_p12 = por %p158_p8, %p44_p3 }
  0x15   : > { %p2535_p13 = pnand %p1692_p9, %p165_p10  ;;  %s2433_s9 = smov [#allocation6]  }
  0x16   : > { %s3052_s6 = scalar_select %p2527_p11, 1, 0 }
  0x17   : > { %s3053_s7 = scalar_select %p2531_p12, 1, 0 }
  0x18   : > { %s3054_s8 = scalar_select %p2535_p13, 1, 0 }
  0x19   : > { %p1966_p1 = pneg %p2535_p13  ;;  %s177_s10 = sshll.u32 %s2433_s9, 4  ;;  %s178_s10 = int_to_ptr.vmem [resolvable:$true] %s177_s10 }
  0x1a   : > { %s2305_s14 = scalar_lea.hbm %s3041_s1, 8192 }
  0x1b   : > { %p2543_p2 = pnand %p1966_p1, %p3046_p4  ;;  %p2306_p0 = scmp.ne.s32.totalorder %s3041_s1, %s2305_s14 }
  0x1c   : > { %p2312_p9 = scmp.lt.u32.totalorder %s2305_s14, %s3041_s1 }
  0x1d   : > { %p2307_p3 = pneg %p2543_p2 }
  0x1f   : > { %p2308_p7 = pnand %p2307_p3, %p2306_p0 }
  0x21   : > { %p2309_p8 = pneg %p2308_p7 }
  0x23   : > { %p2314_p10 = pnand %p2312_p9, %p2309_p8 }
  0x25   : > { %2317 = shalt.err (!%p2314_p10)
}
  0x26   : > { %s2318_s19 = scalar_lea.vmem %s178_s10, 8192  ;;  %p2326_p11 = scmp.lt.s32.totalorder %s178_s10, %s178_s10 }
  0x27   : > { %p2319_p1 = scmp.ne.s32.totalorder %s178_s10, %s2318_s19  ;;  %p2327_p6 = scmp.lt.s32.totalorder %s2318_s19, %s2318_s19 }
  0x29   : > { %p2321_p4 = pnand %p2319_p1, %p2307_p3  ;;  %p2328_p13 = por %p2327_p6, %p2326_p11 }
  0x2b   : > { %p2322_p12 = pneg %p2321_p4 }
  0x2d   : > { %p2329_p5 = pnand %p2328_p13, %p2322_p12 }
  0x2f   : > { %2332 = shalt.err (!%p2329_p5)
}
  0x30   : > { %s2434_s24 = smov 128   ;;  %s2435_s26 = smov 8  }
  0x31   : > { %1969 = dma.hbm_to_vmem [thread:$0]  (!%p2543_p2), %s3041_s1, 8192, %s178_s10, [#allocation7], %s2434_s24, %s2434_s24, %s2435_s26  }
  0x32   : > { %p1694_p0 = scmp.ge.s32.totalorder %s2431_s23, 2 }
  0x33   : > { %p3056_p4 = scmp.ne.s32.totalorder (!%p1694_p0), %s3050_s29, 0 }
  0x34   : > { %196 = sbr.rel (%p1694_p0) target bundleno = 94 (0x5e), region = 32 }
  0x3b   : > { %199 = sbr.rel (!%p3056_p4) target bundleno = 94 (0x5e), region = 36  ;;  %s200_s12 = sand.u32 (%p3056_p4), 1, %s2427_s22  }
  0x3c   : > { %s1696_s13 = sshll.u32 (%p3056_p4), %s2431_s23, 5  ;;  %s1695_s14 = sshll.u32 (%p3056_p4), %s200_s12, 10 }
  0x3d   : > { %s206_s15 = ssub.s32 (%p3056_p4), 38, %s1696_s13  ;;  %s2573_s16 = scalar_lea.sflag (%p3056_p4), [#allocation4], %s200_s12 }
  0x3e   : > { %p207_p5 = scmp.lt.s32.totalorder (%p3056_p4), %s206_s15, 32  ;;  %s204_s17 = scalar_lea.vmem (%p3056_p4), [#allocation3], %s1695_s14 }
  0x42   : > { %s3068_s15 = smov (!%p207_p5, %s206_s15), 32 }
  0x43   : > { %s2570_s11 = sshll.u32 %s3068_s15, 9 }
  0x44   : > { %s212_s10 = ssub.s32 16384, %s2570_s11 }
  0x45   : > { %213 = vsyncadd %s2573_s16, %s212_s10  ;;  %p1699_p6 = scmp.ne.s32.totalorder %s2570_s11, 0  ;;  %s1811_s29 = sshll.u32 %s2431_s23, 14 }
  0x46   : > { %s2581_s24 = scalar_lea.hbm %s3040_s0, %s1811_s29  ;;  %s219_s26 = sshll.u32 %s204_s17, 4  ;;  %s2583_s26 = int_to_ptr.vmem [resolvable:$true] %s219_s26 }
  0x47   : > { %s2333_s27 = scalar_lea.hbm %s2581_s24, %s2570_s11  ;;  %s2337_s13 = scalar_lea.hbm %s3040_s0, 19456 }
  0x48   : > { %p2334_p11 = scmp.ne.s32.totalorder %s2581_s24, %s2333_s27  ;;  %p2338_p2 = scmp.lt.u32.totalorder %s2581_s24, %s3040_s0 }
  0x49   : > { %p2339_p3 = scmp.lt.u32.totalorder %s2337_s13, %s2333_s27  ;;  %p2341_p8 = scmp.lt.u32.totalorder %s2333_s27, %s2581_s24 }
  0x4a   : > { %p2335_p12 = pnand %p2334_p11, %p1699_p6 }
  0x4b   : > { %p2340_p7 = por %p2339_p3, %p2338_p2 }
  0x4c   : > { %p2336_p13 = pneg %p2335_p12 }
  0x4d   : > { %p2342_p9 = por %p2341_p8, %p2340_p7 }
  0x4f   : > { %p2343_p10 = pnand %p2342_p9, %p2336_p13 }
  0x51   : > { %2346 = shalt.err (!%p2343_p10)
}
  0x52   : > { %s2347_s10 = scalar_lea.vmem %s2583_s26, %s2570_s11  ;;  %s2436_s17 = smov [#allocation3]  }
  0x53   : > { %p2348_p1 = scmp.ne.s32.totalorder %s2583_s26, %s2347_s10  ;;  %s2351_s29 = sshll.u32 %s2436_s17, 4  ;;  %s2352_s29 = int_to_ptr.vmem [resolvable:$false] %s2351_s29 }
  0x54   : > { %s2353_s18 = scalar_lea.vmem %s2352_s29, 32768  ;;  %p2354_p11 = scmp.lt.s32.totalorder %s2583_s26, %s2352_s29 }
  0x55   : > { %p2349_p4 = pnand %p2348_p1, %p1699_p6  ;;  %p2355_p12 = scmp.lt.s32.totalorder %s2353_s18, %s2347_s10 }
  0x57   : > { %p2350_p5 = pneg %p2349_p4  ;;  %p2356_p2 = por %p2355_p12, %p2354_p11 }
  0x59   : > { %p2357_p3 = pnand %p2356_p2, %p2350_p5 }
  0x5b   : > { %2360 = shalt.err (!%p2357_p3)
}
  0x5c   : > { %s2437_s19 = smov 512   ;;  %s2438_s27 = smov 32  }
  0x5d   : > { %225 = dma.hbm_to_vmem [thread:$0]  (%p1699_p6), %s2581_s24, %s2570_s11, %s2583_s26, %s2573_s16, %s2437_s19, %s2437_s19, %s2438_s27  }
  0x5e PF: > { %p3057_p13 = scmp.ne.s32.totalorder %s3054_s8, 0 }
  0x5f   : > { %s2613_s9 = sand.u32 (!%p3057_p13), 1, %s2423_s21   ;;  %p3058_p7 = scmp.ne.s32.totalorder (!%p3057_p13), %s3051_s30, 0 }
  0x60   : > { %231 = sbr.rel (%p3057_p13) target bundleno = 786 (0x312), region = 40  ;;  %s1705_s12 = sshll.u32 (!%p3057_p13), %s2613_s9, 10 }
  0x61   : > { %s234_s13 = scalar_lea.sflag (!%p3057_p13), [#allocation4], %s2613_s9  ;;  %s2617_s14 = scalar_lea.vmem (!%p3057_p13), [#allocation3], %s1705_s12 }
  0x67   : > { %2406 = dma.done.wait (%p3058_p7), %s234_s13, 16384  }
  0x68   : > { %2408 = vsyncadd (%p3058_p7), %s234_s13, 4294950912  ;;  %p3059_p6 = scmp.eq.s32.totalorder %s2496_s4, 0 }
  0x6a   : > { %2410 = dma.done.wait (%p3059_p6), [#allocation7], 8192   ;;  %p3060_p8 = pmov %p3059_p6 }
  0x6b   : > { %v2017_v1 = vld [vmem:[#allocation6 + $0x4] ss:$8 sps:$4 sm:$0xff]   ;;  %v2021_v3 = vld [vmem:[#allocation6] ss:$8 sps:$4 sm:$0xff]   ;;  %v2023_v5 = vld [vmem:[#allocation6 + $0x14] ss:$8 sps:$4 sm:$0xff]  }
  0x6c   : > { %2412 = vsyncadd (%p3060_p8), [#allocation7], 4294959104  ;;  %v2019_v2 = vld [vmem:[#allocation6 + $0x104] ss:$8 sps:$4 sm:$0xff]   ;;  %863 = vmatprep.subr.bf16.mxu1 %v2017_v1  ;;  %v2022_v4 = vld [vmem:[#allocation6 + $0x100] ss:$8 sps:$4 sm:$0xff]  }
  0x6d   : > { %1056 = vmatprep.subr.bf16.mxu0 %v2019_v2  ;;  %864 = vmatpush1.bf16.msra.mxu1 %v2021_v3  ;;  %v2025_v6 = vld [vmem:[#allocation6 + $0x114] ss:$8 sps:$4 sm:$0xff]   ;;  %v2027_v7 = vld [vmem:[#allocation6 + $0x10] ss:$8 sps:$4 sm:$0xff]   ;;  %v2029_v9 = vld [vmem:[#allocation6 + $0x24] ss:$8 sps:$4 sm:$0xff]  }
  0x6e   : > { %1057 = vmatpush1.bf16.msra.mxu0 %v2022_v4  ;;  %865 = vmatprep.subr.bf16.mxu1 %v2023_v5  ;;  %v2028_v8 = vld [vmem:[#allocation6 + $0x110] ss:$8 sps:$4 sm:$0xff]   ;;  %v2031_v10 = vld [vmem:[#allocation6 + $0x124] ss:$8 sps:$4 sm:$0xff]   ;;  %v2033_v11 = vld [vmem:[#allocation6 + $0x20] ss:$8 sps:$4 sm:$0xff]  }
  0x6f   : > { %1058 = vmatprep.subr.bf16.mxu0 %v2025_v6  ;;  %v2034_v12 = vld [vmem:[#allocation6 + $0x120] ss:$8 sps:$4 sm:$0xff]   ;;  %v2035_v13 = vld [vmem:[#allocation6 + $0x34] ss:$8 sps:$4 sm:$0xff]   ;;  %v2039_v15 = vld [vmem:[#allocation6 + $0x30] ss:$8 sps:$4 sm:$0xff]  }
  0x70   : > { %v2037_v14 = vld [vmem:[#allocation6 + $0x134] ss:$8 sps:$4 sm:$0xff]   ;;  %v2040_v16 = vld [vmem:[#allocation6 + $0x130] ss:$8 sps:$4 sm:$0xff]   ;;  %v2041_v17 = vld [vmem:[#allocation6 + $0x44] ss:$8 sps:$4 sm:$0xff]  }
  0x71   : > { %866 = vmatpush1.bf16.msra.mxu1 %v2027_v7  ;;  %v2043_v18 = vld [vmem:[#allocation6 + $0x144] ss:$8 sps:$4 sm:$0xff]   ;;  %v2045_v19 = vld [vmem:[#allocation6 + $0x40] ss:$8 sps:$4 sm:$0xff]   ;;  %v2047_v21 = vld [vmem:[#allocation6 + $0x54] ss:$8 sps:$4 sm:$0xff]  }
  0x72   : > { %1059 = vmatpush1.bf16.msra.mxu0 %v2028_v8  ;;  %867 = vmatprep.subr.bf16.mxu1 %v2029_v9  ;;  %v2046_v20 = vld [vmem:[#allocation6 + $0x140] ss:$8 sps:$4 sm:$0xff]   ;;  %v2049_v22 = vld [vmem:[#allocation6 + $0x154] ss:$8 sps:$4 sm:$0xff]   ;;  %v2051_v23 = vld [vmem:[#allocation6 + $0x50] ss:$8 sps:$4 sm:$0xff]  }
  0x73   : > { %1060 = vmatprep.subr.bf16.mxu0 %v2031_v10  ;;  %v2052_v24 = vld [vmem:[#allocation6 + $0x150] ss:$8 sps:$4 sm:$0xff]   ;;  %v2053_v25 = vld [vmem:[#allocation6 + $0x64] ss:$8 sps:$4 sm:$0xff]   ;;  %v2057_v27 = vld [vmem:[#allocation6 + $0x60] ss:$8 sps:$4 sm:$0xff]  }
  0x74   : > { %v2055_v26 = vld [vmem:[#allocation6 + $0x164] ss:$8 sps:$4 sm:$0xff]   ;;  %v2058_v28 = vld [vmem:[#allocation6 + $0x160] ss:$8 sps:$4 sm:$0xff]   ;;  %v2059_v29 = vld [vmem:[#allocation6 + $0x74] ss:$8 sps:$4 sm:$0xff]  }
  0x75   : > { %868 = vmatpush1.bf16.msra.mxu1 %v2033_v11  ;;  %v2061_v30 = vld [vmem:[#allocation6 + $0x174] ss:$8 sps:$4 sm:$0xff]   ;;  %v2063_v31 = vld [vmem:[#allocation6 + $0x70] ss:$8 sps:$4 sm:$0xff]   ;;  %v2065_v33 = vld [vmem:[#allocation6 + $0x84] ss:$8 sps:$4 sm:$0xff]  }
  0x76   : > { %1061 = vmatpush1.bf16.msra.mxu0 %v2034_v12  ;;  %869 = vmatprep.subr.bf16.mxu1 %v2035_v13  ;;  %v2064_v32 = vld [vmem:[#allocation6 + $0x170] ss:$8 sps:$4 sm:$0xff]   ;;  %v2067_v34 = vld [vmem:[#allocation6 + $0x184] ss:$8 sps:$4 sm:$0xff]   ;;  %v2069_v35 = vld [vmem:[#allocation6 + $0x80] ss:$8 sps:$4 sm:$0xff]  }
  0x77   : > { %1062 = vmatprep.subr.bf16.mxu0 %v2037_v14  ;;  %v2070_v36 = vld [vmem:[#allocation6 + $0x180] ss:$8 sps:$4 sm:$0xff]   ;;  %v2071_v37 = vld [vmem:[#allocation6 + $0x94] ss:$8 sps:$4 sm:$0xff]   ;;  %v2075_v39 = vld [vmem:[#allocation6 + $0x90] ss:$8 sps:$4 sm:$0xff]  }
  0x78   : > { %v2073_v38 = vld [vmem:[#allocation6 + $0x194] ss:$8 sps:$4 sm:$0xff]   ;;  %v2076_v40 = vld [vmem:[#allocation6 + $0x190] ss:$8 sps:$4 sm:$0xff]   ;;  %v2077_v41 = vld [vmem:[#allocation6 + $0xa4] ss:$8 sps:$4 sm:$0xff]  }
  0x79   : > { %870 = vmatpush1.bf16.msra.mxu1 %v2039_v15  ;;  %v2079_v42 = vld [vmem:[#allocation6 + $0x1a4] ss:$8 sps:$4 sm:$0xff]   ;;  %v2081_v43 = vld [vmem:[#allocation6 + $0xa0] ss:$8 sps:$4 sm:$0xff]   ;;  %v2083_v45 = vld [vmem:[#allocation6 + $0xb4] ss:$8 sps:$4 sm:$0xff]  }
  0x7a   : > { %1063 = vmatpush1.bf16.msra.mxu0 %v2040_v16  ;;  %871 = vmatprep.subr.bf16.mxu1 %v2041_v17  ;;  %v2082_v44 = vld [vmem:[#allocation6 + $0x1a0] ss:$8 sps:$4 sm:$0xff]   ;;  %v2085_v46 = vld [vmem:[#allocation6 + $0x1b4] ss:$8 sps:$4 sm:$0xff]   ;;  %v2087_v51 = vld [vmem:[#allocation6 + $0xb0] ss:$8 sps:$4 sm:$0xff]  }
  0x7b   : > { %1064 = vmatprep.subr.bf16.mxu0 %v2043_v18  ;;  %v276_v47 = vld [vmem:[%s2617_s14 + $0x8] sm:$0xff]  ;;  %v278_v49 = vld [vmem:[%s2617_s14 + $0x18] sm:$0xff]  ;;  %v275_v7 = vld [vmem:[%s2617_s14] sm:$0xff]  ;;  %s1707_s24 = sshll.u32 %s2613_s9, 1  ;;  %s1812_s26 = sshll.u32 %s2496_s4, 5 }
  0x7c   : > { %v280_v48 = vld [vmem:[%s2617_s14 + $0x28] sm:$0xff]  ;;  %v282_v50 = vld [vmem:[%s2617_s14 + $0x38] sm:$0xff]  ;;  %v279_v8 = vld [vmem:[%s2617_s14 + $0x20] sm:$0xff]  ;;  %s267_s15 = scalar_lea.vmem [#allocation8], %s1707_s24  ;;  %s2996_s18 = scalar_lea.hbm %s3045_s5, %s1812_s26 }
  0x7d   : > { %872 = vmatpush1.bf16.msra.mxu1 %v2045_v19  ;;  %v2088_v52 = vld [vmem:[#allocation6 + $0x1b0] ss:$8 sps:$4 sm:$0xff]   ;;  %v404_v53 = vpack.c.bf16 %v280_v48, %v276_v47  ;;  %v406_v54 = vpack.c.bf16 %v282_v50, %v278_v49  ;;  %v2089_v55 = vld [vmem:[#allocation6 + $0xc4] ss:$8 sps:$4 sm:$0xff]   ;;  %v2093_v57 = vld [vmem:[#allocation6 + $0xc0] ss:$8 sps:$4 sm:$0xff]   ;;  %v403_v15 = vpack.c.bf16 %v279_v8, %v275_v7 }
  0x7e   : > { %1065 = vmatpush1.bf16.msra.mxu0 %v2046_v20  ;;  %873 = vmatprep.subr.bf16.mxu1 %v2047_v21  ;;  %v2091_v56 = vld [vmem:[#allocation6 + $0x1c4] ss:$8 sps:$4 sm:$0xff]   ;;  %v2094_v58 = vld [vmem:[#allocation6 + $0x1c0] ss:$8 sps:$4 sm:$0xff]   ;;  %v2095_v59 = vld [vmem:[#allocation6 + $0xd4] ss:$8 sps:$4 sm:$0xff]  }
  0x7f   : > { %1066 = vmatprep.subr.bf16.mxu0 %v2049_v22  ;;  %895 = vmatprep.mubr.bf16.mxu1 %v404_v53  ;;  %v2097_v60 = vld [vmem:[#allocation6 + $0x1d4] ss:$8 sps:$4 sm:$0xff]   ;;  %v2099_v61 = vld [vmem:[#allocation6 + $0xd0] ss:$8 sps:$4 sm:$0xff]   ;;  %v2101_v63 = vld [vmem:[#allocation6 + $0xe4] ss:$8 sps:$4 sm:$0xff]  }
  0x80   : > { %1088 = vmatprep.mubr.bf16.mxu0 %v406_v54  ;;  %v2100_v62 = vld [vmem:[#allocation6 + $0x1d0] ss:$8 sps:$4 sm:$0xff]   ;;  %v2103_v0 = vld [vmem:[#allocation6 + $0x1e4] ss:$8 sps:$4 sm:$0xff]   ;;  %v2105_v1 = vld [vmem:[#allocation6 + $0xe0] ss:$8 sps:$4 sm:$0xff]  }
  0x81   : > { %874 = vmatpush1.bf16.msra.mxu1 %v2051_v23  ;;  %v2106_v2 = vld [vmem:[#allocation6 + $0x1e0] ss:$8 sps:$4 sm:$0xff]   ;;  %v2107_v3 = vld [vmem:[#allocation6 + $0xf4] ss:$8 sps:$4 sm:$0xff]   ;;  %v2111_v5 = vld [vmem:[#allocation6 + $0xf0] ss:$8 sps:$4 sm:$0xff]  }
  0x82   : > { %1067 = vmatpush1.bf16.msra.mxu0 %v2052_v24  ;;  %875 = vmatprep.subr.bf16.mxu1 %v2053_v25  ;;  %v2109_v4 = vld [vmem:[#allocation6 + $0x1f4] ss:$8 sps:$4 sm:$0xff]   ;;  %v2112_v6 = vld [vmem:[#allocation6 + $0x1f0] ss:$8 sps:$4 sm:$0xff]   ;;  %v284_v11 = vld [vmem:[%s2617_s14 + $0x48] sm:$0xff]  ;;  %s1611_s10 = sshll.u32 %s267_s15, 4  ;;  %s2998_s10 = int_to_ptr.vmem [resolvable:$true] %s1611_s10 }
  0x83   : > { %1068 = vmatprep.subr.bf16.mxu0 %v2055_v26  ;;  %v277_v9 = vld [vmem:[%s2617_s14 + $0x10] sm:$0xff]  ;;  %v288_v12 = vld [vmem:[%s2617_s14 + $0x68] sm:$0xff]  ;;  %v286_v13 = vld [vmem:[%s2617_s14 + $0x58] sm:$0xff]  ;;  %s1597_s19 = scalar_lea.sflag [#allocation5], %s2613_s9  ;;  %s2361_s27 = scalar_lea.vmem %s2998_s10, 32 }
  0x84   : > { %v281_v10 = vld [vmem:[%s2617_s14 + $0x30] sm:$0xff]  ;;  %v290_v14 = vld [vmem:[%s2617_s14 + $0x78] sm:$0xff]  ;;  %v408_v17 = vpack.c.bf16 %v288_v12, %v284_v11  ;;  %v283_v19 = vld [vmem:[%s2617_s14 + $0x40] sm:$0xff]  ;;  %p2362_p9 = scmp.ne.s32.totalorder %s2998_s10, %s2361_s27  ;;  %p3061_p10 = scmp.ne.s32.totalorder %s3052_s6, 0 }
  0x85   : > { %876 = vmatpush1.bf16.msra.mxu1 %v2057_v27  ;;  %v405_v16 = vpack.c.bf16 %v281_v10, %v277_v9  ;;  %v410_v18 = vpack.c.bf16 %v290_v14, %v286_v13  ;;  %v287_v20 = vld [vmem:[%s2617_s14 + $0x60] sm:$0xff]  ;;  %v285_v21 = vld [vmem:[%s2617_s14 + $0x50] sm:$0xff]  ;;  %v292_v23 = vld [vmem:[%s2617_s14 + $0x88] sm:$0xff]  ;;  %s2441_s4 = smov [#allocation8]  }
  0x86   : > { %1069 = vmatpush1.bf16.msra.mxu0 %v2058_v28  ;;  %877 = vmatprep.subr.bf16.mxu1 %v2059_v29  ;;  %v289_v22 = vld [vmem:[%s2617_s14 + $0x70] sm:$0xff]  ;;  %v296_v24 = vld [vmem:[%s2617_s14 + $0xa8] sm:$0xff]  ;;  %v294_v25 = vld [vmem:[%s2617_s14 + $0x98] sm:$0xff]  ;;  %v407_v27 = vpack.c.bf16 %v287_v20, %v283_v19  ;;  %p2363_p1 = pnand %p2362_p9, %p3061_p10  ;;  %s2365_s12 = sshll.u32 %s2441_s4, 4  ;;  %s2366_s12 = int_to_ptr.vmem [resolvable:$false] %s2365_s12 }
  0x87   : > { %1070 = vmatprep.subr.bf16.mxu0 %v2061_v30  ;;  %v298_v26 = vld [vmem:[%s2617_s14 + $0xb8] sm:$0xff]  ;;  %v409_v28 = vpack.c.bf16 %v289_v22, %v285_v21  ;;  %v412_v29 = vpack.c.bf16 %v296_v24, %v292_v23  ;;  %v308_v47 = vld [vmem:[%s2617_s14 + $0x108] sm:$0xff]  ;;  %s2367_s13 = scalar_lea.vmem %s2366_s12, 64  ;;  %p2368_p5 = scmp.lt.s32.totalorder %s2998_s10, %s2366_s12 }
  0x88   : > { %v414_v30 = vpack.c.bf16 %v298_v26, %v294_v25  ;;  %v312_v48 = vld [vmem:[%s2617_s14 + $0x128] sm:$0xff]  ;;  %v310_v49 = vld [vmem:[%s2617_s14 + $0x118] sm:$0xff]  ;;  %p2364_p4 = pneg %p2363_p1  ;;  %p2369_p11 = scmp.lt.s32.totalorder %s2367_s13, %s2361_s27 }
  0x89   : > { %878 = vmatpush1.bf16.msra.mxu1 %v2063_v31  ;;  %v291_v31 = vld [vmem:[%s2617_s14 + $0x80] sm:$0xff]  ;;  %v314_v50 = vld [vmem:[%s2617_s14 + $0x138] sm:$0xff]  ;;  %v420_v53 = vpack.c.bf16 %v312_v48, %v308_v47  ;;  %v324_v7 = vld [vmem:[%s2617_s14 + $0x188] sm:$0xff] }
  0x8a   : > { %1071 = vmatpush1.bf16.msra.mxu0 %v2064_v32  ;;  %879 = vmatprep.subr.bf16.mxu1 %v2065_v33  ;;  %v295_v32 = vld [vmem:[%s2617_s14 + $0xa0] sm:$0xff]  ;;  %v293_v33 = vld [vmem:[%s2617_s14 + $0x90] sm:$0xff]  ;;  %v422_v54 = vpack.c.bf16 %v314_v50, %v310_v49  ;;  %v328_v8 = vld [vmem:[%s2617_s14 + $0x1a8] sm:$0xff]  ;;  %p2370_p12 = por %p2369_p11, %p2368_p5 }
  0x8b   : > { %1072 = vmatprep.subr.bf16.mxu0 %v2067_v34  ;;  %v297_v34 = vld [vmem:[%s2617_s14 + $0xb0] sm:$0xff]  ;;  %v326_v9 = vld [vmem:[%s2617_s14 + $0x198] sm:$0xff]  ;;  %v428_v13 = vpack.c.bf16 %v328_v8, %v324_v7  ;;  %v332_v19 = vld [vmem:[%s2617_s14 + $0x1c8] sm:$0xff] }
  0x8c   : > { %v330_v10 = vld [vmem:[%s2617_s14 + $0x1b8] sm:$0xff]  ;;  %v336_v20 = vld [vmem:[%s2617_s14 + $0x1e8] sm:$0xff]  ;;  %p2371_p2 = pnand %p2370_p12, %p2364_p4 }
  0x8d   : > { %880 = vmatpush1.bf16.msra.mxu1 %v2069_v35  ;;  %v300_v35 = vld [vmem:[%s2617_s14 + $0xc8] sm:$0xff]  ;;  %v430_v14 = vpack.c.bf16 %v330_v10, %v326_v9  ;;  %v334_v21 = vld [vmem:[%s2617_s14 + $0x1d8] sm:$0xff]  ;;  %v432_v25 = vpack.c.bf16 %v336_v20, %v332_v19 }
  0x8e   : > { %1073 = vmatpush1.bf16.msra.mxu0 %v2070_v36  ;;  %881 = vmatprep.subr.bf16.mxu1 %v2071_v37  ;;  %v304_v36 = vld [vmem:[%s2617_s14 + $0xe8] sm:$0xff]  ;;  %v302_v37 = vld [vmem:[%s2617_s14 + $0xd8] sm:$0xff] }
  0x8f   : > { %1074 = vmatprep.subr.bf16.mxu0 %v2073_v38  ;;  %v306_v38 = vld [vmem:[%s2617_s14 + $0xf8] sm:$0xff] }
  0x90   : > { %v338_v22 = vld [vmem:[%s2617_s14 + $0x1f8] sm:$0xff] }
  0x91   : > { %882 = vmatpush1.bf16.msra.mxu1 %v2075_v39  ;;  %v411_v39 = vpack.c.bf16 %v295_v32, %v291_v31  ;;  %v434_v26 = vpack.c.bf16 %v338_v22, %v334_v21  ;;  %v340_v31 = vld [vmem:[%s2617_s14 + $0x208] sm:$0xff] }
  0x92   : > { %1075 = vmatpush1.bf16.msra.mxu0 %v2076_v40  ;;  %883 = vmatprep.subr.bf16.mxu1 %v2077_v41  ;;  %v413_v40 = vpack.c.bf16 %v297_v34, %v293_v33  ;;  %v416_v41 = vpack.c.bf16 %v304_v36, %v300_v35  ;;  %v344_v32 = vld [vmem:[%s2617_s14 + $0x228] sm:$0xff]  ;;  %v342_v33 = vld [vmem:[%s2617_s14 + $0x218] sm:$0xff] }
  0x93   : > { %1076 = vmatprep.subr.bf16.mxu0 %v2079_v42  ;;  %v418_v42 = vpack.c.bf16 %v306_v38, %v302_v37  ;;  %v346_v34 = vld [vmem:[%s2617_s14 + $0x238] sm:$0xff]  ;;  %v436_v37 = vpack.c.bf16 %v344_v32, %v340_v31 }
  0x94   : > { %v438_v38 = vpack.c.bf16 %v346_v34, %v342_v33 }
  0x95   : > { %884 = vmatpush1.bf16.msra.mxu1 %v2081_v43  ;;  %v299_v43 = vld [vmem:[%s2617_s14 + $0xc0] sm:$0xff] }
  0x96   : > { %1077 = vmatpush1.bf16.msra.mxu0 %v2082_v44  ;;  %885 = vmatprep.subr.bf16.mxu1 %v2083_v45  ;;  %v303_v44 = vld [vmem:[%s2617_s14 + $0xe0] sm:$0xff]  ;;  %v301_v45 = vld [vmem:[%s2617_s14 + $0xd0] sm:$0xff] }
  0x97   : > { %1078 = vmatprep.subr.bf16.mxu0 %v2085_v46  ;;  %v305_v46 = vld [vmem:[%s2617_s14 + $0xf0] sm:$0xff] }
  0x99   : > { %886 = vmatpush1.bf16.msra.mxu1 %v2087_v51  ;;  %v415_v51 = vpack.c.bf16 %v303_v44, %v299_v43  ;;  %v348_v43 = vld [vmem:[%s2617_s14 + $0x248] sm:$0xff] }
  0x9a   : > { %1079 = vmatpush1.bf16.msra.mxu0 %v2088_v52  ;;  %887 = vmatprep.subr.bf16.mxu1 %v2089_v55  ;;  %v417_v52 = vpack.c.bf16 %v305_v46, %v301_v45  ;;  %v307_v55 = vld [vmem:[%s2617_s14 + $0x100] sm:$0xff]  ;;  %v352_v44 = vld [vmem:[%s2617_s14 + $0x268] sm:$0xff]  ;;  %v350_v45 = vld [vmem:[%s2617_s14 + $0x258] sm:$0xff] }
  0x9b   : > { %1080 = vmatprep.subr.bf16.mxu0 %v2091_v56  ;;  %v311_v56 = vld [vmem:[%s2617_s14 + $0x120] sm:$0xff]  ;;  %v354_v46 = vld [vmem:[%s2617_s14 + $0x278] sm:$0xff]  ;;  %v440_v49 = vpack.c.bf16 %v352_v44, %v348_v43 }
  0x9c   : > { %v442_v50 = vpack.c.bf16 %v354_v46, %v350_v45 }
  0x9d   : > { %888 = vmatpush1.bf16.msra.mxu1 %v2093_v57  ;;  %v309_v57 = vld [vmem:[%s2617_s14 + $0x110] sm:$0xff] }
  0x9e   : > { %1081 = vmatpush1.bf16.msra.mxu0 %v2094_v58  ;;  %889 = vmatprep.subr.bf16.mxu1 %v2095_v59  ;;  %v313_v58 = vld [vmem:[%s2617_s14 + $0x130] sm:$0xff]  ;;  %v316_v59 = vld [vmem:[%s2617_s14 + $0x148] sm:$0xff] }
  0x9f   : > { %1082 = vmatprep.subr.bf16.mxu0 %v2097_v60  ;;  %v320_v60 = vld [vmem:[%s2617_s14 + $0x168] sm:$0xff] }
  0xa1   : > { %890 = vmatpush1.bf16.msra.mxu1 %v2099_v61  ;;  %v318_v61 = vld [vmem:[%s2617_s14 + $0x158] sm:$0xff] }
  0xa2   : > { %1083 = vmatpush1.bf16.msra.mxu0 %v2100_v62  ;;  %891 = vmatprep.subr.bf16.mxu1 %v2101_v63  ;;  %v322_v62 = vld [vmem:[%s2617_s14 + $0x178] sm:$0xff]  ;;  %v419_v63 = vpack.c.bf16 %v311_v56, %v307_v55  ;;  %v356_v55 = vld [vmem:[%s2617_s14 + $0x288] sm:$0xff] }
  0xa3   : > { %1084 = vmatprep.subr.bf16.mxu0 %v2103_v0  ;;  %v421_v0 = vpack.c.bf16 %v313_v58, %v309_v57  ;;  %v360_v56 = vld [vmem:[%s2617_s14 + $0x2a8] sm:$0xff]  ;;  %v358_v57 = vld [vmem:[%s2617_s14 + $0x298] sm:$0xff] }
  0xa4   : > { %v362_v58 = vld [vmem:[%s2617_s14 + $0x2b8] sm:$0xff] }
  0xa5   : > { %892 = vmatpush1.bf16.msra.mxu1 %v2105_v1  ;;  %v424_v1 = vpack.c.bf16 %v320_v60, %v316_v59 }
  0xa6   : > { %1085 = vmatpush1.bf16.msra.mxu0 %v2106_v2  ;;  %893 = vmatprep.subr.bf16.mxu1 %v2107_v3  ;;  %v426_v2 = vpack.c.bf16 %v322_v62, %v318_v61  ;;  %v315_v3 = vld [vmem:[%s2617_s14 + $0x140] sm:$0xff]  ;;  %v444_v61 = vpack.c.bf16 %v360_v56, %v356_v55  ;;  %v446_v62 = vpack.c.bf16 %v362_v58, %v358_v57 }
  0xa7   : > { %1086 = vmatprep.subr.bf16.mxu0 %v2109_v4  ;;  %v319_v4 = vld [vmem:[%s2617_s14 + $0x160] sm:$0xff] }
  0xa8   : > { %v423_v11 = vpack.c.bf16 %v319_v4, %v315_v3  ;;  %v364_v3 = vld [vmem:[%s2617_s14 + $0x2c8] sm:$0xff] }
  0xa9   : > { %894 = vmatpush1.bf16.msra.mxu1 %v2111_v5  ;;  %v317_v5 = vld [vmem:[%s2617_s14 + $0x150] sm:$0xff]  ;;  %v368_v4 = vld [vmem:[%s2617_s14 + $0x2e8] sm:$0xff] }
  0xaa   : > { %1087 = vmatpush1.bf16.msra.mxu0 %v2112_v6  ;;  %v321_v6 = vld [vmem:[%s2617_s14 + $0x170] sm:$0xff]  ;;  %v448_v9 = vpack.c.bf16 %v368_v4, %v364_v3  ;;  %v531_v4 = vld [vmem:[%s3042_s2] sm:$0x3] }
  0xab   : > { %v425_v12 = vpack.c.bf16 %v321_v6, %v317_v5  ;;  %v366_v5 = vld [vmem:[%s2617_s14 + $0x2d8] sm:$0xff] }
  0xac   : > { %896 = vmatmul.mubr.bf16.vlgmr.msra.gmra.mrb[0].mxu1 %v403_v15  ;;  %v323_v15 = vld [vmem:[%s2617_s14 + $0x180] sm:$0xff]  ;;  %v370_v6 = vld [vmem:[%s2617_s14 + $0x2f8] sm:$0xff] }
  0xad   : > { %1089 = vmatmul.mubr.bf16.vlgmr.msra.gmra.mrb[0].mxu0 %v405_v16  ;;  %905 = vmatprep.mubr.bf16.mxu1 %v408_v17  ;;  %v327_v16 = vld [vmem:[%s2617_s14 + $0x1a0] sm:$0xff]  ;;  %v325_v17 = vld [vmem:[%s2617_s14 + $0x190] sm:$0xff]  ;;  %v450_v10 = vpack.c.bf16 %v370_v6, %v366_v5 }
  0xae   : > { %1098 = vmatprep.mubr.bf16.mxu0 %v410_v18  ;;  %v329_v18 = vld [vmem:[%s2617_s14 + $0x1b0] sm:$0xff]  ;;  %v427_v23 = vpack.c.bf16 %v327_v16, %v323_v15  ;;  %v372_v15 = vld [vmem:[%s2617_s14 + $0x308] sm:$0xff] }
  0xaf   : > { %v429_v24 = vpack.c.bf16 %v329_v18, %v325_v17  ;;  %v376_v16 = vld [vmem:[%s2617_s14 + $0x328] sm:$0xff]  ;;  %v374_v17 = vld [vmem:[%s2617_s14 + $0x318] sm:$0xff] }
  0xb0   : > { %v378_v18 = vld [vmem:[%s2617_s14 + $0x338] sm:$0xff]  ;;  %v452_v21 = vpack.c.bf16 %v376_v16, %v372_v15 }
  0xb1   : > { %v454_v22 = vpack.c.bf16 %v378_v18, %v374_v17 }
  0xb4   : > { %906 = vmatmul.mubr.bf16.gmra.mrb[4].mxu1 %v407_v27  ;;  %v331_v27 = vld [vmem:[%s2617_s14 + $0x1c0] sm:$0xff] }
  0xb5   : > { %1099 = vmatmul.mubr.bf16.gmra.mrb[4].mxu0 %v409_v28  ;;  %915 = vmatprep.mubr.bf16.mxu1 %v412_v29  ;;  %v335_v28 = vld [vmem:[%s2617_s14 + $0x1e0] sm:$0xff]  ;;  %v333_v29 = vld [vmem:[%s2617_s14 + $0x1d0] sm:$0xff] }
  0xb6   : > { %1108 = vmatprep.mubr.bf16.mxu0 %v414_v30  ;;  %v337_v30 = vld [vmem:[%s2617_s14 + $0x1f0] sm:$0xff]  ;;  %v431_v35 = vpack.c.bf16 %v335_v28, %v331_v27  ;;  %v380_v27 = vld [vmem:[%s2617_s14 + $0x348] sm:$0xff] }
  0xb7   : > { %v433_v36 = vpack.c.bf16 %v337_v30, %v333_v29  ;;  %v384_v28 = vld [vmem:[%s2617_s14 + $0x368] sm:$0xff]  ;;  %v382_v29 = vld [vmem:[%s2617_s14 + $0x358] sm:$0xff] }
  0xb8   : > { %v386_v30 = vld [vmem:[%s2617_s14 + $0x378] sm:$0xff]  ;;  %v456_v33 = vpack.c.bf16 %v384_v28, %v380_v27 }
  0xb9   : > { %v458_v34 = vpack.c.bf16 %v386_v30, %v382_v29 }
  0xbc   : > { %916 = vmatmul.mubr.bf16.gmra.mrb[8].mxu1 %v411_v39  ;;  %v339_v39 = vld [vmem:[%s2617_s14 + $0x200] sm:$0xff] }
  0xbd   : > { %1109 = vmatmul.mubr.bf16.gmra.mrb[8].mxu0 %v413_v40  ;;  %925 = vmatprep.mubr.bf16.mxu1 %v416_v41  ;;  %v343_v40 = vld [vmem:[%s2617_s14 + $0x220] sm:$0xff]  ;;  %v341_v41 = vld [vmem:[%s2617_s14 + $0x210] sm:$0xff] }
  0xbe   : > { %1118 = vmatprep.mubr.bf16.mxu0 %v418_v42  ;;  %v345_v42 = vld [vmem:[%s2617_s14 + $0x230] sm:$0xff]  ;;  %v435_v47 = vpack.c.bf16 %v343_v40, %v339_v39  ;;  %v388_v39 = vld [vmem:[%s2617_s14 + $0x388] sm:$0xff] }
  0xbf   : > { %v437_v48 = vpack.c.bf16 %v345_v42, %v341_v41  ;;  %v392_v40 = vld [vmem:[%s2617_s14 + $0x3a8] sm:$0xff]  ;;  %v390_v41 = vld [vmem:[%s2617_s14 + $0x398] sm:$0xff] }
  0xc0   : > { %v394_v42 = vld [vmem:[%s2617_s14 + $0x3b8] sm:$0xff]  ;;  %v460_v45 = vpack.c.bf16 %v392_v40, %v388_v39 }
  0xc1   : > { %v462_v46 = vpack.c.bf16 %v394_v42, %v390_v41 }
  0xc4   : > { %926 = vmatmul.mubr.bf16.gmra.mrb[12].mxu1 %v415_v51  ;;  %v347_v51 = vld [vmem:[%s2617_s14 + $0x240] sm:$0xff] }
  0xc5   : > { %1119 = vmatmul.mubr.bf16.gmra.mrb[12].mxu0 %v417_v52  ;;  %935 = vmatprep.mubr.bf16.mxu1 %v420_v53  ;;  %v351_v52 = vld [vmem:[%s2617_s14 + $0x260] sm:$0xff]  ;;  %v349_v53 = vld [vmem:[%s2617_s14 + $0x250] sm:$0xff] }
  0xc6   : > { %1128 = vmatprep.mubr.bf16.mxu0 %v422_v54  ;;  %v353_v54 = vld [vmem:[%s2617_s14 + $0x270] sm:$0xff]  ;;  %v439_v59 = vpack.c.bf16 %v351_v52, %v347_v51  ;;  %v396_v51 = vld [vmem:[%s2617_s14 + $0x3c8] sm:$0xff] }
  0xc7   : > { %v441_v60 = vpack.c.bf16 %v353_v54, %v349_v53  ;;  %v400_v52 = vld [vmem:[%s2617_s14 + $0x3e8] sm:$0xff]  ;;  %v398_v53 = vld [vmem:[%s2617_s14 + $0x3d8] sm:$0xff] }
  0xc8   : > { %v402_v54 = vld [vmem:[%s2617_s14 + $0x3f8] sm:$0xff]  ;;  %v464_v57 = vpack.c.bf16 %v400_v52, %v396_v51 }
  0xc9   : > { %v466_v58 = vpack.c.bf16 %v402_v54, %v398_v53 }
  0xcc   : > { %936 = vmatmul.mubr.bf16.gmra.mrb[16].mxu1 %v419_v63  ;;  %v355_v63 = vld [vmem:[%s2617_s14 + $0x280] sm:$0xff] }
  0xcd   : > { %1129 = vmatmul.mubr.bf16.gmra.mrb[16].mxu0 %v421_v0  ;;  %945 = vmatprep.mubr.bf16.mxu1 %v424_v1  ;;  %v359_v0 = vld [vmem:[%s2617_s14 + $0x2a0] sm:$0xff]  ;;  %v357_v1 = vld [vmem:[%s2617_s14 + $0x290] sm:$0xff] }
  0xce   : > { %1138 = vmatprep.mubr.bf16.mxu0 %v426_v2  ;;  %v361_v2 = vld [vmem:[%s2617_s14 + $0x2b0] sm:$0xff]  ;;  %v443_v7 = vpack.c.bf16 %v359_v0, %v355_v63 }
  0xcf   : > { %v445_v8 = vpack.c.bf16 %v361_v2, %v357_v1  ;;  %v533_v1 = vlaneseq }
  0xd1   : > { %v2756_v2 = vshrl.u32 %v533_v1, 7  ;;  %vm1593_vm0 = vcmp.lt.s32.totalorder %v533_v1, 256 }
  0xd3   : > { %v535_v3 = vsub.s32 0, %v2756_v2  ;;  %v539_v5 = vsub.s32 1, %v2756_v2 }
  0xd4   : > { %946 = vmatmul.mubr.bf16.gmra.mrb[20].mxu1 %v423_v11  ;;  %v363_v11 = vld [vmem:[%s2617_s14 + $0x2c0] sm:$0xff] }
  0xd5   : > { %1139 = vmatmul.mubr.bf16.gmra.mrb[20].mxu0 %v425_v12  ;;  %955 = vmatprep.mubr.bf16.mxu1 %v428_v13  ;;  %v367_v12 = vld [vmem:[%s2617_s14 + $0x2e0] sm:$0xff]  ;;  %v365_v13 = vld [vmem:[%s2617_s14 + $0x2d0] sm:$0xff]  ;;  %v2765_v6 = vrot.slane %v531_v4, %v535_v3 }
  0xd6   : > { %1148 = vmatprep.mubr.bf16.mxu0 %v430_v14  ;;  %v369_v14 = vld [vmem:[%s2617_s14 + $0x2f0] sm:$0xff]  ;;  %v447_v19 = vpack.c.bf16 %v367_v12, %v363_v11 }
  0xd7   : > { %v449_v20 = vpack.c.bf16 %v369_v14, %v365_v13 }
  0xdc   : > { %956 = vmatmul.mubr.bf16.gmra.mrb[24].mxu1 %v427_v23  ;;  %v371_v23 = vld [vmem:[%s2617_s14 + $0x300] sm:$0xff] }
  0xdd   : > { %1149 = vmatmul.mubr.bf16.gmra.mrb[24].mxu0 %v429_v24  ;;  %965 = vmatprep.mubr.bf16.mxu1 %v432_v25  ;;  %v375_v24 = vld [vmem:[%s2617_s14 + $0x320] sm:$0xff]  ;;  %v373_v25 = vld [vmem:[%s2617_s14 + $0x310] sm:$0xff] }
  0xde   : > { %1158 = vmatprep.mubr.bf16.mxu0 %v434_v26  ;;  %v377_v26 = vld [vmem:[%s2617_s14 + $0x330] sm:$0xff]  ;;  %v451_v31 = vpack.c.bf16 %v375_v24, %v371_v23 }
  0xdf   : > { %v453_v32 = vpack.c.bf16 %v377_v26, %v373_v25 }
  0xe4   : > { %966 = vmatmul.mubr.bf16.gmra.mrb[28].mxu1 %v431_v35  ;;  %v379_v35 = vld [vmem:[%s2617_s14 + $0x340] sm:$0xff] }
  0xe5   : > { %1159 = vmatmul.mubr.bf16.gmra.mrb[28].mxu0 %v433_v36  ;;  %975 = vmatprep.mubr.bf16.mxu1 %v436_v37  ;;  %v383_v36 = vld [vmem:[%s2617_s14 + $0x360] sm:$0xff]  ;;  %v381_v37 = vld [vmem:[%s2617_s14 + $0x350] sm:$0xff] }
  0xe6   : > { %1168 = vmatprep.mubr.bf16.mxu0 %v438_v38  ;;  %v385_v38 = vld [vmem:[%s2617_s14 + $0x370] sm:$0xff]  ;;  %v455_v43 = vpack.c.bf16 %v383_v36, %v379_v35 }
  0xe7   : > { %v457_v44 = vpack.c.bf16 %v385_v38, %v381_v37 }
  0xec   : > { %976 = vmatmul.mubr.bf16.gmra.mrb[32].mxu1 %v435_v47  ;;  %v387_v47 = vld [vmem:[%s2617_s14 + $0x380] sm:$0xff] }
  0xed   : > { %1169 = vmatmul.mubr.bf16.gmra.mrb[32].mxu0 %v437_v48  ;;  %985 = vmatprep.mubr.bf16.mxu1 %v440_v49  ;;  %v391_v48 = vld [vmem:[%s2617_s14 + $0x3a0] sm:$0xff]  ;;  %v389_v49 = vld [vmem:[%s2617_s14 + $0x390] sm:$0xff] }
  0xee   : > { %1178 = vmatprep.mubr.bf16.mxu0 %v442_v50  ;;  %v393_v50 = vld [vmem:[%s2617_s14 + $0x3b0] sm:$0xff]  ;;  %v459_v55 = vpack.c.bf16 %v391_v48, %v387_v47 }
  0xef   : > { %v461_v56 = vpack.c.bf16 %v393_v50, %v389_v49 }
  0xf4   : > { %986 = vmatmul.mubr.bf16.gmra.mrb[36].mxu1 %v439_v59  ;;  %v395_v59 = vld [vmem:[%s2617_s14 + $0x3c0] sm:$0xff] }
  0xf5   : > { %1179 = vmatmul.mubr.bf16.gmra.mrb[36].mxu0 %v441_v60  ;;  %995 = vmatprep.mubr.bf16.mxu1 %v444_v61  ;;  %v399_v60 = vld [vmem:[%s2617_s14 + $0x3e0] sm:$0xff]  ;;  %v397_v61 = vld [vmem:[%s2617_s14 + $0x3d0] sm:$0xff] }
  0xf6   : > { %1188 = vmatprep.mubr.bf16.mxu0 %v446_v62  ;;  %v401_v62 = vld [vmem:[%s2617_s14 + $0x3f0] sm:$0xff]  ;;  %v463_v63 = vpack.c.bf16 %v399_v60, %v395_v59 }
  0xf7   : > { %v465_v0 = vpack.c.bf16 %v401_v62, %v397_v61 }
  0xfc   : > { %996 = vmatmul.mubr.bf16.gmra.mrb[40].mxu1 %v443_v7  ;;  %v2767_v7 = vrot.slane %v531_v4, %v539_v5 }
  0xfd   : > { %1189 = vmatmul.mubr.bf16.gmra.mrb[40].mxu0 %v445_v8  ;;  %1005 = vmatprep.mubr.bf16.mxu1 %v448_v9 }
  0xfe   : > { %1198 = vmatprep.mubr.bf16.mxu0 %v450_v10 }
 0x104   : > { %1006 = vmatmul.mubr.bf16.gmra.mrb[44].mxu1 %v447_v19 }
 0x105   : > { %1199 = vmatmul.mubr.bf16.gmra.mrb[44].mxu0 %v449_v20  ;;  %1015 = vmatprep.mubr.bf16.mxu1 %v452_v21 }
 0x106   : > { %1208 = vmatprep.mubr.bf16.mxu0 %v454_v22 }
 0x10c   : > { %1016 = vmatmul.mubr.bf16.gmra.mrb[48].mxu1 %v451_v31 }
 0x10d   : > { %1209 = vmatmul.mubr.bf16.gmra.mrb[48].mxu0 %v453_v32  ;;  %1025 = vmatprep.mubr.bf16.mxu1 %v456_v33 }
 0x10e   : > { %1218 = vmatprep.mubr.bf16.mxu0 %v458_v34 }
 0x114   : > { %1026 = vmatmul.mubr.bf16.gmra.mrb[52].mxu1 %v455_v43 }
 0x115   : > { %1219 = vmatmul.mubr.bf16.gmra.mrb[52].mxu0 %v457_v44  ;;  %1035 = vmatprep.mubr.bf16.mxu1 %v460_v45 }
 0x116   : > { %1228 = vmatprep.mubr.bf16.mxu0 %v462_v46 }
 0x11c   : > { %1036 = vmatmul.mubr.bf16.gmra.mrb[56].mxu1 %v459_v55 }
 0x11d   : > { %1229 = vmatmul.mubr.bf16.gmra.mrb[56].mxu0 %v461_v56  ;;  %1045 = vmatprep.mubr.bf16.mxu1 %v464_v57 }
 0x11e   : > { %1238 = vmatprep.mubr.bf16.mxu0 %v466_v58 }
 0x124   : > { %1046 = vmatmul.mubr.bf16.gmra.mrb[60].mxu1 %v463_v63 }
 0x125   : > { %1239 = vmatmul.mubr.bf16.gmra.mrb[60].mxu0 %v465_v0 }
 0x17f   : > { %v897_v8 = vpop.f32.mrb[0].mxu1 }
 0x180   : > { %v1090_v9 = vpop.f32.mrb[0].mxu0  ;;  %v898_v10 = vadd.f32 %v897_v8, %v2765_v6  ;;  %v899_v11 = vpop.f32.mrb[1].mxu1 }
 0x181   : > { %v1092_v12 = vpop.f32.mrb[1].mxu0  ;;  %v900_v13 = vadd.f32 %v899_v11, %v2767_v7  ;;  %v901_v14 = vpop.f32.mrb[2].mxu1 }
 0x182   : > { %v1094_v15 = vpop.f32.mrb[2].mxu0  ;;  %v1091_v16 = vadd.f32 %v1090_v9, %v898_v10  ;;  %v902_v17 = vadd.f32 %v901_v14, %v2765_v6  ;;  %v903_v18 = vpop.f32.mrb[3].mxu1 }
 0x183   : > { %v1096_v19 = vpop.f32.mrb[3].mxu0  ;;  %v1093_v20 = vadd.f32 %v1092_v12, %v900_v13  ;;  %v904_v21 = vadd.f32 %v903_v18, %v2767_v7 }
 0x184   : > { %v1095_v22 = vadd.f32 %v1094_v15, %v902_v17 }
 0x185   : > { %v1772_v23 = vmul.f32 -1.442695, %v1093_v20  ;;  %v1097_v24 = vadd.f32 %v1096_v19, %v904_v21 }
 0x187   : > { %2113 = vpow2.f32 %v1772_v23  ;;  %v1773_v25 = vmul.f32 -1.442695, %v1097_v24  ;;  %v907_v26 = vpop.f32.mrb[4].mxu1 }
 0x188   : > { %v1100_v27 = vpop.f32.mrb[4].mxu0  ;;  %v908_v28 = vadd.f32 %v907_v26, %v2765_v6  ;;  %v909_v29 = vpop.f32.mrb[5].mxu1 }
 0x189   : > { %v1102_v30 = vpop.f32.mrb[5].mxu0  ;;  %2115 = vpow2.f32 %v1773_v25  ;;  %v910_v31 = vadd.f32 %v909_v29, %v2767_v7  ;;  %v911_v32 = vpop.f32.mrb[6].mxu1 }
 0x18a   : > { %v1104_v33 = vpop.f32.mrb[6].mxu0  ;;  %v1101_v34 = vadd.f32 %v1100_v27, %v908_v28  ;;  %v912_v35 = vadd.f32 %v911_v32, %v2765_v6  ;;  %v913_v36 = vpop.f32.mrb[7].mxu1 }
 0x18b   : > { %v1106_v37 = vpop.f32.mrb[7].mxu0  ;;  %v1103_v38 = vadd.f32 %v1102_v30, %v910_v31  ;;  %v914_v39 = vadd.f32 %v913_v36, %v2767_v7  ;;  %v2796_v30 = vld [vmem:[%s3043_s3] sm:$0x1] }
 0x18c   : > { %v1105_v40 = vadd.f32 %v1104_v33, %v912_v35  ;;  %1829 = vmatprep.mubr.bf16.mxu1 %v2796_v30 }
 0x18d   : > { %v1774_v41 = vmul.f32 -1.442695, %v1103_v38  ;;  %v1107_v42 = vadd.f32 %v1106_v37, %v914_v39 }
 0x18f   : > { %2117 = vpow2.f32 %v1774_v41  ;;  %v1775_v43 = vmul.f32 -1.442695, %v1107_v42  ;;  %v917_v44 = vpop.f32.mrb[8].mxu1 }
 0x190   : > { %v1110_v45 = vpop.f32.mrb[8].mxu0  ;;  %v918_v46 = vadd.f32 %v917_v44, %v2765_v6  ;;  %v919_v47 = vpop.f32.mrb[9].mxu1 }
 0x191   : > { %v1112_v48 = vpop.f32.mrb[9].mxu0  ;;  %v2114_v49 = vpop.eup %2113  ;;  %2119 = vpow2.f32 %v1775_v43  ;;  %v920_v50 = vadd.f32 %v919_v47, %v2767_v7 }
 0x192   : > { %v921_v51 = vpop.f32.mrb[10].mxu1  ;;  %v1114_v52 = vpop.f32.mrb[10].mxu0  ;;  %v1377_v53 = vadd.f32 1.0, %v2114_v49  ;;  %v2779_v54 = vadd.f32 %v1110_v45, %v918_v46  ;;  %2121 = vtanh.f32 %v1091_v16 }
 0x193   : > { %v922_v55 = vadd.f32 %v921_v51, %v2765_v6  ;;  %v923_v56 = vpop.f32.mrb[11].mxu1  ;;  %v1116_v57 = vpop.f32.mrb[11].mxu0  ;;  %v1113_v59 = vadd.f32 %v1112_v48, %v920_v50 }
 0x194   : > { %v2116_v58 = vpop.eup %2115  ;;  %v924_v60 = vadd.f32 %v923_v56, %v2767_v7  ;;  %2123 = vrcp.f32 %v1377_v53 }
 0x195   : > { %v1378_v61 = vadd.f32 1.0, %v2116_v58  ;;  %v2783_v62 = vadd.f32 %v1114_v52, %v922_v55  ;;  %2125 = vtanh.f32 %v1095_v22  ;;  %v1776_v63 = vmul.f32 -1.442695, %v1113_v59 }
 0x196   : > { %v1117_v0 = vadd.f32 %v1116_v57, %v924_v60  ;;  %v1522_v60 = vld [vmem:[#allocation2] sm:$0x1] }
 0x197   : > { %2127 = vrcp.f32 %v1378_v61  ;;  %v927_v5 = vpop.f32.mrb[12].mxu1 }
 0x198   : > { %2129 = vpow2.f32 %v1776_v63  ;;  %v1777_v4 = vmul.f32 -1.442695, %v1117_v0  ;;  %v1120_v8 = vpop.f32.mrb[12].mxu0  ;;  %v928_v9 = vadd.f32 %v927_v5, %v2765_v6  ;;  %v929_v10 = vpop.f32.mrb[13].mxu1  ;;  %v2439_v63 = vmov 0  }
 0x199   : > { %v1122_v11 = vpop.f32.mrb[13].mxu0  ;;  %v2118_v12 = vpop.eup %2117  ;;  %v930_v13 = vadd.f32 %v929_v10, %v2767_v7  ;;  %2016 = vset.pattern.permute.xlu0 %v2439_v63 }
 0x19a   : > { %2131 = vpow2.f32 %v1777_v4  ;;  %v931_v14 = vpop.f32.mrb[14].mxu1  ;;  %v1124_v15 = vpop.f32.mrb[14].mxu0  ;;  %v1379_v16 = vadd.f32 1.0, %v2118_v12  ;;  %v2787_v17 = vadd.f32 %v1120_v8, %v928_v9  ;;  %1525 = vperm.xlu0 %2016, %v1522_v60  }
 0x19b   : > { %v932_v18 = vadd.f32 %v931_v14, %v2765_v6  ;;  %v933_v19 = vpop.f32.mrb[15].mxu1  ;;  %v1126_v20 = vpop.f32.mrb[15].mxu0  ;;  %2133 = vtanh.f32 %v1101_v34  ;;  %v1123_v22 = vadd.f32 %v1122_v11, %v930_v13 }
 0x19c   : > { %v2120_v21 = vpop.eup %2119  ;;  %v934_v23 = vadd.f32 %v933_v19, %v2767_v7  ;;  %2135 = vrcp.f32 %v1379_v16 }
 0x19d   : > { %v1380_v24 = vadd.f32 1.0, %v2120_v21  ;;  %v2791_v25 = vadd.f32 %v1124_v15, %v932_v18  ;;  %v2122_v26 = vpop.eup %2121  ;;  %2137 = vtanh.f32 %v1105_v40  ;;  %v1778_v27 = vmul.f32 -1.442695, %v1123_v22 }
 0x19e   : > { %v1127_v28 = vadd.f32 %v1126_v20, %v934_v23  ;;  %v2124_v29 = vpop.eup %2123 }
 0x19f   : > { %2139 = vrcp.f32 %v1380_v24  ;;  %v2126_v31 = vpop.eup %2125  ;;  %v937_v33 = vpop.f32.mrb[16].mxu1  ;;  %v2798_v35 = vmul.f32 %v2124_v29, %v2122_v26 }
 0x1a0   : > { %2141 = vpow2.f32 %v1778_v27  ;;  %v1779_v32 = vmul.f32 -1.442695, %v1127_v28  ;;  %v1130_v34 = vpop.f32.mrb[16].mxu0  ;;  %v938_v37 = vadd.f32 %v937_v33, %v2765_v6  ;;  %v939_v38 = vpop.f32.mrb[17].mxu1 }
 0x1a1   : > { %v2128_v36 = vpop.eup %2127  ;;  %v1132_v39 = vpop.f32.mrb[17].mxu0  ;;  %v940_v41 = vadd.f32 %v939_v38, %v2767_v7 }
 0x1a2   : > { %v2130_v40 = vpop.eup %2129  ;;  %2143 = vpow2.f32 %v1779_v32  ;;  %v941_v42 = vpop.f32.mrb[18].mxu1  ;;  %v2803_v44 = vmul.f32 %v2128_v36, %v2126_v31  ;;  %v2805_v46 = vadd.f32 %v1130_v34, %v938_v37 }
 0x1a3   : > { %v1134_v43 = vpop.f32.mrb[18].mxu0  ;;  %v1381_v45 = vadd.f32 1.0, %v2130_v40  ;;  %v942_v47 = vadd.f32 %v941_v42, %v2765_v6  ;;  %v943_v48 = vpop.f32.mrb[19].mxu1  ;;  %2145 = vtanh.f32 %v2779_v54  ;;  %v1133_v51 = vadd.f32 %v1132_v39, %v940_v41 }
 0x1a4   : > { %v1136_v49 = vpop.f32.mrb[19].mxu0  ;;  %v2132_v50 = vpop.eup %2131  ;;  %v944_v52 = vadd.f32 %v943_v48, %v2767_v7  ;;  %v1506_v53 = vpack.c.bf16 %v2803_v44, %v2798_v35 }
 0x1a5   : > { %2147 = vrcp.f32 %v1381_v45  ;;  %v1382_v55 = vadd.f32 1.0, %v2132_v50  ;;  %v2812_v56 = vadd.f32 %v1134_v43, %v942_v47  ;;  %v2134_v57 = vpop.eup %2133  ;;  %v1780_v58 = vmul.f32 -1.442695, %v1133_v51 }
 0x1a6   : > { %2149 = vtanh.f32 %v2783_v62  ;;  %v1137_v59 = vadd.f32 %v1136_v49, %v944_v52  ;;  %v2136_v61 = vpop.eup %2135 }
 0x1a7   : > { %2151 = vrcp.f32 %v1382_v55  ;;  %v2138_v54 = vpop.eup %2137  ;;  %v947_v4 = vpop.f32.mrb[20].mxu1  ;;  %v2815_v8 = vmul.f32 %v2136_v61, %v2134_v57 }
 0x1a8   : > { %2153 = vpow2.f32 %v1780_v58  ;;  %v1781_v0 = vmul.f32 -1.442695, %v1137_v59  ;;  %v1140_v5 = vpop.f32.mrb[20].mxu0  ;;  %v948_v10 = vadd.f32 %v947_v4, %v2765_v6  ;;  %v949_v11 = vpop.f32.mrb[21].mxu1 }
 0x1a9   : > { %v2140_v9 = vpop.eup %2139  ;;  %v1142_v62 = vpop.f32.mrb[21].mxu0  ;;  %v950_v13 = vadd.f32 %v949_v11, %v2767_v7 }
 0x1aa   : > { %v2142_v12 = vpop.eup %2141  ;;  %2155 = vpow2.f32 %v1781_v0  ;;  %v951_v14 = vpop.f32.mrb[22].mxu1  ;;  %v2819_v16 = vmul.f32 %v2140_v9, %v2138_v54  ;;  %v2821_v19 = vadd.f32 %v1140_v5, %v948_v10 }
 0x1ab   : > { %v1144_v15 = vpop.f32.mrb[22].mxu0  ;;  %v1383_v18 = vadd.f32 1.0, %v2142_v12  ;;  %v952_v20 = vadd.f32 %v951_v14, %v2765_v6  ;;  %v953_v21 = vpop.f32.mrb[23].mxu1  ;;  %2157 = vtanh.f32 %v2787_v17  ;;  %v1143_v24 = vadd.f32 %v1142_v62, %v950_v13 }
 0x1ac   : > { %v1146_v22 = vpop.f32.mrb[23].mxu0  ;;  %v2144_v23 = vpop.eup %2143  ;;  %v954_v26 = vadd.f32 %v953_v21, %v2767_v7  ;;  %v1507_v27 = vpack.c.bf16 %v2819_v16, %v2815_v8 }
 0x1ad   : > { %2159 = vrcp.f32 %v1383_v18  ;;  %v1384_v28 = vadd.f32 1.0, %v2144_v23  ;;  %v2828_v29 = vadd.f32 %v1144_v15, %v952_v20  ;;  %v2146_v31 = vpop.eup %2145  ;;  %v1782_v32 = vmul.f32 -1.442695, %v1143_v24 }
 0x1ae   : > { %2161 = vtanh.f32 %v2791_v25  ;;  %v1147_v33 = vadd.f32 %v1146_v22, %v954_v26 }
 0x1af   : > { %v2148_v34 = vpop.eup %2147  ;;  %2163 = vrcp.f32 %v1384_v28  ;;  %v957_v37 = vpop.f32.mrb[24].mxu1 }
 0x1b0   : > { %v2150_v36 = vpop.eup %2149  ;;  %2165 = vpow2.f32 %v1782_v32  ;;  %v1783_v17 = vmul.f32 -1.442695, %v1147_v33  ;;  %v1150_v38 = vpop.f32.mrb[24].mxu0  ;;  %v2831_v39 = vmul.f32 %v2148_v34, %v2146_v31  ;;  %v958_v41 = vadd.f32 %v957_v37, %v2765_v6 }
 0x1b1   : > { %v2152_v40 = vpop.eup %2151  ;;  %v959_v42 = vpop.f32.mrb[25].mxu1 }
 0x1b2   : > { %v1152_v43 = vpop.f32.mrb[25].mxu0  ;;  %v2154_v45 = vpop.eup %2153  ;;  %2167 = vpow2.f32 %v1783_v17  ;;  %v960_v25 = vadd.f32 %v959_v42, %v2767_v7  ;;  %v2835_v49 = vmul.f32 %v2152_v40, %v2150_v36  ;;  %v2837_v51 = vadd.f32 %v1150_v38, %v958_v41 }
 0x1b3   : > { %v961_v47 = vpop.f32.mrb[26].mxu1  ;;  %v1154_v48 = vpop.f32.mrb[26].mxu0  ;;  %v1385_v50 = vadd.f32 1.0, %v2154_v45  ;;  %2169 = vtanh.f32 %v2805_v46 }
 0x1b4   : > { %v962_v52 = vadd.f32 %v961_v47, %v2765_v6  ;;  %v963_v55 = vpop.f32.mrb[27].mxu1  ;;  %v1156_v57 = vpop.f32.mrb[27].mxu0  ;;  %v1153_v59 = vadd.f32 %v1152_v43, %v960_v25  ;;  %v1508_v61 = vpack.c.bf16 %v2835_v49, %v2831_v39 }
 0x1b5   : > { %v2156_v58 = vpop.eup %2155  ;;  %v964_v60 = vadd.f32 %v963_v55, %v2767_v7  ;;  %2171 = vrcp.f32 %v1385_v50 }
 0x1b6   : > { %v1386_v63 = vadd.f32 1.0, %v2156_v58  ;;  %v2844_v54 = vadd.f32 %v1154_v48, %v962_v52  ;;  %v2158_v0 = vpop.eup %2157  ;;  %2173 = vtanh.f32 %v2812_v56  ;;  %v1784_v4 = vmul.f32 -1.442695, %v1153_v59 }
 0x1b7   : > { %v1157_v5 = vadd.f32 %v1156_v57, %v964_v60  ;;  %v2160_v9 = vpop.eup %2159  ;;  %v967_v11 = vpop.f32.mrb[28].mxu1 }
 0x1b8   : > { %2175 = vrcp.f32 %v1386_v63  ;;  %v2162_v10 = vpop.eup %2161  ;;  %v1160_v62 = vpop.f32.mrb[28].mxu0  ;;  %v2847_v12 = vmul.f32 %v2160_v9, %v2158_v0  ;;  %v968_v14 = vadd.f32 %v967_v11, %v2765_v6 }
 0x1b9   : > { %2177 = vpow2.f32 %v1784_v4  ;;  %v1785_v46 = vmul.f32 -1.442695, %v1157_v5  ;;  %v2164_v13 = vpop.eup %2163  ;;  %v969_v15 = vpop.f32.mrb[29].mxu1 }
 0x1ba   : > { %v1162_v18 = vpop.f32.mrb[29].mxu0  ;;  %v2166_v20 = vpop.eup %2165  ;;  %v970_v56 = vadd.f32 %v969_v15, %v2767_v7  ;;  %v2851_v23 = vmul.f32 %v2164_v13, %v2162_v10  ;;  %v2853_v26 = vadd.f32 %v1160_v62, %v968_v14 }
 0x1bb   : > { %2179 = vpow2.f32 %v1785_v46  ;;  %v971_v21 = vpop.f32.mrb[30].mxu1  ;;  %v1164_v22 = vpop.f32.mrb[30].mxu0  ;;  %v1387_v24 = vadd.f32 1.0, %v2166_v20 }
 0x1bc   : > { %v972_v28 = vadd.f32 %v971_v21, %v2765_v6  ;;  %v973_v31 = vpop.f32.mrb[31].mxu1  ;;  %v1166_v32 = vpop.f32.mrb[31].mxu0  ;;  %2181 = vtanh.f32 %v2821_v19  ;;  %v1163_v34 = vadd.f32 %v1162_v18, %v970_v56  ;;  %v1509_v17 = vpack.c.bf16 %v2851_v23, %v2847_v12 }
 0x1bd   : > { %v2168_v33 = vpop.eup %2167  ;;  %v974_v36 = vadd.f32 %v973_v31, %v2767_v7  ;;  %2183 = vrcp.f32 %v1387_v24 }
 0x1be   : > { %v1388_v37 = vadd.f32 1.0, %v2168_v33  ;;  %v2860_v38 = vadd.f32 %v1164_v22, %v972_v28  ;;  %v2170_v40 = vpop.eup %2169  ;;  %2185 = vtanh.f32 %v2828_v29  ;;  %v1786_v41 = vmul.f32 -1.442695, %v1163_v34 }
 0x1bf   : > { %v1167_v42 = vadd.f32 %v1166_v32, %v974_v36  ;;  %v2172_v43 = vpop.eup %2171  ;;  %v977_v25 = vpop.f32.mrb[32].mxu1 }
 0x1c0   : > { %2187 = vrcp.f32 %v1388_v37  ;;  %v2174_v45 = vpop.eup %2173  ;;  %v1170_v47 = vpop.f32.mrb[32].mxu0  ;;  %v2863_v48 = vmul.f32 %v2172_v43, %v2170_v40  ;;  %v978_v52 = vadd.f32 %v977_v25, %v2765_v6 }
 0x1c1   : > { %2189 = vpow2.f32 %v1786_v41  ;;  %v1787_v19 = vmul.f32 -1.442695, %v1167_v42  ;;  %v979_v55 = vpop.f32.mrb[33].mxu1  ;;  %v1172_v57 = vpop.f32.mrb[33].mxu0 }
 0x1c2   : > { %v2176_v50 = vpop.eup %2175  ;;  %v980_v29 = vadd.f32 %v979_v55, %v2767_v7  ;;  %v981_v59 = vpop.f32.mrb[34].mxu1  ;;  %v2869_v4 = vadd.f32 %v1170_v47, %v978_v52 }
 0x1c3   : > { %v2178_v58 = vpop.eup %2177  ;;  %2191 = vpow2.f32 %v1787_v19  ;;  %v1174_v60 = vpop.f32.mrb[34].mxu0  ;;  %v2867_v63 = vmul.f32 %v2176_v50, %v2174_v45  ;;  %v982_v5 = vadd.f32 %v981_v59, %v2765_v6 }
 0x1c4   : > { %v1389_v0 = vadd.f32 1.0, %v2178_v58  ;;  %v983_v9 = vpop.f32.mrb[35].mxu1  ;;  %v1176_v10 = vpop.f32.mrb[35].mxu0  ;;  %2193 = vtanh.f32 %v2837_v51  ;;  %v1173_v11 = vadd.f32 %v1172_v57, %v980_v29 }
 0x1c5   : > { %v2180_v46 = vpop.eup %2179  ;;  %v984_v62 = vadd.f32 %v983_v9, %v2767_v7  ;;  %v1510_v13 = vpack.c.bf16 %v2867_v63, %v2863_v48  ;;  %v2876_v15 = vadd.f32 %v1174_v60, %v982_v5 }
 0x1c6   : > { %2195 = vrcp.f32 %v1389_v0  ;;  %v1390_v14 = vadd.f32 1.0, %v2180_v46  ;;  %v2182_v18 = vpop.eup %2181  ;;  %v1788_v20 = vmul.f32 -1.442695, %v1173_v11 }
 0x1c7   : > { %2197 = vtanh.f32 %v2844_v54  ;;  %v1177_v56 = vadd.f32 %v1176_v10, %v984_v62  ;;  %v2184_v21 = vpop.eup %2183  ;;  %v987_v24 = vpop.f32.mrb[36].mxu1 }
 0x1c8   : > { %2199 = vrcp.f32 %v1390_v14  ;;  %v2186_v22 = vpop.eup %2185  ;;  %v1180_v28 = vpop.f32.mrb[36].mxu0  ;;  %v2879_v31 = vmul.f32 %v2184_v21, %v2182_v18  ;;  %v988_v33 = vadd.f32 %v987_v24, %v2765_v6 }
 0x1c9   : > { %2201 = vpow2.f32 %v1788_v20  ;;  %v1789_v51 = vmul.f32 -1.442695, %v1177_v56  ;;  %v989_v34 = vpop.f32.mrb[37].mxu1  ;;  %v1182_v36 = vpop.f32.mrb[37].mxu0 }
 0x1ca   : > { %v2188_v32 = vpop.eup %2187  ;;  %v990_v54 = vadd.f32 %v989_v34, %v2767_v7  ;;  %v991_v40 = vpop.f32.mrb[38].mxu1  ;;  %v2886_v19 = vadd.f32 %v1180_v28, %v988_v33 }
 0x1cb   : > { %v2190_v37 = vpop.eup %2189  ;;  %2203 = vpow2.f32 %v1789_v51  ;;  %v1184_v41 = vpop.f32.mrb[38].mxu0  ;;  %v2883_v42 = vmul.f32 %v2188_v32, %v2186_v22  ;;  %v992_v45 = vadd.f32 %v991_v40, %v2765_v6 }
 0x1cc   : > { %v1391_v43 = vadd.f32 1.0, %v2190_v37  ;;  %v993_v25 = vpop.f32.mrb[39].mxu1  ;;  %v1186_v47 = vpop.f32.mrb[39].mxu0  ;;  %2205 = vtanh.f32 %v2853_v26  ;;  %v1183_v55 = vadd.f32 %v1182_v36, %v990_v54 }
 0x1cd   : > { %v2192_v50 = vpop.eup %2191  ;;  %v994_v52 = vadd.f32 %v993_v25, %v2767_v7  ;;  %v1511_v57 = vpack.c.bf16 %v2883_v42, %v2879_v31  ;;  %v2892_v29 = vadd.f32 %v1184_v41, %v992_v45  ;;  %v2440_v42 = vmov 1966171168  }
 0x1ce   : > { %2207 = vrcp.f32 %v1391_v43  ;;  %v1392_v58 = vadd.f32 1.0, %v2192_v50  ;;  %v2194_v59 = vpop.eup %2193  ;;  %v1790_v60 = vmul.f32 -1.442695, %v1183_v55 }
 0x1cf   : > { %2209 = vtanh.f32 %v2860_v38  ;;  %v1187_v0 = vadd.f32 %v1186_v47, %v994_v52  ;;  %v997_v10 = vpop.f32.mrb[40].mxu1 }
 0x1d0   : > { %v2196_v5 = vpop.eup %2195  ;;  %2211 = vrcp.f32 %v1392_v58  ;;  %v1190_v46 = vpop.f32.mrb[40].mxu0  ;;  %v998_v14 = vadd.f32 %v997_v10, %v2765_v6 }
 0x1d1   : > { %v2198_v9 = vpop.eup %2197  ;;  %2213 = vpow2.f32 %v1790_v60  ;;  %v1791_v26 = vmul.f32 -1.442695, %v1187_v0  ;;  %v2895_v11 = vmul.f32 %v2196_v5, %v2194_v59  ;;  %v999_v18 = vpop.f32.mrb[41].mxu1 }
 0x1d2   : > { %v2200_v62 = vpop.eup %2199  ;;  %v1192_v20 = vpop.f32.mrb[41].mxu0  ;;  %v1000_v38 = vadd.f32 %v999_v18, %v2767_v7  ;;  %v2902_v32 = vadd.f32 %v1190_v46, %v998_v14 }
 0x1d3   : > { %v2202_v56 = vpop.eup %2201  ;;  %2215 = vpow2.f32 %v1791_v26  ;;  %v1001_v21 = vpop.f32.mrb[42].mxu1  ;;  %v2899_v51 = vmul.f32 %v2200_v62, %v2198_v9 }
 0x1d4   : > { %v1194_v22 = vpop.f32.mrb[42].mxu0  ;;  %v1393_v24 = vadd.f32 1.0, %v2202_v56  ;;  %v1002_v28 = vadd.f32 %v1001_v21, %v2765_v6  ;;  %v1003_v33 = vpop.f32.mrb[43].mxu1  ;;  %2217 = vtanh.f32 %v2869_v4  ;;  %v1193_v54 = vadd.f32 %v1192_v20, %v1000_v38 }
 0x1d5   : > { %v1196_v34 = vpop.f32.mrb[43].mxu0  ;;  %v2204_v36 = vpop.eup %2203  ;;  %v1004_v37 = vadd.f32 %v1003_v33, %v2767_v7  ;;  %v1512_v40 = vpack.c.bf16 %v2899_v51, %v2895_v11 }
 0x1d6   : > { %2219 = vrcp.f32 %v1393_v24  ;;  %v1394_v41 = vadd.f32 1.0, %v2204_v36  ;;  %v2908_v43 = vadd.f32 %v1194_v22, %v1002_v28  ;;  %v2206_v45 = vpop.eup %2205  ;;  %v1792_v25 = vmul.f32 -1.442695, %v1193_v54 }
 0x1d7   : > { %2221 = vtanh.f32 %v2876_v15  ;;  %v1197_v47 = vadd.f32 %v1196_v34, %v1004_v37  ;;  %v1007_v55 = vpop.f32.mrb[44].mxu1 }
 0x1d8   : > { %v2208_v50 = vpop.eup %2207  ;;  %2223 = vrcp.f32 %v1394_v41  ;;  %v1200_v58 = vpop.f32.mrb[44].mxu0  ;;  %v1008_v0 = vadd.f32 %v1007_v55, %v2765_v6 }
 0x1d9   : > { %v2210_v52 = vpop.eup %2209  ;;  %2225 = vpow2.f32 %v1792_v25  ;;  %v1793_v4 = vmul.f32 -1.442695, %v1197_v47  ;;  %v2911_v59 = vmul.f32 %v2208_v50, %v2206_v45  ;;  %v1009_v5 = vpop.f32.mrb[45].mxu1 }
 0x1da   : > { %v2212_v60 = vpop.eup %2211  ;;  %v1202_v9 = vpop.f32.mrb[45].mxu0  ;;  %v1010_v15 = vadd.f32 %v1009_v5, %v2767_v7  ;;  %v2918_v20 = vadd.f32 %v1200_v58, %v1008_v0 }
 0x1db   : > { %v2214_v26 = vpop.eup %2213  ;;  %2227 = vpow2.f32 %v1793_v4  ;;  %v1011_v10 = vpop.f32.mrb[46].mxu1  ;;  %v2915_v62 = vmul.f32 %v2212_v60, %v2210_v52 }
 0x1dc   : > { %v1204_v46 = vpop.f32.mrb[46].mxu0  ;;  %v1395_v14 = vadd.f32 1.0, %v2214_v26  ;;  %v1012_v18 = vadd.f32 %v1011_v10, %v2765_v6  ;;  %v1013_v56 = vpop.f32.mrb[47].mxu1  ;;  %2229 = vtanh.f32 %v2886_v19  ;;  %v1203_v24 = vadd.f32 %v1202_v9, %v1010_v15 }
 0x1dd   : > { %v1206_v38 = vpop.f32.mrb[47].mxu0  ;;  %v2216_v21 = vpop.eup %2215  ;;  %v1014_v22 = vadd.f32 %v1013_v56, %v2767_v7  ;;  %v1513_v28 = vpack.c.bf16 %v2915_v62, %v2911_v59 }
 0x1de   : > { %2231 = vrcp.f32 %v1395_v14  ;;  %v1396_v33 = vadd.f32 1.0, %v2216_v21  ;;  %v2924_v34 = vadd.f32 %v1204_v46, %v1012_v18  ;;  %v2218_v36 = vpop.eup %2217  ;;  %v1794_v37 = vmul.f32 -1.442695, %v1203_v24 }
 0x1df   : > { %2233 = vtanh.f32 %v2892_v29  ;;  %v1207_v54 = vadd.f32 %v1206_v38, %v1014_v22  ;;  %v1017_v25 = vpop.f32.mrb[48].mxu1 }
 0x1e0   : > { %v2220_v41 = vpop.eup %2219  ;;  %2235 = vrcp.f32 %v1396_v33  ;;  %v1210_v47 = vpop.f32.mrb[48].mxu0  ;;  %v1018_v4 = vadd.f32 %v1017_v25, %v2765_v6 }
 0x1e1   : > { %v2222_v45 = vpop.eup %2221  ;;  %2237 = vpow2.f32 %v1794_v37  ;;  %v1795_v19 = vmul.f32 -1.442695, %v1207_v54  ;;  %v1489_v50 = vmul.f32 %v2220_v41, %v2218_v36  ;;  %v1019_v55 = vpop.f32.mrb[49].mxu1 }
 0x1e2   : > { %v2224_v52 = vpop.eup %2223  ;;  %v1212_v58 = vpop.f32.mrb[49].mxu0  ;;  %v1020_v0 = vadd.f32 %v1019_v55, %v2767_v7  ;;  %v2930_v10 = vadd.f32 %v1210_v47, %v1018_v4 }
 0x1e3   : > { %v2226_v60 = vpop.eup %2225  ;;  %2239 = vpow2.f32 %v1795_v19  ;;  %v1021_v29 = vpop.f32.mrb[50].mxu1  ;;  %v1490_v9 = vmul.f32 %v2224_v52, %v2222_v45 }
 0x1e4   : > { %v1214_v5 = vpop.f32.mrb[50].mxu0  ;;  %v1397_v26 = vadd.f32 1.0, %v2226_v60  ;;  %v1022_v15 = vadd.f32 %v1021_v29, %v2765_v6  ;;  %v1023_v46 = vpop.f32.mrb[51].mxu1  ;;  %2241 = vtanh.f32 %v2902_v32  ;;  %v1213_v38 = vadd.f32 %v1212_v58, %v1020_v0 }
 0x1e5   : > { %v1216_v14 = vpop.f32.mrb[51].mxu0  ;;  %v2228_v18 = vpop.eup %2227  ;;  %v1024_v56 = vadd.f32 %v1023_v46, %v2767_v7  ;;  %v1514_v21 = vpack.c.bf16 %v1490_v9, %v1489_v50 }
 0x1e6   : > { %2243 = vrcp.f32 %v1397_v26  ;;  %v1398_v22 = vadd.f32 1.0, %v2228_v18  ;;  %v2934_v24 = vadd.f32 %v1214_v5, %v1022_v15  ;;  %v2230_v33 = vpop.eup %2229  ;;  %v1796_v36 = vmul.f32 -1.442695, %v1213_v38 }
 0x1e7   : > { %2245 = vtanh.f32 %v2908_v43  ;;  %v1217_v37 = vadd.f32 %v1216_v14, %v1024_v56  ;;  %1813 = vmatprep.subr.bf16.mxu1 %v1514_v21  ;;  %v1027_v45 = vpop.f32.mrb[52].mxu1 }
 0x1e8   : > { %v2232_v54 = vpop.eup %2231  ;;  %2247 = vrcp.f32 %v1398_v22  ;;  %1814 = vmatpush3.bf16.xpose.msra.mxu1 %v1506_v53  ;;  %v1220_v19 = vpop.f32.mrb[52].mxu0  ;;  %v1028_v50 = vadd.f32 %v1027_v45, %v2765_v6 }
 0x1e9   : > { %v2234_v32 = vpop.eup %2233  ;;  %2249 = vpow2.f32 %v1796_v36  ;;  %v1797_v41 = vmul.f32 -1.442695, %v1217_v37  ;;  %v1491_v25 = vmul.f32 %v2232_v54, %v2230_v33  ;;  %v1029_v52 = vpop.f32.mrb[53].mxu1 }
 0x1ea   : > { %v2236_v47 = vpop.eup %2235  ;;  %v1222_v43 = vpop.f32.mrb[53].mxu0  ;;  %v1030_v55 = vadd.f32 %v1029_v52, %v2767_v7  ;;  %v2943_v53 = vadd.f32 %v1220_v19, %v1028_v50 }
 0x1eb   : > { %v2238_v4 = vpop.eup %2237  ;;  %2251 = vpow2.f32 %v1797_v41  ;;  %v1031_v58 = vpop.f32.mrb[54].mxu1  ;;  %v1492_v0 = vmul.f32 %v2236_v47, %v2234_v32 }
 0x1ec   : > { %v1224_v60 = vpop.f32.mrb[54].mxu0  ;;  %v1399_v35 = vadd.f32 1.0, %v2238_v4  ;;  %v1032_v44 = vadd.f32 %v1031_v58, %v2765_v6  ;;  %v1033_v29 = vpop.f32.mrb[55].mxu1  ;;  %2253 = vtanh.f32 %v2918_v20  ;;  %v1223_v15 = vadd.f32 %v1222_v43, %v1030_v55 }
 0x1ed   : > { %v1226_v5 = vpop.f32.mrb[55].mxu0  ;;  %v2240_v9 = vpop.eup %2239  ;;  %v1034_v26 = vadd.f32 %v1033_v29, %v2767_v7  ;;  %v1515_v46 = vpack.c.bf16 %v1492_v0, %v1491_v25 }
 0x1ee   : > { %2255 = vrcp.f32 %v1399_v35  ;;  %v1400_v14 = vadd.f32 1.0, %v2240_v9  ;;  %v2947_v18 = vadd.f32 %v1224_v60, %v1032_v44  ;;  %v2242_v56 = vpop.eup %2241  ;;  %v1798_v38 = vmul.f32 -1.442695, %v1223_v15 }
 0x1ef   : > { %2257 = vtanh.f32 %v2924_v34  ;;  %v1227_v21 = vadd.f32 %v1226_v5, %v1034_v26  ;;  %1815 = vmatprep.subr.bf16.mxu1 %v1515_v46  ;;  %v1037_v36 = vpop.f32.mrb[56].mxu1 }
 0x1f0   : > { %v2244_v22 = vpop.eup %2243  ;;  %2259 = vrcp.f32 %v1400_v14  ;;  %1816 = vmatpush3.bf16.xpose.msra.mxu1 %v1507_v27  ;;  %v1230_v37 = vpop.f32.mrb[56].mxu0  ;;  %v1038_v41 = vadd.f32 %v1037_v36, %v2765_v6 }
 0x1f1   : > { %v2246_v20 = vpop.eup %2245  ;;  %2261 = vpow2.f32 %v1798_v38  ;;  %v1799_v33 = vmul.f32 -1.442695, %v1227_v21  ;;  %v1493_v54 = vmul.f32 %v2244_v22, %v2242_v56  ;;  %v1039_v45 = vpop.f32.mrb[57].mxu1 }
 0x1f2   : > { %v2248_v32 = vpop.eup %2247  ;;  %v1232_v34 = vpop.f32.mrb[57].mxu0  ;;  %v1040_v25 = vadd.f32 %v1039_v45, %v2767_v7  ;;  %v2956_v27 = vadd.f32 %v1230_v37, %v1038_v41 }
 0x1f3   : > { %v2250_v19 = vpop.eup %2249  ;;  %2263 = vpow2.f32 %v1799_v33  ;;  %v1041_v47 = vpop.f32.mrb[58].mxu1  ;;  %v1494_v52 = vmul.f32 %v2248_v32, %v2246_v20 }
 0x1f4   : > { %v1234_v50 = vpop.f32.mrb[58].mxu0  ;;  %v1401_v8 = vadd.f32 1.0, %v2250_v19  ;;  %v1042_v16 = vadd.f32 %v1041_v47, %v2765_v6  ;;  %v1043_v43 = vpop.f32.mrb[59].mxu1  ;;  %2265 = vtanh.f32 %v2930_v10  ;;  %v1233_v60 = vadd.f32 %v1232_v34, %v1040_v25 }
 0x1f5   : > { %v1236_v4 = vpop.f32.mrb[59].mxu0  ;;  %v2252_v55 = vpop.eup %2251  ;;  %v1044_v58 = vadd.f32 %v1043_v43, %v2767_v7  ;;  %v1516_v0 = vpack.c.bf16 %v1494_v52, %v1493_v54 }
 0x1f6   : > { %2267 = vrcp.f32 %v1401_v8  ;;  %v1402_v35 = vadd.f32 1.0, %v2252_v55  ;;  %v1235_v44 = vadd.f32 %v1234_v50, %v1042_v16  ;;  %v2254_v29 = vpop.eup %2253  ;;  %v1800_v5 = vmul.f32 -1.442695, %v1233_v60 }
 0x1f7   : > { %2269 = vtanh.f32 %v2934_v24  ;;  %v1237_v9 = vadd.f32 %v1236_v4, %v1044_v58  ;;  %1817 = vmatprep.subr.bf16.mxu1 %v1516_v0  ;;  %v1047_v46 = vpop.f32.mrb[60].mxu1 }
 0x1f8   : > { %v2256_v26 = vpop.eup %2255  ;;  %2271 = vrcp.f32 %v1402_v35  ;;  %1818 = vmatpush3.bf16.xpose.msra.mxu1 %v1508_v61  ;;  %v1240_v14 = vpop.f32.mrb[60].mxu0  ;;  %v1048_v21 = vadd.f32 %v1047_v46, %v2765_v6 }
 0x1f9   : > { %v2258_v10 = vpop.eup %2257  ;;  %2273 = vpow2.f32 %v1800_v5  ;;  %v1801_v15 = vmul.f32 -1.442695, %v1237_v9  ;;  %v1495_v56 = vmul.f32 %v2256_v26, %v2254_v29  ;;  %v1049_v22 = vpop.f32.mrb[61].mxu1 }
 0x1fa   : > { %v2260_v38 = vpop.eup %2259  ;;  %v1242_v24 = vpop.f32.mrb[61].mxu0  ;;  %v1050_v33 = vadd.f32 %v1049_v22, %v2767_v7  ;;  %v1241_v61 = vadd.f32 %v1240_v14, %v1048_v21 }
 0x1fb   : > { %v2262_v20 = vpop.eup %2261  ;;  %2275 = vpow2.f32 %v1801_v15  ;;  %v1051_v36 = vpop.f32.mrb[62].mxu1  ;;  %v1496_v54 = vmul.f32 %v2260_v38, %v2258_v10 }
 0x1fc   : > { %v1244_v37 = vpop.f32.mrb[62].mxu0  ;;  %v1403_v39 = vadd.f32 1.0, %v2262_v20  ;;  %v1052_v49 = vadd.f32 %v1051_v36, %v2765_v6  ;;  %v1053_v32 = vpop.f32.mrb[63].mxu1  ;;  %2277 = vtanh.f32 %v2943_v53  ;;  %v1243_v19 = vadd.f32 %v1242_v24, %v1050_v33 }
 0x1fd   : > { %v1246_v41 = vpop.f32.mrb[63].mxu0  ;;  %v2264_v45 = vpop.eup %2263  ;;  %v1054_v34 = vadd.f32 %v1053_v32, %v2767_v7  ;;  %v1517_v25 = vpack.c.bf16 %v1496_v54, %v1495_v56 }
 0x1fe   : > { %2279 = vrcp.f32 %v1403_v39  ;;  %v1404_v47 = vadd.f32 1.0, %v2264_v45  ;;  %v1245_v50 = vadd.f32 %v1244_v37, %v1052_v49  ;;  %v2266_v52 = vpop.eup %2265  ;;  %v1802_v8 = vmul.f32 -1.442695, %v1243_v19 }
 0x1ff   : > { %2281 = vtanh.f32 %v2947_v18  ;;  %v1247_v16 = vadd.f32 %v1246_v41, %v1054_v34  ;;  %1819 = vmatprep.subr.bf16.mxu1 %v1517_v25 }
 0x200   : > { %v2268_v6 = vpop.eup %2267  ;;  %2283 = vrcp.f32 %v1404_v47  ;;  %1820 = vmatpush3.bf16.xpose.msra.mxu1 %v1509_v17 }
 0x201   : > { %v2270_v53 = vpop.eup %2269  ;;  %2285 = vpow2.f32 %v1802_v8  ;;  %v1803_v7 = vmul.f32 -1.442695, %v1247_v16  ;;  %v1497_v43 = vmul.f32 %v2268_v6, %v2266_v52 }
 0x202   : > { %v2272_v4 = vpop.eup %2271 }
 0x203   : > { %v2274_v55 = vpop.eup %2273  ;;  %2287 = vpow2.f32 %v1803_v7  ;;  %v1498_v58 = vmul.f32 %v2272_v4, %v2270_v53 }
 0x204   : > { %v1405_v60 = vadd.f32 1.0, %v2274_v55  ;;  %2289 = vtanh.f32 %v2956_v27 }
 0x205   : > { %v2276_v0 = vpop.eup %2275  ;;  %v1518_v18 = vpack.c.bf16 %v1498_v58, %v1497_v43 }
 0x206   : > { %2291 = vrcp.f32 %v1405_v60  ;;  %v1406_v35 = vadd.f32 1.0, %v2276_v0  ;;  %v2278_v29 = vpop.eup %2277 }
 0x207   : > { %2293 = vtanh.f32 %v1235_v44  ;;  %1821 = vmatprep.subr.bf16.mxu1 %v1518_v18 }
 0x208   : > { %v2280_v12 = vpop.eup %2279  ;;  %2295 = vrcp.f32 %v1406_v35  ;;  %1822 = vmatpush3.bf16.xpose.msra.mxu1 %v1510_v13 }
 0x209   : > { %v2282_v23 = vpop.eup %2281  ;;  %v1499_v17 = vmul.f32 %v2280_v12, %v2278_v29  ;;  %2297 = vtanh.f32 %v1241_v61 }
 0x20a   : > { %v2284_v5 = vpop.eup %2283 }
 0x20b   : > { %v2286_v9 = vpop.eup %2285  ;;  %v1500_v26 = vmul.f32 %v2284_v5, %v2282_v23 }
 0x20c   : > { %v1407_v10 = vadd.f32 1.0, %v2286_v9 }
 0x20d   : > { %v2288_v15 = vpop.eup %2287  ;;  %v1519_v27 = vpack.c.bf16 %v1500_v26, %v1499_v17 }
 0x20e   : > { %2299 = vrcp.f32 %v1407_v10  ;;  %v1408_v46 = vadd.f32 1.0, %v2288_v15  ;;  %v2290_v14 = vpop.eup %2289 }
 0x20f   : > { %2301 = vtanh.f32 %v1245_v50  ;;  %1823 = vmatprep.subr.bf16.mxu1 %v1519_v27 }
 0x210   : > { %v2292_v44 = vpop.eup %2291  ;;  %2303 = vrcp.f32 %v1408_v46  ;;  %1824 = vmatpush3.bf16.xpose.msra.mxu1 %v1511_v57  ;;  %v1577_v57 = vunpack.c.l.s4 %v2440_v42 }
 0x211   : > { %v2294_v48 = vpop.eup %2293  ;;  %v1501_v63 = vmul.f32 %v2292_v44, %v2290_v14 }
 0x212   : > { %v2296_v13 = vpop.eup %2295  ;;  %v1578_v51 = vunpack.c.0.s8 %v1577_v57 }
 0x213   : > { %v1502_v56 = vmul.f32 %v2296_v13, %v2294_v48  ;;  %v2298_v21 = vpop.eup %2297 }
 0x214   : > { %v1581_v61 = vsub.s32 %v1578_v51, %v2756_v2 }
 0x215   : > { %v1520_v38 = vpack.c.bf16 %v1502_v56, %v1501_v63 }
 0x217   : > { %1825 = vmatprep.subr.bf16.mxu1 %v1520_v38 }
 0x218   : > { %v2300_v22 = vpop.eup %2299  ;;  %1826 = vmatpush3.bf16.xpose.msra.mxu1 %v1512_v40 }
 0x219   : > { %v2302_v24 = vpop.eup %2301  ;;  %v1503_v20 = vmul.f32 %v2300_v22, %v2298_v21  ;;  %v1526_v31 = vpop.permute.xlu0 %1525 }
 0x21a   : > { %v2304_v33 = vpop.eup %2303  ;;  %v1531_v11 = vrot.slane %v1526_v31, %v535_v3 }
 0x21b   : > { %v1504_v36 = vmul.f32 %v2304_v33, %v2302_v24 }
 0x21d   : > { %v1521_v37 = vpack.c.bf16 %v1504_v36, %v1503_v20 }
 0x21f   : > { %1827 = vmatprep.subr.bf16.mxu1 %v1521_v37 }
 0x220   : > { %1828 = vmatpush3.bf16.xpose.msra.mxu1 %v1513_v28 }
 0x227   : > { %1830 = vmatmul.mubr.bf16.vlgmr.msra.gmra.mrb[64].mxu1 %v2796_v30 }
 0x2fa   : > { %v1566_v40 = vpop.f32.mrb[64].mxu1 }
 0x2fb   : > { %v1567_v54 = vadd.f32 %v1566_v40, %v1531_v11  ;;  %v1568_v39 = vpop.f32.mrb[65].mxu1 }
 0x2fc   : > { %v1569_v49 = vadd.f32 %v1568_v39, %v1531_v11  ;;  %v1570_v59 = vpop.f32.mrb[66].mxu1 }
 0x2fd   : > { %v1571_v62 = vpop.f32.mrb[67].mxu1 }
 0x2fe   : > { %v1575_v28 = vcombine.low %v1567_v54, %v1569_v49 }
 0x300   : > { %v1582_v30 = vrot.slane %v1575_v28, %v1581_v61 }
 0x302   : > { %v1589_v3 = vrot.slane %v1582_v30, %v1581_v61 }
 0x304   : > { %1595 = vst.msk [vmem:[%s267_s15] sm:$0x3] %vm1593_vm0, %v1589_v3 }
 0x305   : > { %2374 = shalt.err (!%p2371_p2)
}
 0x306   : > { %s2375_s9 = scalar_lea.hbm %s2996_s18, 32  ;;  %s2379_s8 = scalar_lea.hbm %s3045_s5, 64 }
 0x307   : > { %p2376_p3 = scmp.ne.s32.totalorder %s2996_s18, %s2375_s9  ;;  %p2380_p6 = scmp.lt.u32.totalorder %s2996_s18, %s3045_s5 }
 0x308   : > { %p2381_p8 = scmp.lt.u32.totalorder %s2379_s8, %s2375_s9  ;;  %p2383_p1 = scmp.lt.u32.totalorder %s2375_s9, %s2996_s18 }
 0x309   : > { %p2377_p13 = pnand %p2376_p3, %p3061_p10 }
 0x30a   : > { %p2382_p9 = por %p2381_p8, %p2380_p6 }
 0x30b   : > { %p2378_p7 = pneg %p2377_p13 }
 0x30c   : > { %p2384_p4 = por %p2383_p1, %p2382_p9 }
 0x30e   : > { %p2385_p5 = pnand %p2384_p4, %p2378_p7 }
 0x310   : > { %2388 = shalt.err (!%p2385_p5)
}
 0x311   : > { %1964 = dma.vmem_to_hbm [thread:$0]  (%p3061_p10), %s2998_s10, 32, %s2996_s18, %s1597_s19  }
 0x312 PF: > { %s1623_s24 = sand.u32 1, %s2419_s20   ;;  %p3062_p11 = scmp.ne.s32.totalorder %s3053_s7, 0 }
 0x313   : > { %s1624_s26 = scalar_lea.sflag [#allocation5], %s1623_s24 }
 0x314   : > { %p1971_p12 = pnand %p1694_p0, %p3062_p11 }
 0x316   : > { %2414 = dma.done.wait (!%p1971_p12), %s1624_s26, 32  }
 0x317   : > { %2416 = vsyncadd (!%p1971_p12), %s1624_s26, 4294967264  ;;  %p21_p2 = scmp.ge.s32.totalorder %s2500_s25, 4   ;;  %s3063_s20 = smov %s2423_s21 }
 0x318   : > { %s3064_s21 = smov %s2427_s22  ;;  %s3065_s22 = smov %s2512_s28 }
 0x319   : > { %s3066_s23 = smov %s2500_s25  ;;  %23 = sbr.rel (!%p21_p2) target bundleno = 9 (0x9), region = 89 }
 0x320   :  { %1629 = vsyncpa [#allocation4], 1 }
 0x321   :  { %1631 = vsyncpa [#allocation4 + $0x1], 1 }
 0x322   :  { %1632 = vsyncpa [#allocation7], 1 }
 0x323   :  { %1633 = vsyncpa [#allocation5], 1 }
 0x324   :  { %1635 = vsyncpa [#allocation5 + $0x1], 1 }

</bundles_post_ra>
